<compile_context>
chip_gen: v5e
topology: v5e:2x2
jax: 0.10.0
libtpu: 0.0.40
codegen_flags: <defaults>
</compile_context>

<pallas_src>
import functools
import math

import jax
import jax.numpy as jnp
from jax.experimental import pallas as pl
from jax.experimental.pallas import tpu as pltpu


def _block_kernel(x_ref, g1_ref, be1_ref, wqkv_ref, bqkv_ref,
                  wp_ref, bp_ref, g2_ref, be2_ref,
                  w1_ref, b1_ref, w2_ref, b2_ref,
                  o_ref, attn_ref,
                  *, bs, n_tokens, n_heads, head_dim, scale, eps):
    f32 = jnp.float32
    bf16 = jnp.bfloat16
    D = n_heads * head_dim
    T = n_tokens

    x = x_ref[...].astype(f32)                       # (bs*T, D) slab, fp32 math

    def layernorm(v, g, b):
        mu = jnp.mean(v, axis=-1, keepdims=True)
        var = jnp.mean((v - mu) ** 2, axis=-1, keepdims=True)
        return (v - mu) * jax.lax.rsqrt(var + eps) * g + b

    # ---------------- attention branch ----------------
    xn1 = layernorm(x, g1_ref[0], be1_ref[0])
    qkv = jnp.dot(xn1.astype(bf16), wqkv_ref[...],
                  preferred_element_type=f32) + bqkv_ref[0]      # (bs*T, 3D) f32

    # qkv column layout after the PyTorch reshape (T, 3, H, hd):
    #   [q_h0 ... q_h{H-1} | k_h0 ... | v_h0 ...], each chunk head_dim wide.
    for si in range(bs):                   # static loop over samples in the slab
        r0 = si * T
        for h in range(n_heads):           # static loop over heads
            c = h * head_dim
            q = qkv[r0:r0 + T, c:c + head_dim] * scale           # scale folded into q
            k = qkv[r0:r0 + T, D + c:D + c + head_dim]
            v = qkv[r0:r0 + T, 2 * D + c:2 * D + c + head_dim]
            scores = jax.lax.dot_general(                        # q @ k.T, bf16 on MXU
                q.astype(bf16), k.astype(bf16),
                (((1,), (1,)), ((), ())),
                preferred_element_type=f32)                      # (T, T) f32
            scores = scores - jnp.max(scores, axis=-1, keepdims=True)
            p = jnp.exp(scores)
            p = p * pl.reciprocal(jnp.sum(p, axis=-1, keepdims=True), approx=True)
            ctx = jnp.dot(p.astype(bf16), v.astype(bf16),
                          preferred_element_type=f32)            # (T, hd)
            attn_ref[r0:r0 + T, c:c + head_dim] = ctx            # scatter into slab

    attn_out = jnp.dot(attn_ref[...].astype(bf16), wp_ref[...],
                       preferred_element_type=f32) + bp_ref[0]
    x1 = x + attn_out                                            # residual 1

    # ---------------- MLP branch ----------------
    xn2 = layernorm(x1, g2_ref[0], be2_ref[0])
    h1 = jnp.dot(xn2.astype(bf16), w1_ref[...],
                 preferred_element_type=f32) + b1_ref[0]         # (bs*T, HID) f32
    # exact GELU (PyTorch nn.GELU default, erf-based), kept in f32
    h1 = 0.5 * h1 * (1.0 + jax.lax.erf(h1 * (1.0 / math.sqrt(2.0))))
    mlp_out = jnp.dot(h1.astype(bf16), w2_ref[...],
                      preferred_element_type=f32) + b2_ref[0]    # (bs*T, D)

    o_ref[...] = (x1 + mlp_out).astype(o_ref.dtype)              # residual 2


def _pick_block_batch(B, T, D, hid, budget_bytes=16 << 20):
    """Samples per grid step: fill MXU M-dim but keep VMEM sane and grid >= 2."""
    per_sample = 4 * T * (3 * D + hid + 6 * D)      # rough f32 intermediate bytes
    cap = max(1, budget_bytes // max(per_sample, 1))
    best = 1
    for cand in range(1, B + 1):
        fits = cand <= cap and cand * T <= 1024
        splits = (B // cand) >= min(2, B)           # >=2 parallel steps (megacore/v7x)
        if B % cand == 0 and fits and splits:
            best = cand
    return best


def vit_block(x, params, *, n_heads, eps=1e-6):
    B, T, D = x.shape
    head_dim = D // n_heads
    scale = head_dim ** (-0.5)
    HID = params["w1_t"].shape[1]

    bs = _pick_block_batch(B, T, D, HID)
    nb = B // bs

    # Weights go in as bf16 (halves HBM/VMEM bytes, bf16 MXU rate); biases and
    # LayerNorm affine stay f32 and are applied to the f32 accumulators.
    bf16 = jnp.bfloat16
    wqkv = params["wqkv_t"].astype(bf16)
    wp = params["wp_t"].astype(bf16)
    w1 = params["w1_t"].astype(bf16)
    w2 = params["w2_t"].astype(bf16)

    x2 = x.reshape(B * T, D)                        # lane-dense 2-D slab layout

    kernel = functools.partial(_block_kernel, bs=bs, n_tokens=T, n_heads=n_heads,
                               head_dim=head_dim, scale=scale, eps=eps)
    args = (x2, params["g1"], params["be1"], wqkv, params["bqkv"],
            wp, params["bp"], params["g2"], params["be2"],
            w1, params["b1"], w2, params["b2"])

    def _call(weight_mode):
        def wspec(shape):                           # resident weights, constant index map
            if weight_mode is None:
                return pl.BlockSpec(shape, lambda b: (0, 0))
            return pl.BlockSpec(shape, lambda b: (0, 0), pipeline_mode=weight_mode)

        def vspec(shape):                           # small vectors (biases / LN affine)
            return pl.BlockSpec(shape, lambda b: (0, 0))

        return pl.pallas_call(
            kernel,
            out_shape=jax.ShapeDtypeStruct((B * T, D), x.dtype),
            grid_spec=pltpu.PrefetchScalarGridSpec(
                num_scalar_prefetch=0,
                grid=(nb,),
                in_specs=[
                    pl.BlockSpec((bs * T, D), lambda b: (b, 0)),   # x slab
                    vspec((1, D)), vspec((1, D)),                  # norm1 gamma/beta
                    wspec((D, 3 * D)), vspec((1, 3 * D)),          # qkv W (in,out) / b
                    wspec((D, D)), vspec((1, D)),                  # proj W / b
                    vspec((1, D)), vspec((1, D)),                  # norm2 gamma/beta
                    wspec((D, HID)), vspec((1, HID)),              # fc1 W / b
                    wspec((HID, D)), vspec((1, D)),                # fc2 W / b
                ],
                out_specs=pl.BlockSpec((bs * T, D), lambda b: (b, 0)),
                scratch_shapes=[pltpu.VMEM((bs * T, D), jnp.float32)],  # attn slab
            ),
            compiler_params=pltpu.CompilerParams(
                dimension_semantics=("parallel",),
                vmem_limit_bytes=64 * 1024 * 1024,
            ),
        )(*args)

    try:
        # Weights have a constant index map -> a second pipeline buffer is waste.
        out2 = _call(pl.Buffered(1))
    except Exception:
        out2 = _call(None)                          # fall back to default buffering
    return out2.reshape(B, T, D)


def _reference(x, p, n_heads, eps=1e-6):
    """Pure-JAX fp32 reference mirroring the PyTorch forward pass."""
    B, T, D = x.shape
    hd = D // n_heads
    scale = hd ** (-0.5)

    def ln(v, g, b):
        mu = v.mean(-1, keepdims=True)
        var = ((v - mu) ** 2).mean(-1, keepdims=True)
        return (v - mu) / jnp.sqrt(var + eps) * g[0] + b[0]

    xn1 = ln(x, p["g1"], p["be1"])
    qkv = xn1 @ p["wqkv_t"] + p["bqkv"][0]
    qkv = qkv.reshape(B, T, 3, n_heads, hd).transpose(2, 0, 3, 1, 4)
    q, k, v = qkv[0], qkv[1], qkv[2]                       # (B, H, T, hd)
    s = jnp.einsum("bhtd,bhsd->bhts", q, k) * scale
    a = jax.nn.softmax(s, axis=-1)
    o = jnp.einsum("bhts,bhsd->bhtd", a, v)
    o = o.transpose(0, 2, 1, 3).reshape(B, T, D)
    o = o @ p["wp_t"] + p["bp"][0]
    x1 = x + o
    xn2 = ln(x1, p["g2"], p["be2"])
    h = xn2 @ p["w1_t"] + p["b1"][0]
    h = 0.5 * h * (1.0 + jax.lax.erf(h / math.sqrt(2.0)))
    m = h @ p["w2_t"] + p["b2"][0]
    return x1 + m


def _init_params(key, dim, n_heads, mlp_ratio):
    hid = int(dim * mlp_ratio)
    ks = jax.random.split(key, 8)
    std = 0.02
    return {
        "g1":  jnp.ones((1, dim), jnp.float32),
        "be1": jnp.zeros((1, dim), jnp.float32),
        "wqkv_t": std * jax.random.normal(ks[0], (dim, 3 * dim), jnp.float32),
        "bqkv":   std * jax.random.normal(ks[1], (1, 3 * dim), jnp.float32),
        "wp_t":   std * jax.random.normal(ks[2], (dim, dim), jnp.float32),
        "bp":     std * jax.random.normal(ks[3], (1, dim), jnp.float32),
        "g2":  jnp.ones((1, dim), jnp.float32),
        "be2": jnp.zeros((1, dim), jnp.float32),
        "w1_t": std * jax.random.normal(ks[4], (dim, hid), jnp.float32),
        "b1":   std * jax.random.normal(ks[5], (1, hid), jnp.float32),
        "w2_t": std * jax.random.normal(ks[6], (hid, dim), jnp.float32),
        "b2":   std * jax.random.normal(ks[7], (1, dim), jnp.float32),
    }


if __name__ == "__main__":
    # Small shapes consistent with the module; B=4 exercises the multi-sample
    # (bs=2 per grid step) blocking path and a 2-step parallel grid.
    B, T, DIM, N_HEADS, MLP_RATIO = 4, 8, 32, 4, 4.0

    key = jax.random.PRNGKey(0)
    kx, kp = jax.random.split(key)
    x = jax.random.normal(kx, (B, T, DIM), jnp.float32)
    params = _init_params(kp, DIM, N_HEADS, MLP_RATIO)

    out = vit_block(x, params, n_heads=N_HEADS)
    out = jax.block_until_ready(out)

    ref = _reference(x, params, N_HEADS)
    assert out.shape == (B, T, DIM)
    max_err = float(jnp.max(jnp.abs(out - ref)))
    # bf16 matmul operands (per perf review) -> loosened tolerance vs fp32 ref.
    assert jnp.allclose(out, ref, atol=5e-3, rtol=5e-3), \
        f"mismatch vs reference (max abs err {max_err})"

    print("KERNEL_OK")
</pallas_src>

<mosaic_0001>
module attributes {stable_mosaic.version = 11 : i64} {
  func.func @_block_kernel(%arg0: i32, %arg1: memref<16x32xf32, #tpu.memory_space<vmem>>, %arg2: memref<1x32xf32, #tpu.memory_space<vmem>>, %arg3: memref<1x32xf32, #tpu.memory_space<vmem>>, %arg4: memref<32x96xbf16, #tpu.memory_space<vmem>>, %arg5: memref<1x96xf32, #tpu.memory_space<vmem>>, %arg6: memref<32x32xbf16, #tpu.memory_space<vmem>>, %arg7: memref<1x32xf32, #tpu.memory_space<vmem>>, %arg8: memref<1x32xf32, #tpu.memory_space<vmem>>, %arg9: memref<1x32xf32, #tpu.memory_space<vmem>>, %arg10: memref<32x128xbf16, #tpu.memory_space<vmem>>, %arg11: memref<1x128xf32, #tpu.memory_space<vmem>>, %arg12: memref<128x32xbf16, #tpu.memory_space<vmem>>, %arg13: memref<1x32xf32, #tpu.memory_space<vmem>>, %arg14: memref<16x32xf32, #tpu.memory_space<vmem>>, %arg15: memref<16x32xf32, #tpu.memory_space<vmem>>) attributes {dimension_semantics = [#tpu.dimension_semantics<parallel>], iteration_bounds = array<i64: 2>, scalar_prefetch = 0 : i64, scratch_operands = 1 : i64, tpu.core_type = #tpu.core_type<tc>, window_params = [{transform_indices = @transform_0, window_bounds = array<i64: 16, 32>}, {pipeline_mode = #tpu.pipeline_mode<synchronous>, transform_indices = @transform_1, window_bounds = array<i64: 1, 32>}, {pipeline_mode = #tpu.pipeline_mode<synchronous>, transform_indices = @transform_2, window_bounds = array<i64: 1, 32>}, {pipeline_mode = #tpu.pipeline_mode<synchronous>, transform_indices = @transform_3, window_bounds = array<i64: 32, 96>}, {pipeline_mode = #tpu.pipeline_mode<synchronous>, transform_indices = @transform_4, window_bounds = array<i64: 1, 96>}, {pipeline_mode = #tpu.pipeline_mode<synchronous>, transform_indices = @transform_5, window_bounds = array<i64: 32, 32>}, {pipeline_mode = #tpu.pipeline_mode<synchronous>, transform_indices = @transform_6, window_bounds = array<i64: 1, 32>}, {pipeline_mode = #tpu.pipeline_mode<synchronous>, transform_indices = @transform_7, window_bounds = array<i64: 1, 32>}, {pipeline_mode = #tpu.pipeline_mode<synchronous>, transform_indices = @transform_8, window_bounds = array<i64: 1, 32>}, {pipeline_mode = #tpu.pipeline_mode<synchronous>, transform_indices = @transform_9, window_bounds = array<i64: 32, 128>}, {pipeline_mode = #tpu.pipeline_mode<synchronous>, transform_indices = @transform_10, window_bounds = array<i64: 1, 128>}, {pipeline_mode = #tpu.pipeline_mode<synchronous>, transform_indices = @transform_11, window_bounds = array<i64: 128, 32>}, {pipeline_mode = #tpu.pipeline_mode<synchronous>, transform_indices = @transform_12, window_bounds = array<i64: 1, 32>}, {transform_indices = @transform_13, window_bounds = array<i64: 16, 32>}]} {
    %c0 = arith.constant 0 : index
    %c0_0 = arith.constant 0 : index
    %0 = vector.load %arg1[%c0, %c0_0] : memref<16x32xf32, #tpu.memory_space<vmem>>, vector<16x32xf32>
    %c0_1 = arith.constant 0 : index
    %c0_2 = arith.constant 0 : index
    %1 = vector.load %arg2[%c0_1, %c0_2] : memref<1x32xf32, #tpu.memory_space<vmem>>, vector<1x32xf32>
    %2 = vector.shape_cast %1 : vector<1x32xf32> to vector<32xf32>
    %c0_3 = arith.constant 0 : index
    %c0_4 = arith.constant 0 : index
    %3 = vector.load %arg3[%c0_3, %c0_4] : memref<1x32xf32, #tpu.memory_space<vmem>>, vector<1x32xf32>
    %4 = vector.shape_cast %3 : vector<1x32xf32> to vector<32xf32>
    %cst = arith.constant dense<0.000000e+00> : vector<16xf32>
    %5 = vector.multi_reduction <add>, %0, %cst [1] : vector<16x32xf32> to vector<16xf32>
    %6 = vector.shape_cast %5 : vector<16xf32> to vector<16x1xf32>
    %cst_5 = arith.constant 3.200000e+01 : f32
    %7 = vector.broadcast %cst_5 : f32 to vector<16x1xf32>
    %8 = arith.divf %6, %7 : vector<16x1xf32>
    %9 = vector.broadcast %8 : vector<16x1xf32> to vector<16x32xf32>
    %10 = arith.subf %0, %9 : vector<16x32xf32>
    %11 = arith.mulf %10, %10 : vector<16x32xf32>
    %cst_6 = arith.constant dense<0.000000e+00> : vector<16xf32>
    %12 = vector.multi_reduction <add>, %11, %cst_6 [1] : vector<16x32xf32> to vector<16xf32>
    %13 = vector.shape_cast %12 : vector<16xf32> to vector<16x1xf32>
    %cst_7 = arith.constant 3.200000e+01 : f32
    %14 = vector.broadcast %cst_7 : f32 to vector<16x1xf32>
    %15 = arith.divf %13, %14 : vector<16x1xf32>
    %16 = vector.broadcast %8 : vector<16x1xf32> to vector<16x32xf32>
    %17 = arith.subf %0, %16 : vector<16x32xf32>
    %cst_8 = arith.constant 9.99999997E-7 : f32
    %18 = vector.broadcast %cst_8 : f32 to vector<16x1xf32>
    %19 = arith.addf %15, %18 : vector<16x1xf32>
    %20 = math.rsqrt %19 : vector<16x1xf32>
    %21 = vector.broadcast %20 : vector<16x1xf32> to vector<16x32xf32>
    %22 = arith.mulf %17, %21 : vector<16x32xf32>
    %23 = vector.shape_cast %2 : vector<32xf32> to vector<1x32xf32>
    %24 = vector.broadcast %23 : vector<1x32xf32> to vector<16x32xf32>
    %25 = arith.mulf %22, %24 : vector<16x32xf32>
    %26 = vector.shape_cast %4 : vector<32xf32> to vector<1x32xf32>
    %27 = vector.broadcast %26 : vector<1x32xf32> to vector<16x32xf32>
    %28 = arith.addf %25, %27 : vector<16x32xf32>
    %29 = arith.truncf %28 : vector<16x32xf32> to vector<16x32xbf16>
    %c0_9 = arith.constant 0 : index
    %c0_10 = arith.constant 0 : index
    %30 = vector.load %arg4[%c0_9, %c0_10] : memref<32x96xbf16, #tpu.memory_space<vmem>>, vector<32x96xbf16>
    %cst_11 = arith.constant dense<0.000000e+00> : vector<16x96xf32>
    %31 = tpu.matmul %29, %30, %cst_11 {dimension_numbers = #tpu.dot_dimension_numbers<[1], [0], [0], [1], [0, 0, 1, 1], [], []>} : vector<16x32xbf16>, vector<32x96xbf16>, vector<16x96xf32> -> vector<16x96xf32>
    %c0_12 = arith.constant 0 : index
    %c0_13 = arith.constant 0 : index
    %32 = vector.load %arg5[%c0_12, %c0_13] : memref<1x96xf32, #tpu.memory_space<vmem>>, vector<1x96xf32>
    %33 = vector.shape_cast %32 : vector<1x96xf32> to vector<96xf32>
    %34 = vector.shape_cast %33 : vector<96xf32> to vector<1x96xf32>
    %35 = vector.broadcast %34 : vector<1x96xf32> to vector<16x96xf32>
    %36 = arith.addf %31, %35 : vector<16x96xf32>
    %37 = vector.extract_strided_slice %36 {offsets = [0, 0], sizes = [8, 8], strides = [1, 1]} : vector<16x96xf32> to vector<8x8xf32>
    %cst_14 = arith.constant 0.353553385 : f32
    %38 = vector.broadcast %cst_14 : f32 to vector<8x8xf32>
    %39 = arith.mulf %37, %38 : vector<8x8xf32>
    %40 = vector.extract_strided_slice %36 {offsets = [0, 32], sizes = [8, 8], strides = [1, 1]} : vector<16x96xf32> to vector<8x8xf32>
    %41 = vector.extract_strided_slice %36 {offsets = [0, 64], sizes = [8, 8], strides = [1, 1]} : vector<16x96xf32> to vector<8x8xf32>
    %42 = arith.truncf %39 : vector<8x8xf32> to vector<8x8xbf16>
    %43 = arith.truncf %40 : vector<8x8xf32> to vector<8x8xbf16>
    %cst_15 = arith.constant dense<0.000000e+00> : vector<8x8xf32>
    %44 = tpu.matmul %42, %43, %cst_15 {dimension_numbers = #tpu.dot_dimension_numbers<[1], [1], [0], [0], [0, 0, 1, 0], [], []>} : vector<8x8xbf16>, vector<8x8xbf16>, vector<8x8xf32> -> vector<8x8xf32>
    %cst_16 = arith.constant dense<0xFF800000> : vector<8xf32>
    %45 = vector.multi_reduction <maximumf>, %44, %cst_16 [1] : vector<8x8xf32> to vector<8xf32>
    %46 = vector.shape_cast %45 : vector<8xf32> to vector<8x1xf32>
    %47 = vector.broadcast %46 : vector<8x1xf32> to vector<8x8xf32>
    %48 = arith.subf %44, %47 : vector<8x8xf32>
    %49 = math.exp %48 : vector<8x8xf32>
    %cst_17 = arith.constant dense<0.000000e+00> : vector<8xf32>
    %50 = vector.multi_reduction <add>, %49, %cst_17 [1] : vector<8x8xf32> to vector<8xf32>
    %51 = vector.shape_cast %50 : vector<8xf32> to vector<8x1xf32>
    %52 = tpu.reciprocal %51 {approx = true} : vector<8x1xf32> -> vector<8x1xf32>
    %53 = vector.broadcast %52 : vector<8x1xf32> to vector<8x8xf32>
    %54 = arith.mulf %49, %53 : vector<8x8xf32>
    %55 = arith.truncf %54 : vector<8x8xf32> to vector<8x8xbf16>
    %56 = arith.truncf %41 : vector<8x8xf32> to vector<8x8xbf16>
    %cst_18 = arith.constant dense<0.000000e+00> : vector<8x8xf32>
    %57 = tpu.matmul %55, %56, %cst_18 {dimension_numbers = #tpu.dot_dimension_numbers<[1], [0], [0], [1], [0, 0, 1, 1], [], []>} : vector<8x8xbf16>, vector<8x8xbf16>, vector<8x8xf32> -> vector<8x8xf32>
    %c0_19 = arith.constant 0 : index
    %c0_20 = arith.constant 0 : index
    %58 = vector.load %arg15[%c0_19, %c0_20] : memref<16x32xf32, #tpu.memory_space<vmem>>, vector<8x8xf32>
    tpu.vector_store %arg15[%c0_19, %c0_20], %57 {strides = array<i32>} : memref<16x32xf32, #tpu.memory_space<vmem>>, vector<8x8xf32>,
    %59 = vector.extract_strided_slice %36 {offsets = [0, 8], sizes = [8, 8], strides = [1, 1]} : vector<16x96xf32> to vector<8x8xf32>
    %cst_21 = arith.constant 0.353553385 : f32
    %60 = vector.broadcast %cst_21 : f32 to vector<8x8xf32>
    %61 = arith.mulf %59, %60 : vector<8x8xf32>
    %62 = vector.extract_strided_slice %36 {offsets = [0, 40], sizes = [8, 8], strides = [1, 1]} : vector<16x96xf32> to vector<8x8xf32>
    %63 = vector.extract_strided_slice %36 {offsets = [0, 72], sizes = [8, 8], strides = [1, 1]} : vector<16x96xf32> to vector<8x8xf32>
    %64 = arith.truncf %61 : vector<8x8xf32> to vector<8x8xbf16>
    %65 = arith.truncf %62 : vector<8x8xf32> to vector<8x8xbf16>
    %cst_22 = arith.constant dense<0.000000e+00> : vector<8x8xf32>
    %66 = tpu.matmul %64, %65, %cst_22 {dimension_numbers = #tpu.dot_dimension_numbers<[1], [1], [0], [0], [0, 0, 1, 0], [], []>} : vector<8x8xbf16>, vector<8x8xbf16>, vector<8x8xf32> -> vector<8x8xf32>
    %cst_23 = arith.constant dense<0xFF800000> : vector<8xf32>
    %67 = vector.multi_reduction <maximumf>, %66, %cst_23 [1] : vector<8x8xf32> to vector<8xf32>
    %68 = vector.shape_cast %67 : vector<8xf32> to vector<8x1xf32>
    %69 = vector.broadcast %68 : vector<8x1xf32> to vector<8x8xf32>
    %70 = arith.subf %66, %69 : vector<8x8xf32>
    %71 = math.exp %70 : vector<8x8xf32>
    %cst_24 = arith.constant dense<0.000000e+00> : vector<8xf32>
    %72 = vector.multi_reduction <add>, %71, %cst_24 [1] : vector<8x8xf32> to vector<8xf32>
    %73 = vector.shape_cast %72 : vector<8xf32> to vector<8x1xf32>
    %74 = tpu.reciprocal %73 {approx = true} : vector<8x1xf32> -> vector<8x1xf32>
    %75 = vector.broadcast %74 : vector<8x1xf32> to vector<8x8xf32>
    %76 = arith.mulf %71, %75 : vector<8x8xf32>
    %77 = arith.truncf %76 : vector<8x8xf32> to vector<8x8xbf16>
    %78 = arith.truncf %63 : vector<8x8xf32> to vector<8x8xbf16>
    %cst_25 = arith.constant dense<0.000000e+00> : vector<8x8xf32>
    %79 = tpu.matmul %77, %78, %cst_25 {dimension_numbers = #tpu.dot_dimension_numbers<[1], [0], [0], [1], [0, 0, 1, 1], [], []>} : vector<8x8xbf16>, vector<8x8xbf16>, vector<8x8xf32> -> vector<8x8xf32>
    %c0_26 = arith.constant 0 : index
    %c8 = arith.constant 8 : index
    %80 = vector.load %arg15[%c0_26, %c8] : memref<16x32xf32, #tpu.memory_space<vmem>>, vector<8x8xf32>
    tpu.vector_store %arg15[%c0_26, %c8], %79 {strides = array<i32>} : memref<16x32xf32, #tpu.memory_space<vmem>>, vector<8x8xf32>,
    %81 = vector.extract_strided_slice %36 {offsets = [0, 16], sizes = [8, 8], strides = [1, 1]} : vector<16x96xf32> to vector<8x8xf32>
    %cst_27 = arith.constant 0.353553385 : f32
    %82 = vector.broadcast %cst_27 : f32 to vector<8x8xf32>
    %83 = arith.mulf %81, %82 : vector<8x8xf32>
    %84 = vector.extract_strided_slice %36 {offsets = [0, 48], sizes = [8, 8], strides = [1, 1]} : vector<16x96xf32> to vector<8x8xf32>
    %85 = vector.extract_strided_slice %36 {offsets = [0, 80], sizes = [8, 8], strides = [1, 1]} : vector<16x96xf32> to vector<8x8xf32>
    %86 = arith.truncf %83 : vector<8x8xf32> to vector<8x8xbf16>
    %87 = arith.truncf %84 : vector<8x8xf32> to vector<8x8xbf16>
    %cst_28 = arith.constant dense<0.000000e+00> : vector<8x8xf32>
    %88 = tpu.matmul %86, %87, %cst_28 {dimension_numbers = #tpu.dot_dimension_numbers<[1], [1], [0], [0], [0, 0, 1, 0], [], []>} : vector<8x8xbf16>, vector<8x8xbf16>, vector<8x8xf32> -> vector<8x8xf32>
    %cst_29 = arith.constant dense<0xFF800000> : vector<8xf32>
    %89 = vector.multi_reduction <maximumf>, %88, %cst_29 [1] : vector<8x8xf32> to vector<8xf32>
    %90 = vector.shape_cast %89 : vector<8xf32> to vector<8x1xf32>
    %91 = vector.broadcast %90 : vector<8x1xf32> to vector<8x8xf32>
    %92 = arith.subf %88, %91 : vector<8x8xf32>
    %93 = math.exp %92 : vector<8x8xf32>
    %cst_30 = arith.constant dense<0.000000e+00> : vector<8xf32>
    %94 = vector.multi_reduction <add>, %93, %cst_30 [1] : vector<8x8xf32> to vector<8xf32>
    %95 = vector.shape_cast %94 : vector<8xf32> to vector<8x1xf32>
    %96 = tpu.reciprocal %95 {approx = true} : vector<8x1xf32> -> vector<8x1xf32>
    %97 = vector.broadcast %96 : vector<8x1xf32> to vector<8x8xf32>
    %98 = arith.mulf %93, %97 : vector<8x8xf32>
    %99 = arith.truncf %98 : vector<8x8xf32> to vector<8x8xbf16>
    %100 = arith.truncf %85 : vector<8x8xf32> to vector<8x8xbf16>
    %cst_31 = arith.constant dense<0.000000e+00> : vector<8x8xf32>
    %101 = tpu.matmul %99, %100, %cst_31 {dimension_numbers = #tpu.dot_dimension_numbers<[1], [0], [0], [1], [0, 0, 1, 1], [], []>} : vector<8x8xbf16>, vector<8x8xbf16>, vector<8x8xf32> -> vector<8x8xf32>
    %c0_32 = arith.constant 0 : index
    %c16 = arith.constant 16 : index
    %102 = vector.load %arg15[%c0_32, %c16] : memref<16x32xf32, #tpu.memory_space<vmem>>, vector<8x8xf32>
    tpu.vector_store %arg15[%c0_32, %c16], %101 {strides = array<i32>} : memref<16x32xf32, #tpu.memory_space<vmem>>, vector<8x8xf32>,
    %103 = vector.extract_strided_slice %36 {offsets = [0, 24], sizes = [8, 8], strides = [1, 1]} : vector<16x96xf32> to vector<8x8xf32>
    %cst_33 = arith.constant 0.353553385 : f32
    %104 = vector.broadcast %cst_33 : f32 to vector<8x8xf32>
    %105 = arith.mulf %103, %104 : vector<8x8xf32>
    %106 = vector.extract_strided_slice %36 {offsets = [0, 56], sizes = [8, 8], strides = [1, 1]} : vector<16x96xf32> to vector<8x8xf32>
    %107 = vector.extract_strided_slice %36 {offsets = [0, 88], sizes = [8, 8], strides = [1, 1]} : vector<16x96xf32> to vector<8x8xf32>
    %108 = arith.truncf %105 : vector<8x8xf32> to vector<8x8xbf16>
    %109 = arith.truncf %106 : vector<8x8xf32> to vector<8x8xbf16>
    %cst_34 = arith.constant dense<0.000000e+00> : vector<8x8xf32>
    %110 = tpu.matmul %108, %109, %cst_34 {dimension_numbers = #tpu.dot_dimension_numbers<[1], [1], [0], [0], [0, 0, 1, 0], [], []>} : vector<8x8xbf16>, vector<8x8xbf16>, vector<8x8xf32> -> vector<8x8xf32>
    %cst_35 = arith.constant dense<0xFF800000> : vector<8xf32>
    %111 = vector.multi_reduction <maximumf>, %110, %cst_35 [1] : vector<8x8xf32> to vector<8xf32>
    %112 = vector.shape_cast %111 : vector<8xf32> to vector<8x1xf32>
    %113 = vector.broadcast %112 : vector<8x1xf32> to vector<8x8xf32>
    %114 = arith.subf %110, %113 : vector<8x8xf32>
    %115 = math.exp %114 : vector<8x8xf32>
    %cst_36 = arith.constant dense<0.000000e+00> : vector<8xf32>
    %116 = vector.multi_reduction <add>, %115, %cst_36 [1] : vector<8x8xf32> to vector<8xf32>
    %117 = vector.shape_cast %116 : vector<8xf32> to vector<8x1xf32>
    %118 = tpu.reciprocal %117 {approx = true} : vector<8x1xf32> -> vector<8x1xf32>
    %119 = vector.broadcast %118 : vector<8x1xf32> to vector<8x8xf32>
    %120 = arith.mulf %115, %119 : vector<8x8xf32>
    %121 = arith.truncf %120 : vector<8x8xf32> to vector<8x8xbf16>
    %122 = arith.truncf %107 : vector<8x8xf32> to vector<8x8xbf16>
    %cst_37 = arith.constant dense<0.000000e+00> : vector<8x8xf32>
    %123 = tpu.matmul %121, %122, %cst_37 {dimension_numbers = #tpu.dot_dimension_numbers<[1], [0], [0], [1], [0, 0, 1, 1], [], []>} : vector<8x8xbf16>, vector<8x8xbf16>, vector<8x8xf32> -> vector<8x8xf32>
    %c0_38 = arith.constant 0 : index
    %c24 = arith.constant 24 : index
    %124 = vector.load %arg15[%c0_38, %c24] : memref<16x32xf32, #tpu.memory_space<vmem>>, vector<8x8xf32>
    tpu.vector_store %arg15[%c0_38, %c24], %123 {strides = array<i32>} : memref<16x32xf32, #tpu.memory_space<vmem>>, vector<8x8xf32>,
    %125 = vector.extract_strided_slice %36 {offsets = [8, 0], sizes = [8, 8], strides = [1, 1]} : vector<16x96xf32> to vector<8x8xf32>
    %cst_39 = arith.constant 0.353553385 : f32
    %126 = vector.broadcast %cst_39 : f32 to vector<8x8xf32>
    %127 = arith.mulf %125, %126 : vector<8x8xf32>
    %128 = vector.extract_strided_slice %36 {offsets = [8, 32], sizes = [8, 8], strides = [1, 1]} : vector<16x96xf32> to vector<8x8xf32>
    %129 = vector.extract_strided_slice %36 {offsets = [8, 64], sizes = [8, 8], strides = [1, 1]} : vector<16x96xf32> to vector<8x8xf32>
    %130 = arith.truncf %127 : vector<8x8xf32> to vector<8x8xbf16>
    %131 = arith.truncf %128 : vector<8x8xf32> to vector<8x8xbf16>
    %cst_40 = arith.constant dense<0.000000e+00> : vector<8x8xf32>
    %132 = tpu.matmul %130, %131, %cst_40 {dimension_numbers = #tpu.dot_dimension_numbers<[1], [1], [0], [0], [0, 0, 1, 0], [], []>} : vector<8x8xbf16>, vector<8x8xbf16>, vector<8x8xf32> -> vector<8x8xf32>
    %cst_41 = arith.constant dense<0xFF800000> : vector<8xf32>
    %133 = vector.multi_reduction <maximumf>, %132, %cst_41 [1] : vector<8x8xf32> to vector<8xf32>
    %134 = vector.shape_cast %133 : vector<8xf32> to vector<8x1xf32>
    %135 = vector.broadcast %134 : vector<8x1xf32> to vector<8x8xf32>
    %136 = arith.subf %132, %135 : vector<8x8xf32>
    %137 = math.exp %136 : vector<8x8xf32>
    %cst_42 = arith.constant dense<0.000000e+00> : vector<8xf32>
    %138 = vector.multi_reduction <add>, %137, %cst_42 [1] : vector<8x8xf32> to vector<8xf32>
    %139 = vector.shape_cast %138 : vector<8xf32> to vector<8x1xf32>
    %140 = tpu.reciprocal %139 {approx = true} : vector<8x1xf32> -> vector<8x1xf32>
    %141 = vector.broadcast %140 : vector<8x1xf32> to vector<8x8xf32>
    %142 = arith.mulf %137, %141 : vector<8x8xf32>
    %143 = arith.truncf %142 : vector<8x8xf32> to vector<8x8xbf16>
    %144 = arith.truncf %129 : vector<8x8xf32> to vector<8x8xbf16>
    %cst_43 = arith.constant dense<0.000000e+00> : vector<8x8xf32>
    %145 = tpu.matmul %143, %144, %cst_43 {dimension_numbers = #tpu.dot_dimension_numbers<[1], [0], [0], [1], [0, 0, 1, 1], [], []>} : vector<8x8xbf16>, vector<8x8xbf16>, vector<8x8xf32> -> vector<8x8xf32>
    %c8_44 = arith.constant 8 : index
    %c0_45 = arith.constant 0 : index
    %146 = vector.load %arg15[%c8_44, %c0_45] : memref<16x32xf32, #tpu.memory_space<vmem>>, vector<8x8xf32>
    tpu.vector_store %arg15[%c8_44, %c0_45], %145 {strides = array<i32>} : memref<16x32xf32, #tpu.memory_space<vmem>>, vector<8x8xf32>,
    %147 = vector.extract_strided_slice %36 {offsets = [8, 8], sizes = [8, 8], strides = [1, 1]} : vector<16x96xf32> to vector<8x8xf32>
    %cst_46 = arith.constant 0.353553385 : f32
    %148 = vector.broadcast %cst_46 : f32 to vector<8x8xf32>
    %149 = arith.mulf %147, %148 : vector<8x8xf32>
    %150 = vector.extract_strided_slice %36 {offsets = [8, 40], sizes = [8, 8], strides = [1, 1]} : vector<16x96xf32> to vector<8x8xf32>
    %151 = vector.extract_strided_slice %36 {offsets = [8, 72], sizes = [8, 8], strides = [1, 1]} : vector<16x96xf32> to vector<8x8xf32>
    %152 = arith.truncf %149 : vector<8x8xf32> to vector<8x8xbf16>
    %153 = arith.truncf %150 : vector<8x8xf32> to vector<8x8xbf16>
    %cst_47 = arith.constant dense<0.000000e+00> : vector<8x8xf32>
    %154 = tpu.matmul %152, %153, %cst_47 {dimension_numbers = #tpu.dot_dimension_numbers<[1], [1], [0], [0], [0, 0, 1, 0], [], []>} : vector<8x8xbf16>, vector<8x8xbf16>, vector<8x8xf32> -> vector<8x8xf32>
    %cst_48 = arith.constant dense<0xFF800000> : vector<8xf32>
    %155 = vector.multi_reduction <maximumf>, %154, %cst_48 [1] : vector<8x8xf32> to vector<8xf32>
    %156 = vector.shape_cast %155 : vector<8xf32> to vector<8x1xf32>
    %157 = vector.broadcast %156 : vector<8x1xf32> to vector<8x8xf32>
    %158 = arith.subf %154, %157 : vector<8x8xf32>
    %159 = math.exp %158 : vector<8x8xf32>
    %cst_49 = arith.constant dense<0.000000e+00> : vector<8xf32>
    %160 = vector.multi_reduction <add>, %159, %cst_49 [1] : vector<8x8xf32> to vector<8xf32>
    %161 = vector.shape_cast %160 : vector<8xf32> to vector<8x1xf32>
    %162 = tpu.reciprocal %161 {approx = true} : vector<8x1xf32> -> vector<8x1xf32>
    %163 = vector.broadcast %162 : vector<8x1xf32> to vector<8x8xf32>
    %164 = arith.mulf %159, %163 : vector<8x8xf32>
    %165 = arith.truncf %164 : vector<8x8xf32> to vector<8x8xbf16>
    %166 = arith.truncf %151 : vector<8x8xf32> to vector<8x8xbf16>
    %cst_50 = arith.constant dense<0.000000e+00> : vector<8x8xf32>
    %167 = tpu.matmul %165, %166, %cst_50 {dimension_numbers = #tpu.dot_dimension_numbers<[1], [0], [0], [1], [0, 0, 1, 1], [], []>} : vector<8x8xbf16>, vector<8x8xbf16>, vector<8x8xf32> -> vector<8x8xf32>
    %c8_51 = arith.constant 8 : index
    %c8_52 = arith.constant 8 : index
    %168 = vector.load %arg15[%c8_51, %c8_52] : memref<16x32xf32, #tpu.memory_space<vmem>>, vector<8x8xf32>
    tpu.vector_store %arg15[%c8_51, %c8_52], %167 {strides = array<i32>} : memref<16x32xf32, #tpu.memory_space<vmem>>, vector<8x8xf32>,
    %169 = vector.extract_strided_slice %36 {offsets = [8, 16], sizes = [8, 8], strides = [1, 1]} : vector<16x96xf32> to vector<8x8xf32>
    %cst_53 = arith.constant 0.353553385 : f32
    %170 = vector.broadcast %cst_53 : f32 to vector<8x8xf32>
    %171 = arith.mulf %169, %170 : vector<8x8xf32>
    %172 = vector.extract_strided_slice %36 {offsets = [8, 48], sizes = [8, 8], strides = [1, 1]} : vector<16x96xf32> to vector<8x8xf32>
    %173 = vector.extract_strided_slice %36 {offsets = [8, 80], sizes = [8, 8], strides = [1, 1]} : vector<16x96xf32> to vector<8x8xf32>
    %174 = arith.truncf %171 : vector<8x8xf32> to vector<8x8xbf16>
    %175 = arith.truncf %172 : vector<8x8xf32> to vector<8x8xbf16>
    %cst_54 = arith.constant dense<0.000000e+00> : vector<8x8xf32>
    %176 = tpu.matmul %174, %175, %cst_54 {dimension_numbers = #tpu.dot_dimension_numbers<[1], [1], [0], [0], [0, 0, 1, 0], [], []>} : vector<8x8xbf16>, vector<8x8xbf16>, vector<8x8xf32> -> vector<8x8xf32>
    %cst_55 = arith.constant dense<0xFF800000> : vector<8xf32>
    %177 = vector.multi_reduction <maximumf>, %176, %cst_55 [1] : vector<8x8xf32> to vector<8xf32>
    %178 = vector.shape_cast %177 : vector<8xf32> to vector<8x1xf32>
    %179 = vector.broadcast %178 : vector<8x1xf32> to vector<8x8xf32>
    %180 = arith.subf %176, %179 : vector<8x8xf32>
    %181 = math.exp %180 : vector<8x8xf32>
    %cst_56 = arith.constant dense<0.000000e+00> : vector<8xf32>
    %182 = vector.multi_reduction <add>, %181, %cst_56 [1] : vector<8x8xf32> to vector<8xf32>
    %183 = vector.shape_cast %182 : vector<8xf32> to vector<8x1xf32>
    %184 = tpu.reciprocal %183 {approx = true} : vector<8x1xf32> -> vector<8x1xf32>
    %185 = vector.broadcast %184 : vector<8x1xf32> to vector<8x8xf32>
    %186 = arith.mulf %181, %185 : vector<8x8xf32>
    %187 = arith.truncf %186 : vector<8x8xf32> to vector<8x8xbf16>
    %188 = arith.truncf %173 : vector<8x8xf32> to vector<8x8xbf16>
    %cst_57 = arith.constant dense<0.000000e+00> : vector<8x8xf32>
    %189 = tpu.matmul %187, %188, %cst_57 {dimension_numbers = #tpu.dot_dimension_numbers<[1], [0], [0], [1], [0, 0, 1, 1], [], []>} : vector<8x8xbf16>, vector<8x8xbf16>, vector<8x8xf32> -> vector<8x8xf32>
    %c8_58 = arith.constant 8 : index
    %c16_59 = arith.constant 16 : index
    %190 = vector.load %arg15[%c8_58, %c16_59] : memref<16x32xf32, #tpu.memory_space<vmem>>, vector<8x8xf32>
    tpu.vector_store %arg15[%c8_58, %c16_59], %189 {strides = array<i32>} : memref<16x32xf32, #tpu.memory_space<vmem>>, vector<8x8xf32>,
    %191 = vector.extract_strided_slice %36 {offsets = [8, 24], sizes = [8, 8], strides = [1, 1]} : vector<16x96xf32> to vector<8x8xf32>
    %cst_60 = arith.constant 0.353553385 : f32
    %192 = vector.broadcast %cst_60 : f32 to vector<8x8xf32>
    %193 = arith.mulf %191, %192 : vector<8x8xf32>
    %194 = vector.extract_strided_slice %36 {offsets = [8, 56], sizes = [8, 8], strides = [1, 1]} : vector<16x96xf32> to vector<8x8xf32>
    %195 = vector.extract_strided_slice %36 {offsets = [8, 88], sizes = [8, 8], strides = [1, 1]} : vector<16x96xf32> to vector<8x8xf32>
    %196 = arith.truncf %193 : vector<8x8xf32> to vector<8x8xbf16>
    %197 = arith.truncf %194 : vector<8x8xf32> to vector<8x8xbf16>
    %cst_61 = arith.constant dense<0.000000e+00> : vector<8x8xf32>
    %198 = tpu.matmul %196, %197, %cst_61 {dimension_numbers = #tpu.dot_dimension_numbers<[1], [1], [0], [0], [0, 0, 1, 0], [], []>} : vector<8x8xbf16>, vector<8x8xbf16>, vector<8x8xf32> -> vector<8x8xf32>
    %cst_62 = arith.constant dense<0xFF800000> : vector<8xf32>
    %199 = vector.multi_reduction <maximumf>, %198, %cst_62 [1] : vector<8x8xf32> to vector<8xf32>
    %200 = vector.shape_cast %199 : vector<8xf32> to vector<8x1xf32>
    %201 = vector.broadcast %200 : vector<8x1xf32> to vector<8x8xf32>
    %202 = arith.subf %198, %201 : vector<8x8xf32>
    %203 = math.exp %202 : vector<8x8xf32>
    %cst_63 = arith.constant dense<0.000000e+00> : vector<8xf32>
    %204 = vector.multi_reduction <add>, %203, %cst_63 [1] : vector<8x8xf32> to vector<8xf32>
    %205 = vector.shape_cast %204 : vector<8xf32> to vector<8x1xf32>
    %206 = tpu.reciprocal %205 {approx = true} : vector<8x1xf32> -> vector<8x1xf32>
    %207 = vector.broadcast %206 : vector<8x1xf32> to vector<8x8xf32>
    %208 = arith.mulf %203, %207 : vector<8x8xf32>
    %209 = arith.truncf %208 : vector<8x8xf32> to vector<8x8xbf16>
    %210 = arith.truncf %195 : vector<8x8xf32> to vector<8x8xbf16>
    %cst_64 = arith.constant dense<0.000000e+00> : vector<8x8xf32>
    %211 = tpu.matmul %209, %210, %cst_64 {dimension_numbers = #tpu.dot_dimension_numbers<[1], [0], [0], [1], [0, 0, 1, 1], [], []>} : vector<8x8xbf16>, vector<8x8xbf16>, vector<8x8xf32> -> vector<8x8xf32>
    %c8_65 = arith.constant 8 : index
    %c24_66 = arith.constant 24 : index
    %212 = vector.load %arg15[%c8_65, %c24_66] : memref<16x32xf32, #tpu.memory_space<vmem>>, vector<8x8xf32>
    tpu.vector_store %arg15[%c8_65, %c24_66], %211 {strides = array<i32>} : memref<16x32xf32, #tpu.memory_space<vmem>>, vector<8x8xf32>,
    %c0_67 = arith.constant 0 : index
    %c0_68 = arith.constant 0 : index
    %213 = vector.load %arg15[%c0_67, %c0_68] : memref<16x32xf32, #tpu.memory_space<vmem>>, vector<16x32xf32>
    %214 = arith.truncf %213 : vector<16x32xf32> to vector<16x32xbf16>
    %c0_69 = arith.constant 0 : index
    %c0_70 = arith.constant 0 : index
    %215 = vector.load %arg6[%c0_69, %c0_70] : memref<32x32xbf16, #tpu.memory_space<vmem>>, vector<32x32xbf16>
    %cst_71 = arith.constant dense<0.000000e+00> : vector<16x32xf32>
    %216 = tpu.matmul %214, %215, %cst_71 {dimension_numbers = #tpu.dot_dimension_numbers<[1], [0], [0], [1], [0, 0, 1, 1], [], []>} : vector<16x32xbf16>, vector<32x32xbf16>, vector<16x32xf32> -> vector<16x32xf32>
    %c0_72 = arith.constant 0 : index
    %c0_73 = arith.constant 0 : index
    %217 = vector.load %arg7[%c0_72, %c0_73] : memref<1x32xf32, #tpu.memory_space<vmem>>, vector<1x32xf32>
    %218 = vector.shape_cast %217 : vector<1x32xf32> to vector<32xf32>
    %219 = vector.shape_cast %218 : vector<32xf32> to vector<1x32xf32>
    %220 = vector.broadcast %219 : vector<1x32xf32> to vector<16x32xf32>
    %221 = arith.addf %216, %220 : vector<16x32xf32>
    %222 = arith.addf %0, %221 : vector<16x32xf32>
    %c0_74 = arith.constant 0 : index
    %c0_75 = arith.constant 0 : index
    %223 = vector.load %arg8[%c0_74, %c0_75] : memref<1x32xf32, #tpu.memory_space<vmem>>, vector<1x32xf32>
    %224 = vector.shape_cast %223 : vector<1x32xf32> to vector<32xf32>
    %c0_76 = arith.constant 0 : index
    %c0_77 = arith.constant 0 : index
    %225 = vector.load %arg9[%c0_76, %c0_77] : memref<1x32xf32, #tpu.memory_space<vmem>>, vector<1x32xf32>
    %226 = vector.shape_cast %225 : vector<1x32xf32> to vector<32xf32>
    %cst_78 = arith.constant dense<0.000000e+00> : vector<16xf32>
    %227 = vector.multi_reduction <add>, %222, %cst_78 [1] : vector<16x32xf32> to vector<16xf32>
    %228 = vector.shape_cast %227 : vector<16xf32> to vector<16x1xf32>
    %cst_79 = arith.constant 3.200000e+01 : f32
    %229 = vector.broadcast %cst_79 : f32 to vector<16x1xf32>
    %230 = arith.divf %228, %229 : vector<16x1xf32>
    %231 = vector.broadcast %230 : vector<16x1xf32> to vector<16x32xf32>
    %232 = arith.subf %222, %231 : vector<16x32xf32>
    %233 = arith.mulf %232, %232 : vector<16x32xf32>
    %cst_80 = arith.constant dense<0.000000e+00> : vector<16xf32>
    %234 = vector.multi_reduction <add>, %233, %cst_80 [1] : vector<16x32xf32> to vector<16xf32>
    %235 = vector.shape_cast %234 : vector<16xf32> to vector<16x1xf32>
    %cst_81 = arith.constant 3.200000e+01 : f32
    %236 = vector.broadcast %cst_81 : f32 to vector<16x1xf32>
    %237 = arith.divf %235, %236 : vector<16x1xf32>
    %238 = vector.broadcast %230 : vector<16x1xf32> to vector<16x32xf32>
    %239 = arith.subf %222, %238 : vector<16x32xf32>
    %cst_82 = arith.constant 9.99999997E-7 : f32
    %240 = vector.broadcast %cst_82 : f32 to vector<16x1xf32>
    %241 = arith.addf %237, %240 : vector<16x1xf32>
    %242 = math.rsqrt %241 : vector<16x1xf32>
    %243 = vector.broadcast %242 : vector<16x1xf32> to vector<16x32xf32>
    %244 = arith.mulf %239, %243 : vector<16x32xf32>
    %245 = vector.shape_cast %224 : vector<32xf32> to vector<1x32xf32>
    %246 = vector.broadcast %245 : vector<1x32xf32> to vector<16x32xf32>
    %247 = arith.mulf %244, %246 : vector<16x32xf32>
    %248 = vector.shape_cast %226 : vector<32xf32> to vector<1x32xf32>
    %249 = vector.broadcast %248 : vector<1x32xf32> to vector<16x32xf32>
    %250 = arith.addf %247, %249 : vector<16x32xf32>
    %251 = arith.truncf %250 : vector<16x32xf32> to vector<16x32xbf16>
    %c0_83 = arith.constant 0 : index
    %c0_84 = arith.constant 0 : index
    %252 = vector.load %arg10[%c0_83, %c0_84] : memref<32x128xbf16, #tpu.memory_space<vmem>>, vector<32x128xbf16>
    %cst_85 = arith.constant dense<0.000000e+00> : vector<16x128xf32>
    %253 = tpu.matmul %251, %252, %cst_85 {dimension_numbers = #tpu.dot_dimension_numbers<[1], [0], [0], [1], [0, 0, 1, 1], [], []>} : vector<16x32xbf16>, vector<32x128xbf16>, vector<16x128xf32> -> vector<16x128xf32>
    %c0_86 = arith.constant 0 : index
    %c0_87 = arith.constant 0 : index
    %254 = vector.load %arg11[%c0_86, %c0_87] : memref<1x128xf32, #tpu.memory_space<vmem>>, vector<1x128xf32>
    %255 = vector.shape_cast %254 : vector<1x128xf32> to vector<128xf32>
    %256 = vector.shape_cast %255 : vector<128xf32> to vector<1x128xf32>
    %257 = vector.broadcast %256 : vector<1x128xf32> to vector<16x128xf32>
    %258 = arith.addf %253, %257 : vector<16x128xf32>
    %cst_88 = arith.constant 5.000000e-01 : f32
    %259 = vector.broadcast %cst_88 : f32 to vector<16x128xf32>
    %260 = arith.mulf %259, %258 : vector<16x128xf32>
    %cst_89 = arith.constant 0.707106769 : f32
    %261 = vector.broadcast %cst_89 : f32 to vector<16x128xf32>
    %262 = arith.mulf %258, %261 : vector<16x128xf32>
    %263 = math.erf %262 : vector<16x128xf32>
    %cst_90 = arith.constant 1.000000e+00 : f32
    %264 = vector.broadcast %cst_90 : f32 to vector<16x128xf32>
    %265 = arith.addf %264, %263 : vector<16x128xf32>
    %266 = arith.mulf %260, %265 : vector<16x128xf32>
    %267 = arith.truncf %266 : vector<16x128xf32> to vector<16x128xbf16>
    %c0_91 = arith.constant 0 : index
    %c0_92 = arith.constant 0 : index
    %268 = vector.load %arg12[%c0_91, %c0_92] : memref<128x32xbf16, #tpu.memory_space<vmem>>, vector<128x32xbf16>
    %cst_93 = arith.constant dense<0.000000e+00> : vector<16x32xf32>
    %269 = tpu.matmul %267, %268, %cst_93 {dimension_numbers = #tpu.dot_dimension_numbers<[1], [0], [0], [1], [0, 0, 1, 1], [], []>} : vector<16x128xbf16>, vector<128x32xbf16>, vector<16x32xf32> -> vector<16x32xf32>
    %c0_94 = arith.constant 0 : index
    %c0_95 = arith.constant 0 : index
    %270 = vector.load %arg13[%c0_94, %c0_95] : memref<1x32xf32, #tpu.memory_space<vmem>>, vector<1x32xf32>
    %271 = vector.shape_cast %270 : vector<1x32xf32> to vector<32xf32>
    %272 = vector.shape_cast %271 : vector<32xf32> to vector<1x32xf32>
    %273 = vector.broadcast %272 : vector<1x32xf32> to vector<16x32xf32>
    %274 = arith.addf %269, %273 : vector<16x32xf32>
    %275 = arith.addf %222, %274 : vector<16x32xf32>
    %c0_96 = arith.constant 0 : index
    %c0_97 = arith.constant 0 : index
    %276 = vector.load %arg14[%c0_96, %c0_97] : memref<16x32xf32, #tpu.memory_space<vmem>>, vector<16x32xf32>
    tpu.vector_store %arg14[%c0_96, %c0_97], %275 {strides = array<i32>} : memref<16x32xf32, #tpu.memory_space<vmem>>, vector<16x32xf32>,
    return
  }
  func.func @transform_0(%arg0: i32) -> (i32, i32) {
    %c0_i32 = arith.constant 0 : i32
    %c0_i32_0 = arith.constant 0 : i32
    return %arg0, %c0_i32 : i32, i32
  }
  func.func @transform_1(%arg0: i32) -> (i32, i32) {
    %c0_i32 = arith.constant 0 : i32
    %c0_i32_0 = arith.constant 0 : i32
    %c0_i32_1 = arith.constant 0 : i32
    return %c0_i32, %c0_i32_0 : i32, i32
  }
  func.func @transform_2(%arg0: i32) -> (i32, i32) {
    %c0_i32 = arith.constant 0 : i32
    %c0_i32_0 = arith.constant 0 : i32
    %c0_i32_1 = arith.constant 0 : i32
    return %c0_i32, %c0_i32_0 : i32, i32
  }
  func.func @transform_3(%arg0: i32) -> (i32, i32) {
    %c0_i32 = arith.constant 0 : i32
    %c0_i32_0 = arith.constant 0 : i32
    %c0_i32_1 = arith.constant 0 : i32
    return %c0_i32, %c0_i32_0 : i32, i32
  }
  func.func @transform_4(%arg0: i32) -> (i32, i32) {
    %c0_i32 = arith.constant 0 : i32
    %c0_i32_0 = arith.constant 0 : i32
    %c0_i32_1 = arith.constant 0 : i32
    return %c0_i32, %c0_i32_0 : i32, i32
  }
  func.func @transform_5(%arg0: i32) -> (i32, i32) {
    %c0_i32 = arith.constant 0 : i32
    %c0_i32_0 = arith.constant 0 : i32
    %c0_i32_1 = arith.constant 0 : i32
    return %c0_i32, %c0_i32_0 : i32, i32
  }
  func.func @transform_6(%arg0: i32) -> (i32, i32) {
    %c0_i32 = arith.constant 0 : i32
    %c0_i32_0 = arith.constant 0 : i32
    %c0_i32_1 = arith.constant 0 : i32
    return %c0_i32, %c0_i32_0 : i32, i32
  }
  func.func @transform_7(%arg0: i32) -> (i32, i32) {
    %c0_i32 = arith.constant 0 : i32
    %c0_i32_0 = arith.constant 0 : i32
    %c0_i32_1 = arith.constant 0 : i32
    return %c0_i32, %c0_i32_0 : i32, i32
  }
  func.func @transform_8(%arg0: i32) -> (i32, i32) {
    %c0_i32 = arith.constant 0 : i32
    %c0_i32_0 = arith.constant 0 : i32
    %c0_i32_1 = arith.constant 0 : i32
    return %c0_i32, %c0_i32_0 : i32, i32
  }
  func.func @transform_9(%arg0: i32) -> (i32, i32) {
    %c0_i32 = arith.constant 0 : i32
    %c0_i32_0 = arith.constant 0 : i32
    %c0_i32_1 = arith.constant 0 : i32
    return %c0_i32, %c0_i32_0 : i32, i32
  }
  func.func @transform_10(%arg0: i32) -> (i32, i32) {
    %c0_i32 = arith.constant 0 : i32
    %c0_i32_0 = arith.constant 0 : i32
    %c0_i32_1 = arith.constant 0 : i32
    return %c0_i32, %c0_i32_0 : i32, i32
  }
  func.func @transform_11(%arg0: i32) -> (i32, i32) {
    %c0_i32 = arith.constant 0 : i32
    %c0_i32_0 = arith.constant 0 : i32
    %c0_i32_1 = arith.constant 0 : i32
    return %c0_i32, %c0_i32_0 : i32, i32
  }
  func.func @transform_12(%arg0: i32) -> (i32, i32) {
    %c0_i32 = arith.constant 0 : i32
    %c0_i32_0 = arith.constant 0 : i32
    %c0_i32_1 = arith.constant 0 : i32
    return %c0_i32, %c0_i32_0 : i32, i32
  }
  func.func @transform_13(%arg0: i32) -> (i32, i32) {
    %c0_i32 = arith.constant 0 : i32
    %c0_i32_0 = arith.constant 0 : i32
    return %arg0, %c0_i32 : i32, i32
  }
}

module attributes {stable_mosaic.version = 11 : i64} {
  func.func @_block_kernel(%arg0: i32, %arg1: memref<16x32xf32, #tpu.memory_space<vmem>>, %arg2: memref<1x32xf32, #tpu.memory_space<vmem>>, %arg3: memref<1x32xf32, #tpu.memory_space<vmem>>, %arg4: memref<32x96xbf16, #tpu.memory_space<vmem>>, %arg5: memref<1x96xf32, #tpu.memory_space<vmem>>, %arg6: memref<32x32xbf16, #tpu.memory_space<vmem>>, %arg7: memref<1x32xf32, #tpu.memory_space<vmem>>, %arg8: memref<1x32xf32, #tpu.memory_space<vmem>>, %arg9: memref<1x32xf32, #tpu.memory_space<vmem>>, %arg10: memref<32x128xbf16, #tpu.memory_space<vmem>>, %arg11: memref<1x128xf32, #tpu.memory_space<vmem>>, %arg12: memref<128x32xbf16, #tpu.memory_space<vmem>>, %arg13: memref<1x32xf32, #tpu.memory_space<vmem>>, %arg14: memref<16x32xf32, #tpu.memory_space<vmem>>, %arg15: memref<16x32xf32, #tpu.memory_space<vmem>>) attributes {dimension_semantics = [#tpu.dimension_semantics<parallel>], iteration_bounds = array<i64: 2>, scalar_prefetch = 0 : i64, scratch_operands = 1 : i64, tpu.core_type = #tpu.core_type<tc>, window_params = [{transform_indices = @transform_0, window_bounds = array<i64: 16, 32>}, {pipeline_mode = #tpu.pipeline_mode<synchronous>, transform_indices = @transform_1, window_bounds = array<i64: 1, 32>}, {pipeline_mode = #tpu.pipeline_mode<synchronous>, transform_indices = @transform_2, window_bounds = array<i64: 1, 32>}, {pipeline_mode = #tpu.pipeline_mode<synchronous>, transform_indices = @transform_3, window_bounds = array<i64: 32, 96>}, {pipeline_mode = #tpu.pipeline_mode<synchronous>, transform_indices = @transform_4, window_bounds = array<i64: 1, 96>}, {pipeline_mode = #tpu.pipeline_mode<synchronous>, transform_indices = @transform_5, window_bounds = array<i64: 32, 32>}, {pipeline_mode = #tpu.pipeline_mode<synchronous>, transform_indices = @transform_6, window_bounds = array<i64: 1, 32>}, {pipeline_mode = #tpu.pipeline_mode<synchronous>, transform_indices = @transform_7, window_bounds = array<i64: 1, 32>}, {pipeline_mode = #tpu.pipeline_mode<synchronous>, transform_indices = @transform_8, window_bounds = array<i64: 1, 32>}, {pipeline_mode = #tpu.pipeline_mode<synchronous>, transform_indices = @transform_9, window_bounds = array<i64: 32, 128>}, {pipeline_mode = #tpu.pipeline_mode<synchronous>, transform_indices = @transform_10, window_bounds = array<i64: 1, 128>}, {pipeline_mode = #tpu.pipeline_mode<synchronous>, transform_indices = @transform_11, window_bounds = array<i64: 128, 32>}, {pipeline_mode = #tpu.pipeline_mode<synchronous>, transform_indices = @transform_12, window_bounds = array<i64: 1, 32>}, {transform_indices = @transform_13, window_bounds = array<i64: 16, 32>}]} {
    %c0 = arith.constant 0 : index
    %c0_0 = arith.constant 0 : index
    %0 = vector.load %arg1[%c0, %c0_0] : memref<16x32xf32, #tpu.memory_space<vmem>>, vector<16x32xf32>
    %c0_1 = arith.constant 0 : index
    %c0_2 = arith.constant 0 : index
    %1 = vector.load %arg2[%c0_1, %c0_2] : memref<1x32xf32, #tpu.memory_space<vmem>>, vector<1x32xf32>
    %2 = vector.shape_cast %1 : vector<1x32xf32> to vector<32xf32>
    %c0_3 = arith.constant 0 : index
    %c0_4 = arith.constant 0 : index
    %3 = vector.load %arg3[%c0_3, %c0_4] : memref<1x32xf32, #tpu.memory_space<vmem>>, vector<1x32xf32>
    %4 = vector.shape_cast %3 : vector<1x32xf32> to vector<32xf32>
    %cst = arith.constant dense<0.000000e+00> : vector<16xf32>
    %5 = vector.multi_reduction <add>, %0, %cst [1] : vector<16x32xf32> to vector<16xf32>
    %6 = vector.shape_cast %5 : vector<16xf32> to vector<16x1xf32>
    %cst_5 = arith.constant 3.200000e+01 : f32
    %7 = vector.broadcast %cst_5 : f32 to vector<16x1xf32>
    %8 = arith.divf %6, %7 : vector<16x1xf32>
    %9 = vector.broadcast %8 : vector<16x1xf32> to vector<16x32xf32>
    %10 = arith.subf %0, %9 : vector<16x32xf32>
    %11 = arith.mulf %10, %10 : vector<16x32xf32>
    %cst_6 = arith.constant dense<0.000000e+00> : vector<16xf32>
    %12 = vector.multi_reduction <add>, %11, %cst_6 [1] : vector<16x32xf32> to vector<16xf32>
    %13 = vector.shape_cast %12 : vector<16xf32> to vector<16x1xf32>
    %cst_7 = arith.constant 3.200000e+01 : f32
    %14 = vector.broadcast %cst_7 : f32 to vector<16x1xf32>
    %15 = arith.divf %13, %14 : vector<16x1xf32>
    %16 = vector.broadcast %8 : vector<16x1xf32> to vector<16x32xf32>
    %17 = arith.subf %0, %16 : vector<16x32xf32>
    %cst_8 = arith.constant 9.99999997E-7 : f32
    %18 = vector.broadcast %cst_8 : f32 to vector<16x1xf32>
    %19 = arith.addf %15, %18 : vector<16x1xf32>
    %20 = math.rsqrt %19 : vector<16x1xf32>
    %21 = vector.broadcast %20 : vector<16x1xf32> to vector<16x32xf32>
    %22 = arith.mulf %17, %21 : vector<16x32xf32>
    %23 = vector.shape_cast %2 : vector<32xf32> to vector<1x32xf32>
    %24 = vector.broadcast %23 : vector<1x32xf32> to vector<16x32xf32>
    %25 = arith.mulf %22, %24 : vector<16x32xf32>
    %26 = vector.shape_cast %4 : vector<32xf32> to vector<1x32xf32>
    %27 = vector.broadcast %26 : vector<1x32xf32> to vector<16x32xf32>
    %28 = arith.addf %25, %27 : vector<16x32xf32>
    %29 = arith.truncf %28 : vector<16x32xf32> to vector<16x32xbf16>
    %c0_9 = arith.constant 0 : index
    %c0_10 = arith.constant 0 : index
    %30 = vector.load %arg4[%c0_9, %c0_10] : memref<32x96xbf16, #tpu.memory_space<vmem>>, vector<32x96xbf16>
    %cst_11 = arith.constant dense<0.000000e+00> : vector<16x96xf32>
    %31 = tpu.matmul %29, %30, %cst_11 {dimension_numbers = #tpu.dot_dimension_numbers<[1], [0], [0], [1], [0, 0, 1, 1], [], []>} : vector<16x32xbf16>, vector<32x96xbf16>, vector<16x96xf32> -> vector<16x96xf32>
    %c0_12 = arith.constant 0 : index
    %c0_13 = arith.constant 0 : index
    %32 = vector.load %arg5[%c0_12, %c0_13] : memref<1x96xf32, #tpu.memory_space<vmem>>, vector<1x96xf32>
    %33 = vector.shape_cast %32 : vector<1x96xf32> to vector<96xf32>
    %34 = vector.shape_cast %33 : vector<96xf32> to vector<1x96xf32>
    %35 = vector.broadcast %34 : vector<1x96xf32> to vector<16x96xf32>
    %36 = arith.addf %31, %35 : vector<16x96xf32>
    %37 = vector.extract_strided_slice %36 {offsets = [0, 0], sizes = [8, 8], strides = [1, 1]} : vector<16x96xf32> to vector<8x8xf32>
    %cst_14 = arith.constant 0.353553385 : f32
    %38 = vector.broadcast %cst_14 : f32 to vector<8x8xf32>
    %39 = arith.mulf %37, %38 : vector<8x8xf32>
    %40 = vector.extract_strided_slice %36 {offsets = [0, 32], sizes = [8, 8], strides = [1, 1]} : vector<16x96xf32> to vector<8x8xf32>
    %41 = vector.extract_strided_slice %36 {offsets = [0, 64], sizes = [8, 8], strides = [1, 1]} : vector<16x96xf32> to vector<8x8xf32>
    %42 = arith.truncf %39 : vector<8x8xf32> to vector<8x8xbf16>
    %43 = arith.truncf %40 : vector<8x8xf32> to vector<8x8xbf16>
    %cst_15 = arith.constant dense<0.000000e+00> : vector<8x8xf32>
    %44 = tpu.matmul %42, %43, %cst_15 {dimension_numbers = #tpu.dot_dimension_numbers<[1], [1], [0], [0], [0, 0, 1, 0], [], []>} : vector<8x8xbf16>, vector<8x8xbf16>, vector<8x8xf32> -> vector<8x8xf32>
    %cst_16 = arith.constant dense<0xFF800000> : vector<8xf32>
    %45 = vector.multi_reduction <maximumf>, %44, %cst_16 [1] : vector<8x8xf32> to vector<8xf32>
    %46 = vector.shape_cast %45 : vector<8xf32> to vector<8x1xf32>
    %47 = vector.broadcast %46 : vector<8x1xf32> to vector<8x8xf32>
    %48 = arith.subf %44, %47 : vector<8x8xf32>
    %49 = math.exp %48 : vector<8x8xf32>
    %cst_17 = arith.constant dense<0.000000e+00> : vector<8xf32>
    %50 = vector.multi_reduction <add>, %49, %cst_17 [1] : vector<8x8xf32> to vector<8xf32>
    %51 = vector.shape_cast %50 : vector<8xf32> to vector<8x1xf32>
    %52 = tpu.reciprocal %51 {approx = true} : vector<8x1xf32> -> vector<8x1xf32>
    %53 = vector.broadcast %52 : vector<8x1xf32> to vector<8x8xf32>
    %54 = arith.mulf %49, %53 : vector<8x8xf32>
    %55 = arith.truncf %54 : vector<8x8xf32> to vector<8x8xbf16>
    %56 = arith.truncf %41 : vector<8x8xf32> to vector<8x8xbf16>
    %cst_18 = arith.constant dense<0.000000e+00> : vector<8x8xf32>
    %57 = tpu.matmul %55, %56, %cst_18 {dimension_numbers = #tpu.dot_dimension_numbers<[1], [0], [0], [1], [0, 0, 1, 1], [], []>} : vector<8x8xbf16>, vector<8x8xbf16>, vector<8x8xf32> -> vector<8x8xf32>
    %c0_19 = arith.constant 0 : index
    %c0_20 = arith.constant 0 : index
    %58 = vector.load %arg15[%c0_19, %c0_20] : memref<16x32xf32, #tpu.memory_space<vmem>>, vector<8x8xf32>
    tpu.vector_store %arg15[%c0_19, %c0_20], %57 {strides = array<i32>} : memref<16x32xf32, #tpu.memory_space<vmem>>, vector<8x8xf32>,
    %59 = vector.extract_strided_slice %36 {offsets = [0, 8], sizes = [8, 8], strides = [1, 1]} : vector<16x96xf32> to vector<8x8xf32>
    %cst_21 = arith.constant 0.353553385 : f32
    %60 = vector.broadcast %cst_21 : f32 to vector<8x8xf32>
    %61 = arith.mulf %59, %60 : vector<8x8xf32>
    %62 = vector.extract_strided_slice %36 {offsets = [0, 40], sizes = [8, 8], strides = [1, 1]} : vector<16x96xf32> to vector<8x8xf32>
    %63 = vector.extract_strided_slice %36 {offsets = [0, 72], sizes = [8, 8], strides = [1, 1]} : vector<16x96xf32> to vector<8x8xf32>
    %64 = arith.truncf %61 : vector<8x8xf32> to vector<8x8xbf16>
    %65 = arith.truncf %62 : vector<8x8xf32> to vector<8x8xbf16>
    %cst_22 = arith.constant dense<0.000000e+00> : vector<8x8xf32>
    %66 = tpu.matmul %64, %65, %cst_22 {dimension_numbers = #tpu.dot_dimension_numbers<[1], [1], [0], [0], [0, 0, 1, 0], [], []>} : vector<8x8xbf16>, vector<8x8xbf16>, vector<8x8xf32> -> vector<8x8xf32>
    %cst_23 = arith.constant dense<0xFF800000> : vector<8xf32>
    %67 = vector.multi_reduction <maximumf>, %66, %cst_23 [1] : vector<8x8xf32> to vector<8xf32>
    %68 = vector.shape_cast %67 : vector<8xf32> to vector<8x1xf32>
    %69 = vector.broadcast %68 : vector<8x1xf32> to vector<8x8xf32>
    %70 = arith.subf %66, %69 : vector<8x8xf32>
    %71 = math.exp %70 : vector<8x8xf32>
    %cst_24 = arith.constant dense<0.000000e+00> : vector<8xf32>
    %72 = vector.multi_reduction <add>, %71, %cst_24 [1] : vector<8x8xf32> to vector<8xf32>
    %73 = vector.shape_cast %72 : vector<8xf32> to vector<8x1xf32>
    %74 = tpu.reciprocal %73 {approx = true} : vector<8x1xf32> -> vector<8x1xf32>
    %75 = vector.broadcast %74 : vector<8x1xf32> to vector<8x8xf32>
    %76 = arith.mulf %71, %75 : vector<8x8xf32>
    %77 = arith.truncf %76 : vector<8x8xf32> to vector<8x8xbf16>
    %78 = arith.truncf %63 : vector<8x8xf32> to vector<8x8xbf16>
    %cst_25 = arith.constant dense<0.000000e+00> : vector<8x8xf32>
    %79 = tpu.matmul %77, %78, %cst_25 {dimension_numbers = #tpu.dot_dimension_numbers<[1], [0], [0], [1], [0, 0, 1, 1], [], []>} : vector<8x8xbf16>, vector<8x8xbf16>, vector<8x8xf32> -> vector<8x8xf32>
    %c0_26 = arith.constant 0 : index
    %c8 = arith.constant 8 : index
    %80 = vector.load %arg15[%c0_26, %c8] : memref<16x32xf32, #tpu.memory_space<vmem>>, vector<8x8xf32>
    tpu.vector_store %arg15[%c0_26, %c8], %79 {strides = array<i32>} : memref<16x32xf32, #tpu.memory_space<vmem>>, vector<8x8xf32>,
    %81 = vector.extract_strided_slice %36 {offsets = [0, 16], sizes = [8, 8], strides = [1, 1]} : vector<16x96xf32> to vector<8x8xf32>
    %cst_27 = arith.constant 0.353553385 : f32
    %82 = vector.broadcast %cst_27 : f32 to vector<8x8xf32>
    %83 = arith.mulf %81, %82 : vector<8x8xf32>
    %84 = vector.extract_strided_slice %36 {offsets = [0, 48], sizes = [8, 8], strides = [1, 1]} : vector<16x96xf32> to vector<8x8xf32>
    %85 = vector.extract_strided_slice %36 {offsets = [0, 80], sizes = [8, 8], strides = [1, 1]} : vector<16x96xf32> to vector<8x8xf32>
    %86 = arith.truncf %83 : vector<8x8xf32> to vector<8x8xbf16>
    %87 = arith.truncf %84 : vector<8x8xf32> to vector<8x8xbf16>
    %cst_28 = arith.constant dense<0.000000e+00> : vector<8x8xf32>
    %88 = tpu.matmul %86, %87, %cst_28 {dimension_numbers = #tpu.dot_dimension_numbers<[1], [1], [0], [0], [0, 0, 1, 0], [], []>} : vector<8x8xbf16>, vector<8x8xbf16>, vector<8x8xf32> -> vector<8x8xf32>
    %cst_29 = arith.constant dense<0xFF800000> : vector<8xf32>
    %89 = vector.multi_reduction <maximumf>, %88, %cst_29 [1] : vector<8x8xf32> to vector<8xf32>
    %90 = vector.shape_cast %89 : vector<8xf32> to vector<8x1xf32>
    %91 = vector.broadcast %90 : vector<8x1xf32> to vector<8x8xf32>
    %92 = arith.subf %88, %91 : vector<8x8xf32>
    %93 = math.exp %92 : vector<8x8xf32>
    %cst_30 = arith.constant dense<0.000000e+00> : vector<8xf32>
    %94 = vector.multi_reduction <add>, %93, %cst_30 [1] : vector<8x8xf32> to vector<8xf32>
    %95 = vector.shape_cast %94 : vector<8xf32> to vector<8x1xf32>
    %96 = tpu.reciprocal %95 {approx = true} : vector<8x1xf32> -> vector<8x1xf32>
    %97 = vector.broadcast %96 : vector<8x1xf32> to vector<8x8xf32>
    %98 = arith.mulf %93, %97 : vector<8x8xf32>
    %99 = arith.truncf %98 : vector<8x8xf32> to vector<8x8xbf16>
    %100 = arith.truncf %85 : vector<8x8xf32> to vector<8x8xbf16>
    %cst_31 = arith.constant dense<0.000000e+00> : vector<8x8xf32>
    %101 = tpu.matmul %99, %100, %cst_31 {dimension_numbers = #tpu.dot_dimension_numbers<[1], [0], [0], [1], [0, 0, 1, 1], [], []>} : vector<8x8xbf16>, vector<8x8xbf16>, vector<8x8xf32> -> vector<8x8xf32>
    %c0_32 = arith.constant 0 : index
    %c16 = arith.constant 16 : index
    %102 = vector.load %arg15[%c0_32, %c16] : memref<16x32xf32, #tpu.memory_space<vmem>>, vector<8x8xf32>
    tpu.vector_store %arg15[%c0_32, %c16], %101 {strides = array<i32>} : memref<16x32xf32, #tpu.memory_space<vmem>>, vector<8x8xf32>,
    %103 = vector.extract_strided_slice %36 {offsets = [0, 24], sizes = [8, 8], strides = [1, 1]} : vector<16x96xf32> to vector<8x8xf32>
    %cst_33 = arith.constant 0.353553385 : f32
    %104 = vector.broadcast %cst_33 : f32 to vector<8x8xf32>
    %105 = arith.mulf %103, %104 : vector<8x8xf32>
    %106 = vector.extract_strided_slice %36 {offsets = [0, 56], sizes = [8, 8], strides = [1, 1]} : vector<16x96xf32> to vector<8x8xf32>
    %107 = vector.extract_strided_slice %36 {offsets = [0, 88], sizes = [8, 8], strides = [1, 1]} : vector<16x96xf32> to vector<8x8xf32>
    %108 = arith.truncf %105 : vector<8x8xf32> to vector<8x8xbf16>
    %109 = arith.truncf %106 : vector<8x8xf32> to vector<8x8xbf16>
    %cst_34 = arith.constant dense<0.000000e+00> : vector<8x8xf32>
    %110 = tpu.matmul %108, %109, %cst_34 {dimension_numbers = #tpu.dot_dimension_numbers<[1], [1], [0], [0], [0, 0, 1, 0], [], []>} : vector<8x8xbf16>, vector<8x8xbf16>, vector<8x8xf32> -> vector<8x8xf32>
    %cst_35 = arith.constant dense<0xFF800000> : vector<8xf32>
    %111 = vector.multi_reduction <maximumf>, %110, %cst_35 [1] : vector<8x8xf32> to vector<8xf32>
    %112 = vector.shape_cast %111 : vector<8xf32> to vector<8x1xf32>
    %113 = vector.broadcast %112 : vector<8x1xf32> to vector<8x8xf32>
    %114 = arith.subf %110, %113 : vector<8x8xf32>
    %115 = math.exp %114 : vector<8x8xf32>
    %cst_36 = arith.constant dense<0.000000e+00> : vector<8xf32>
    %116 = vector.multi_reduction <add>, %115, %cst_36 [1] : vector<8x8xf32> to vector<8xf32>
    %117 = vector.shape_cast %116 : vector<8xf32> to vector<8x1xf32>
    %118 = tpu.reciprocal %117 {approx = true} : vector<8x1xf32> -> vector<8x1xf32>
    %119 = vector.broadcast %118 : vector<8x1xf32> to vector<8x8xf32>
    %120 = arith.mulf %115, %119 : vector<8x8xf32>
    %121 = arith.truncf %120 : vector<8x8xf32> to vector<8x8xbf16>
    %122 = arith.truncf %107 : vector<8x8xf32> to vector<8x8xbf16>
    %cst_37 = arith.constant dense<0.000000e+00> : vector<8x8xf32>
    %123 = tpu.matmul %121, %122, %cst_37 {dimension_numbers = #tpu.dot_dimension_numbers<[1], [0], [0], [1], [0, 0, 1, 1], [], []>} : vector<8x8xbf16>, vector<8x8xbf16>, vector<8x8xf32> -> vector<8x8xf32>
    %c0_38 = arith.constant 0 : index
    %c24 = arith.constant 24 : index
    %124 = vector.load %arg15[%c0_38, %c24] : memref<16x32xf32, #tpu.memory_space<vmem>>, vector<8x8xf32>
    tpu.vector_store %arg15[%c0_38, %c24], %123 {strides = array<i32>} : memref<16x32xf32, #tpu.memory_space<vmem>>, vector<8x8xf32>,
    %125 = vector.extract_strided_slice %36 {offsets = [8, 0], sizes = [8, 8], strides = [1, 1]} : vector<16x96xf32> to vector<8x8xf32>
    %cst_39 = arith.constant 0.353553385 : f32
    %126 = vector.broadcast %cst_39 : f32 to vector<8x8xf32>
    %127 = arith.mulf %125, %126 : vector<8x8xf32>
    %128 = vector.extract_strided_slice %36 {offsets = [8, 32], sizes = [8, 8], strides = [1, 1]} : vector<16x96xf32> to vector<8x8xf32>
    %129 = vector.extract_strided_slice %36 {offsets = [8, 64], sizes = [8, 8], strides = [1, 1]} : vector<16x96xf32> to vector<8x8xf32>
    %130 = arith.truncf %127 : vector<8x8xf32> to vector<8x8xbf16>
    %131 = arith.truncf %128 : vector<8x8xf32> to vector<8x8xbf16>
    %cst_40 = arith.constant dense<0.000000e+00> : vector<8x8xf32>
    %132 = tpu.matmul %130, %131, %cst_40 {dimension_numbers = #tpu.dot_dimension_numbers<[1], [1], [0], [0], [0, 0, 1, 0], [], []>} : vector<8x8xbf16>, vector<8x8xbf16>, vector<8x8xf32> -> vector<8x8xf32>
    %cst_41 = arith.constant dense<0xFF800000> : vector<8xf32>
    %133 = vector.multi_reduction <maximumf>, %132, %cst_41 [1] : vector<8x8xf32> to vector<8xf32>
    %134 = vector.shape_cast %133 : vector<8xf32> to vector<8x1xf32>
    %135 = vector.broadcast %134 : vector<8x1xf32> to vector<8x8xf32>
    %136 = arith.subf %132, %135 : vector<8x8xf32>
    %137 = math.exp %136 : vector<8x8xf32>
    %cst_42 = arith.constant dense<0.000000e+00> : vector<8xf32>
    %138 = vector.multi_reduction <add>, %137, %cst_42 [1] : vector<8x8xf32> to vector<8xf32>
    %139 = vector.shape_cast %138 : vector<8xf32> to vector<8x1xf32>
    %140 = tpu.reciprocal %139 {approx = true} : vector<8x1xf32> -> vector<8x1xf32>
    %141 = vector.broadcast %140 : vector<8x1xf32> to vector<8x8xf32>
    %142 = arith.mulf %137, %141 : vector<8x8xf32>
    %143 = arith.truncf %142 : vector<8x8xf32> to vector<8x8xbf16>
    %144 = arith.truncf %129 : vector<8x8xf32> to vector<8x8xbf16>
    %cst_43 = arith.constant dense<0.000000e+00> : vector<8x8xf32>
    %145 = tpu.matmul %143, %144, %cst_43 {dimension_numbers = #tpu.dot_dimension_numbers<[1], [0], [0], [1], [0, 0, 1, 1], [], []>} : vector<8x8xbf16>, vector<8x8xbf16>, vector<8x8xf32> -> vector<8x8xf32>
    %c8_44 = arith.constant 8 : index
    %c0_45 = arith.constant 0 : index
    %146 = vector.load %arg15[%c8_44, %c0_45] : memref<16x32xf32, #tpu.memory_space<vmem>>, vector<8x8xf32>
    tpu.vector_store %arg15[%c8_44, %c0_45], %145 {strides = array<i32>} : memref<16x32xf32, #tpu.memory_space<vmem>>, vector<8x8xf32>,
    %147 = vector.extract_strided_slice %36 {offsets = [8, 8], sizes = [8, 8], strides = [1, 1]} : vector<16x96xf32> to vector<8x8xf32>
    %cst_46 = arith.constant 0.353553385 : f32
    %148 = vector.broadcast %cst_46 : f32 to vector<8x8xf32>
    %149 = arith.mulf %147, %148 : vector<8x8xf32>
    %150 = vector.extract_strided_slice %36 {offsets = [8, 40], sizes = [8, 8], strides = [1, 1]} : vector<16x96xf32> to vector<8x8xf32>
    %151 = vector.extract_strided_slice %36 {offsets = [8, 72], sizes = [8, 8], strides = [1, 1]} : vector<16x96xf32> to vector<8x8xf32>
    %152 = arith.truncf %149 : vector<8x8xf32> to vector<8x8xbf16>
    %153 = arith.truncf %150 : vector<8x8xf32> to vector<8x8xbf16>
    %cst_47 = arith.constant dense<0.000000e+00> : vector<8x8xf32>
    %154 = tpu.matmul %152, %153, %cst_47 {dimension_numbers = #tpu.dot_dimension_numbers<[1], [1], [0], [0], [0, 0, 1, 0], [], []>} : vector<8x8xbf16>, vector<8x8xbf16>, vector<8x8xf32> -> vector<8x8xf32>
    %cst_48 = arith.constant dense<0xFF800000> : vector<8xf32>
    %155 = vector.multi_reduction <maximumf>, %154, %cst_48 [1] : vector<8x8xf32> to vector<8xf32>
    %156 = vector.shape_cast %155 : vector<8xf32> to vector<8x1xf32>
    %157 = vector.broadcast %156 : vector<8x1xf32> to vector<8x8xf32>
    %158 = arith.subf %154, %157 : vector<8x8xf32>
    %159 = math.exp %158 : vector<8x8xf32>
    %cst_49 = arith.constant dense<0.000000e+00> : vector<8xf32>
    %160 = vector.multi_reduction <add>, %159, %cst_49 [1] : vector<8x8xf32> to vector<8xf32>
    %161 = vector.shape_cast %160 : vector<8xf32> to vector<8x1xf32>
    %162 = tpu.reciprocal %161 {approx = true} : vector<8x1xf32> -> vector<8x1xf32>
    %163 = vector.broadcast %162 : vector<8x1xf32> to vector<8x8xf32>
    %164 = arith.mulf %159, %163 : vector<8x8xf32>
    %165 = arith.truncf %164 : vector<8x8xf32> to vector<8x8xbf16>
    %166 = arith.truncf %151 : vector<8x8xf32> to vector<8x8xbf16>
    %cst_50 = arith.constant dense<0.000000e+00> : vector<8x8xf32>
    %167 = tpu.matmul %165, %166, %cst_50 {dimension_numbers = #tpu.dot_dimension_numbers<[1], [0], [0], [1], [0, 0, 1, 1], [], []>} : vector<8x8xbf16>, vector<8x8xbf16>, vector<8x8xf32> -> vector<8x8xf32>
    %c8_51 = arith.constant 8 : index
    %c8_52 = arith.constant 8 : index
    %168 = vector.load %arg15[%c8_51, %c8_52] : memref<16x32xf32, #tpu.memory_space<vmem>>, vector<8x8xf32>
    tpu.vector_store %arg15[%c8_51, %c8_52], %167 {strides = array<i32>} : memref<16x32xf32, #tpu.memory_space<vmem>>, vector<8x8xf32>,
    %169 = vector.extract_strided_slice %36 {offsets = [8, 16], sizes = [8, 8], strides = [1, 1]} : vector<16x96xf32> to vector<8x8xf32>
    %cst_53 = arith.constant 0.353553385 : f32
    %170 = vector.broadcast %cst_53 : f32 to vector<8x8xf32>
    %171 = arith.mulf %169, %170 : vector<8x8xf32>
    %172 = vector.extract_strided_slice %36 {offsets = [8, 48], sizes = [8, 8], strides = [1, 1]} : vector<16x96xf32> to vector<8x8xf32>
    %173 = vector.extract_strided_slice %36 {offsets = [8, 80], sizes = [8, 8], strides = [1, 1]} : vector<16x96xf32> to vector<8x8xf32>
    %174 = arith.truncf %171 : vector<8x8xf32> to vector<8x8xbf16>
    %175 = arith.truncf %172 : vector<8x8xf32> to vector<8x8xbf16>
    %cst_54 = arith.constant dense<0.000000e+00> : vector<8x8xf32>
    %176 = tpu.matmul %174, %175, %cst_54 {dimension_numbers = #tpu.dot_dimension_numbers<[1], [1], [0], [0], [0, 0, 1, 0], [], []>} : vector<8x8xbf16>, vector<8x8xbf16>, vector<8x8xf32> -> vector<8x8xf32>
    %cst_55 = arith.constant dense<0xFF800000> : vector<8xf32>
    %177 = vector.multi_reduction <maximumf>, %176, %cst_55 [1] : vector<8x8xf32> to vector<8xf32>
    %178 = vector.shape_cast %177 : vector<8xf32> to vector<8x1xf32>
    %179 = vector.broadcast %178 : vector<8x1xf32> to vector<8x8xf32>
    %180 = arith.subf %176, %179 : vector<8x8xf32>
    %181 = math.exp %180 : vector<8x8xf32>
    %cst_56 = arith.constant dense<0.000000e+00> : vector<8xf32>
    %182 = vector.multi_reduction <add>, %181, %cst_56 [1] : vector<8x8xf32> to vector<8xf32>
    %183 = vector.shape_cast %182 : vector<8xf32> to vector<8x1xf32>
    %184 = tpu.reciprocal %183 {approx = true} : vector<8x1xf32> -> vector<8x1xf32>
    %185 = vector.broadcast %184 : vector<8x1xf32> to vector<8x8xf32>
    %186 = arith.mulf %181, %185 : vector<8x8xf32>
    %187 = arith.truncf %186 : vector<8x8xf32> to vector<8x8xbf16>
    %188 = arith.truncf %173 : vector<8x8xf32> to vector<8x8xbf16>
    %cst_57 = arith.constant dense<0.000000e+00> : vector<8x8xf32>
    %189 = tpu.matmul %187, %188, %cst_57 {dimension_numbers = #tpu.dot_dimension_numbers<[1], [0], [0], [1], [0, 0, 1, 1], [], []>} : vector<8x8xbf16>, vector<8x8xbf16>, vector<8x8xf32> -> vector<8x8xf32>
    %c8_58 = arith.constant 8 : index
    %c16_59 = arith.constant 16 : index
    %190 = vector.load %arg15[%c8_58, %c16_59] : memref<16x32xf32, #tpu.memory_space<vmem>>, vector<8x8xf32>
    tpu.vector_store %arg15[%c8_58, %c16_59], %189 {strides = array<i32>} : memref<16x32xf32, #tpu.memory_space<vmem>>, vector<8x8xf32>,
    %191 = vector.extract_strided_slice %36 {offsets = [8, 24], sizes = [8, 8], strides = [1, 1]} : vector<16x96xf32> to vector<8x8xf32>
    %cst_60 = arith.constant 0.353553385 : f32
    %192 = vector.broadcast %cst_60 : f32 to vector<8x8xf32>
    %193 = arith.mulf %191, %192 : vector<8x8xf32>
    %194 = vector.extract_strided_slice %36 {offsets = [8, 56], sizes = [8, 8], strides = [1, 1]} : vector<16x96xf32> to vector<8x8xf32>
    %195 = vector.extract_strided_slice %36 {offsets = [8, 88], sizes = [8, 8], strides = [1, 1]} : vector<16x96xf32> to vector<8x8xf32>
    %196 = arith.truncf %193 : vector<8x8xf32> to vector<8x8xbf16>
    %197 = arith.truncf %194 : vector<8x8xf32> to vector<8x8xbf16>
    %cst_61 = arith.constant dense<0.000000e+00> : vector<8x8xf32>
    %198 = tpu.matmul %196, %197, %cst_61 {dimension_numbers = #tpu.dot_dimension_numbers<[1], [1], [0], [0], [0, 0, 1, 0], [], []>} : vector<8x8xbf16>, vector<8x8xbf16>, vector<8x8xf32> -> vector<8x8xf32>
    %cst_62 = arith.constant dense<0xFF800000> : vector<8xf32>
    %199 = vector.multi_reduction <maximumf>, %198, %cst_62 [1] : vector<8x8xf32> to vector<8xf32>
    %200 = vector.shape_cast %199 : vector<8xf32> to vector<8x1xf32>
    %201 = vector.broadcast %200 : vector<8x1xf32> to vector<8x8xf32>
    %202 = arith.subf %198, %201 : vector<8x8xf32>
    %203 = math.exp %202 : vector<8x8xf32>
    %cst_63 = arith.constant dense<0.000000e+00> : vector<8xf32>
    %204 = vector.multi_reduction <add>, %203, %cst_63 [1] : vector<8x8xf32> to vector<8xf32>
    %205 = vector.shape_cast %204 : vector<8xf32> to vector<8x1xf32>
    %206 = tpu.reciprocal %205 {approx = true} : vector<8x1xf32> -> vector<8x1xf32>
    %207 = vector.broadcast %206 : vector<8x1xf32> to vector<8x8xf32>
    %208 = arith.mulf %203, %207 : vector<8x8xf32>
    %209 = arith.truncf %208 : vector<8x8xf32> to vector<8x8xbf16>
    %210 = arith.truncf %195 : vector<8x8xf32> to vector<8x8xbf16>
    %cst_64 = arith.constant dense<0.000000e+00> : vector<8x8xf32>
    %211 = tpu.matmul %209, %210, %cst_64 {dimension_numbers = #tpu.dot_dimension_numbers<[1], [0], [0], [1], [0, 0, 1, 1], [], []>} : vector<8x8xbf16>, vector<8x8xbf16>, vector<8x8xf32> -> vector<8x8xf32>
    %c8_65 = arith.constant 8 : index
    %c24_66 = arith.constant 24 : index
    %212 = vector.load %arg15[%c8_65, %c24_66] : memref<16x32xf32, #tpu.memory_space<vmem>>, vector<8x8xf32>
    tpu.vector_store %arg15[%c8_65, %c24_66], %211 {strides = array<i32>} : memref<16x32xf32, #tpu.memory_space<vmem>>, vector<8x8xf32>,
    %c0_67 = arith.constant 0 : index
    %c0_68 = arith.constant 0 : index
    %213 = vector.load %arg15[%c0_67, %c0_68] : memref<16x32xf32, #tpu.memory_space<vmem>>, vector<16x32xf32>
    %214 = arith.truncf %213 : vector<16x32xf32> to vector<16x32xbf16>
    %c0_69 = arith.constant 0 : index
    %c0_70 = arith.constant 0 : index
    %215 = vector.load %arg6[%c0_69, %c0_70] : memref<32x32xbf16, #tpu.memory_space<vmem>>, vector<32x32xbf16>
    %cst_71 = arith.constant dense<0.000000e+00> : vector<16x32xf32>
    %216 = tpu.matmul %214, %215, %cst_71 {dimension_numbers = #tpu.dot_dimension_numbers<[1], [0], [0], [1], [0, 0, 1, 1], [], []>} : vector<16x32xbf16>, vector<32x32xbf16>, vector<16x32xf32> -> vector<16x32xf32>
    %c0_72 = arith.constant 0 : index
    %c0_73 = arith.constant 0 : index
    %217 = vector.load %arg7[%c0_72, %c0_73] : memref<1x32xf32, #tpu.memory_space<vmem>>, vector<1x32xf32>
    %218 = vector.shape_cast %217 : vector<1x32xf32> to vector<32xf32>
    %219 = vector.shape_cast %218 : vector<32xf32> to vector<1x32xf32>
    %220 = vector.broadcast %219 : vector<1x32xf32> to vector<16x32xf32>
    %221 = arith.addf %216, %220 : vector<16x32xf32>
    %222 = arith.addf %0, %221 : vector<16x32xf32>
    %c0_74 = arith.constant 0 : index
    %c0_75 = arith.constant 0 : index
    %223 = vector.load %arg8[%c0_74, %c0_75] : memref<1x32xf32, #tpu.memory_space<vmem>>, vector<1x32xf32>
    %224 = vector.shape_cast %223 : vector<1x32xf32> to vector<32xf32>
    %c0_76 = arith.constant 0 : index
    %c0_77 = arith.constant 0 : index
    %225 = vector.load %arg9[%c0_76, %c0_77] : memref<1x32xf32, #tpu.memory_space<vmem>>, vector<1x32xf32>
    %226 = vector.shape_cast %225 : vector<1x32xf32> to vector<32xf32>
    %cst_78 = arith.constant dense<0.000000e+00> : vector<16xf32>
    %227 = vector.multi_reduction <add>, %222, %cst_78 [1] : vector<16x32xf32> to vector<16xf32>
    %228 = vector.shape_cast %227 : vector<16xf32> to vector<16x1xf32>
    %cst_79 = arith.constant 3.200000e+01 : f32
    %229 = vector.broadcast %cst_79 : f32 to vector<16x1xf32>
    %230 = arith.divf %228, %229 : vector<16x1xf32>
    %231 = vector.broadcast %230 : vector<16x1xf32> to vector<16x32xf32>
    %232 = arith.subf %222, %231 : vector<16x32xf32>
    %233 = arith.mulf %232, %232 : vector<16x32xf32>
    %cst_80 = arith.constant dense<0.000000e+00> : vector<16xf32>
    %234 = vector.multi_reduction <add>, %233, %cst_80 [1] : vector<16x32xf32> to vector<16xf32>
    %235 = vector.shape_cast %234 : vector<16xf32> to vector<16x1xf32>
    %cst_81 = arith.constant 3.200000e+01 : f32
    %236 = vector.broadcast %cst_81 : f32 to vector<16x1xf32>
    %237 = arith.divf %235, %236 : vector<16x1xf32>
    %238 = vector.broadcast %230 : vector<16x1xf32> to vector<16x32xf32>
    %239 = arith.subf %222, %238 : vector<16x32xf32>
    %cst_82 = arith.constant 9.99999997E-7 : f32
    %240 = vector.broadcast %cst_82 : f32 to vector<16x1xf32>
    %241 = arith.addf %237, %240 : vector<16x1xf32>
    %242 = math.rsqrt %241 : vector<16x1xf32>
    %243 = vector.broadcast %242 : vector<16x1xf32> to vector<16x32xf32>
    %244 = arith.mulf %239, %243 : vector<16x32xf32>
    %245 = vector.shape_cast %224 : vector<32xf32> to vector<1x32xf32>
    %246 = vector.broadcast %245 : vector<1x32xf32> to vector<16x32xf32>
    %247 = arith.mulf %244, %246 : vector<16x32xf32>
    %248 = vector.shape_cast %226 : vector<32xf32> to vector<1x32xf32>
    %249 = vector.broadcast %248 : vector<1x32xf32> to vector<16x32xf32>
    %250 = arith.addf %247, %249 : vector<16x32xf32>
    %251 = arith.truncf %250 : vector<16x32xf32> to vector<16x32xbf16>
    %c0_83 = arith.constant 0 : index
    %c0_84 = arith.constant 0 : index
    %252 = vector.load %arg10[%c0_83, %c0_84] : memref<32x128xbf16, #tpu.memory_space<vmem>>, vector<32x128xbf16>
    %cst_85 = arith.constant dense<0.000000e+00> : vector<16x128xf32>
    %253 = tpu.matmul %251, %252, %cst_85 {dimension_numbers = #tpu.dot_dimension_numbers<[1], [0], [0], [1], [0, 0, 1, 1], [], []>} : vector<16x32xbf16>, vector<32x128xbf16>, vector<16x128xf32> -> vector<16x128xf32>
    %c0_86 = arith.constant 0 : index
    %c0_87 = arith.constant 0 : index
    %254 = vector.load %arg11[%c0_86, %c0_87] : memref<1x128xf32, #tpu.memory_space<vmem>>, vector<1x128xf32>
    %255 = vector.shape_cast %254 : vector<1x128xf32> to vector<128xf32>
    %256 = vector.shape_cast %255 : vector<128xf32> to vector<1x128xf32>
    %257 = vector.broadcast %256 : vector<1x128xf32> to vector<16x128xf32>
    %258 = arith.addf %253, %257 : vector<16x128xf32>
    %cst_88 = arith.constant 5.000000e-01 : f32
    %259 = vector.broadcast %cst_88 : f32 to vector<16x128xf32>
    %260 = arith.mulf %259, %258 : vector<16x128xf32>
    %cst_89 = arith.constant 0.707106769 : f32
    %261 = vector.broadcast %cst_89 : f32 to vector<16x128xf32>
    %262 = arith.mulf %258, %261 : vector<16x128xf32>
    %263 = math.erf %262 : vector<16x128xf32>
    %cst_90 = arith.constant 1.000000e+00 : f32
    %264 = vector.broadcast %cst_90 : f32 to vector<16x128xf32>
    %265 = arith.addf %264, %263 : vector<16x128xf32>
    %266 = arith.mulf %260, %265 : vector<16x128xf32>
    %267 = arith.truncf %266 : vector<16x128xf32> to vector<16x128xbf16>
    %c0_91 = arith.constant 0 : index
    %c0_92 = arith.constant 0 : index
    %268 = vector.load %arg12[%c0_91, %c0_92] : memref<128x32xbf16, #tpu.memory_space<vmem>>, vector<128x32xbf16>
    %cst_93 = arith.constant dense<0.000000e+00> : vector<16x32xf32>
    %269 = tpu.matmul %267, %268, %cst_93 {dimension_numbers = #tpu.dot_dimension_numbers<[1], [0], [0], [1], [0, 0, 1, 1], [], []>} : vector<16x128xbf16>, vector<128x32xbf16>, vector<16x32xf32> -> vector<16x32xf32>
    %c0_94 = arith.constant 0 : index
    %c0_95 = arith.constant 0 : index
    %270 = vector.load %arg13[%c0_94, %c0_95] : memref<1x32xf32, #tpu.memory_space<vmem>>, vector<1x32xf32>
    %271 = vector.shape_cast %270 : vector<1x32xf32> to vector<32xf32>
    %272 = vector.shape_cast %271 : vector<32xf32> to vector<1x32xf32>
    %273 = vector.broadcast %272 : vector<1x32xf32> to vector<16x32xf32>
    %274 = arith.addf %269, %273 : vector<16x32xf32>
    %275 = arith.addf %222, %274 : vector<16x32xf32>
    %c0_96 = arith.constant 0 : index
    %c0_97 = arith.constant 0 : index
    %276 = vector.load %arg14[%c0_96, %c0_97] : memref<16x32xf32, #tpu.memory_space<vmem>>, vector<16x32xf32>
    tpu.vector_store %arg14[%c0_96, %c0_97], %275 {strides = array<i32>} : memref<16x32xf32, #tpu.memory_space<vmem>>, vector<16x32xf32>,
    return
  }
  func.func @transform_0(%arg0: i32) -> (i32, i32) {
    %c0_i32 = arith.constant 0 : i32
    %c0_i32_0 = arith.constant 0 : i32
    return %arg0, %c0_i32 : i32, i32
  }
  func.func @transform_1(%arg0: i32) -> (i32, i32) {
    %c0_i32 = arith.constant 0 : i32
    %c0_i32_0 = arith.constant 0 : i32
    %c0_i32_1 = arith.constant 0 : i32
    return %c0_i32, %c0_i32_0 : i32, i32
  }
  func.func @transform_2(%arg0: i32) -> (i32, i32) {
    %c0_i32 = arith.constant 0 : i32
    %c0_i32_0 = arith.constant 0 : i32
    %c0_i32_1 = arith.constant 0 : i32
    return %c0_i32, %c0_i32_0 : i32, i32
  }
  func.func @transform_3(%arg0: i32) -> (i32, i32) {
    %c0_i32 = arith.constant 0 : i32
    %c0_i32_0 = arith.constant 0 : i32
    %c0_i32_1 = arith.constant 0 : i32
    return %c0_i32, %c0_i32_0 : i32, i32
  }
  func.func @transform_4(%arg0: i32) -> (i32, i32) {
    %c0_i32 = arith.constant 0 : i32
    %c0_i32_0 = arith.constant 0 : i32
    %c0_i32_1 = arith.constant 0 : i32
    return %c0_i32, %c0_i32_0 : i32, i32
  }
  func.func @transform_5(%arg0: i32) -> (i32, i32) {
    %c0_i32 = arith.constant 0 : i32
    %c0_i32_0 = arith.constant 0 : i32
    %c0_i32_1 = arith.constant 0 : i32
    return %c0_i32, %c0_i32_0 : i32, i32
  }
  func.func @transform_6(%arg0: i32) -> (i32, i32) {
    %c0_i32 = arith.constant 0 : i32
    %c0_i32_0 = arith.constant 0 : i32
    %c0_i32_1 = arith.constant 0 : i32
    return %c0_i32, %c0_i32_0 : i32, i32
  }
  func.func @transform_7(%arg0: i32) -> (i32, i32) {
    %c0_i32 = arith.constant 0 : i32
    %c0_i32_0 = arith.constant 0 : i32
    %c0_i32_1 = arith.constant 0 : i32
    return %c0_i32, %c0_i32_0 : i32, i32
  }
  func.func @transform_8(%arg0: i32) -> (i32, i32) {
    %c0_i32 = arith.constant 0 : i32
    %c0_i32_0 = arith.constant 0 : i32
    %c0_i32_1 = arith.constant 0 : i32
    return %c0_i32, %c0_i32_0 : i32, i32
  }
  func.func @transform_9(%arg0: i32) -> (i32, i32) {
    %c0_i32 = arith.constant 0 : i32
    %c0_i32_0 = arith.constant 0 : i32
    %c0_i32_1 = arith.constant 0 : i32
    return %c0_i32, %c0_i32_0 : i32, i32
  }
  func.func @transform_10(%arg0: i32) -> (i32, i32) {
    %c0_i32 = arith.constant 0 : i32
    %c0_i32_0 = arith.constant 0 : i32
    %c0_i32_1 = arith.constant 0 : i32
    return %c0_i32, %c0_i32_0 : i32, i32
  }
  func.func @transform_11(%arg0: i32) -> (i32, i32) {
    %c0_i32 = arith.constant 0 : i32
    %c0_i32_0 = arith.constant 0 : i32
    %c0_i32_1 = arith.constant 0 : i32
    return %c0_i32, %c0_i32_0 : i32, i32
  }
  func.func @transform_12(%arg0: i32) -> (i32, i32) {
    %c0_i32 = arith.constant 0 : i32
    %c0_i32_0 = arith.constant 0 : i32
    %c0_i32_1 = arith.constant 0 : i32
    return %c0_i32, %c0_i32_0 : i32, i32
  }
  func.func @transform_13(%arg0: i32) -> (i32, i32) {
    %c0_i32 = arith.constant 0 : i32
    %c0_i32_0 = arith.constant 0 : i32
    return %arg0, %c0_i32 : i32, i32
  }
}

</mosaic_0001>

<bundles_post_ra>
// kernel: tpu_custom_call.1
= control target key start
LH: loop header
LB: loop body
LE: loop exit
PB: predicated region body
PF: predicated region fallthrough
CT: control target
= control target key end

     0   :  { %s2176_s0 = inlined_call_operand.vmem [shape: f32[32,32], index: 0, kind: input, shape index: {}]   ;;  %s2177_s1 = inlined_call_operand.hbm [shape: f32[1,32], index: 1, kind: input, shape index: {}]   ;;  %s2178_s2 = inlined_call_operand.vmem [shape: f32[1,32], index: 2, kind: input, shape index: {}]   ;;  %s2179_s3 = inlined_call_operand.vmem [shape: bf16[32,96], index: 3, kind: input, shape index: {}]   ;;  %s2180_s4 = inlined_call_operand.vmem [shape: f32[1,96], index: 4, kind: input, shape index: {}]   ;;  %s2181_s5 = inlined_call_operand.vmem [shape: bf16[32,32], index: 5, kind: input, shape index: {}]   ;;  %s2182_s6 = inlined_call_operand.vmem [shape: f32[1,32], index: 6, kind: input, shape index: {}]   ;;  %s2183_s7 = inlined_call_operand.vmem [shape: f32[1,32], index: 7, kind: input, shape index: {}]   ;;  %s2184_s8 = inlined_call_operand.vmem [shape: f32[1,32], index: 8, kind: input, shape index: {}]   ;;  %s2185_s9 = inlined_call_operand.vmem [shape: bf16[32,128], index: 9, kind: input, shape index: {}]   ;;  %s2186_s10 = inlined_call_operand.vmem [shape: f32[1,128], index: 10, kind: input, shape index: {}]   ;;  %s2187_s11 = inlined_call_operand.vmem [shape: bf16[128,32], index: 11, kind: input, shape index: {}]   ;;  %s2188_s12 = inlined_call_operand.vmem [shape: f32[1,32], index: 12, kind: input, shape index: {}]   ;;  %s2189_s13 = inlined_call_operand.hbm [shape: f32[32,32], index: 13, kind: output, shape index: {}]  }
   0x1   :  { %2191 = sst [smem:[#allocation10_spill]] %s2176_s0 }
   0x2   :  { %2192 = sst [smem:[#allocation11_spill]] %s2177_s1 }
   0x3   :  { %18 = vsyncpa [#allocation4], 0 }
   0x4   :  { %19 = vsyncpa [#allocation5], 0 }
   0x5   :  { %21 = vsyncpa [#allocation5 + $0x1], 0  ;;  %s1865_s25 = smov 0   ;;  %s1867_s26 = smov 0  }
   0x6   :  { %s1869_s27 = smov 0   ;;  %s1871_s28 = smov 0  }
   0x7 LB: > { %s1886_s29 = sadd.s32 4294967295, %s1776_s28   ;;  %s1454_s30 = sadd.s32 4294967294, %s1776_s28   ;;  %s1776_s28 = sphi %s1871_s28, %s2203_s28   ;;  %s1772_s27 = sphi %s1869_s27, %s2202_s27   ;;  %s1768_s26 = sphi %s1867_s26, %s2201_s26   ;;  %s1764_s25 = sphi %s1865_s25, %s2200_s25  }
   0x8   : > { %s1890_s14 = sadd.s32 1, %s1776_s28   ;;  %s312_s15 = sadd.s32 1, %s1772_s27 }
   0x9   : > { %s309_s16 = ssub.s32 %s1776_s28, %s1890_s14  ;;  %p322_p0 = scmp.ne.s32.totalorder %s1772_s27, %s1768_s26 }
   0xa   : > { %p310_p1 = scmp.eq.s32.totalorder %s309_s16, 0  ;;  %p323_p2 = scmp.eq.s32.totalorder %s1886_s29, 1 }
   0xb   : > { %p328_p3 = scmp.ne.s32.totalorder %s1768_s26, %s1764_s25  ;;  %p329_p4 = scmp.eq.s32.totalorder %s1454_s30, 1 }
   0xc   : > { %s1901_s17 = scalar_select %p310_p1, %s1772_s27, %s312_s15  }
   0xd   : > { %p1903_p5 = por %p323_p2, %p322_p0  ;;  %p1907_p6 = por %p329_p4, %p328_p3 }
   0xe   : > { %2193 = sst [smem:[#allocation9_spill]] %s1901_s17  ;;  %p1455_p7 = scmp.ge.s32.totalorder %s1776_s28, 1 }
   0xf   : > { %p336_p8 = scmp.lt.s32.totalorder %s1776_s28, 3  ;;  %p1574_p9 = scmp.eq.s32.totalorder %s1886_s29, 0 }
  0x10   : > { %s2196_s1 = sld [smem:[#allocation11_spill]]  ;;  %s1778_s23 = smov [#allocation3]  }
  0x11   : > { %p337_p10 = pnand %p1455_p7, %p336_p8  ;;  %s350_s24 = sshll.u32 %s1778_s23, 4  ;;  %s351_s24 = int_to_ptr.vmem [resolvable:$true] %s350_s24 }
  0x13   : > { %p1566_p11 = pneg %p337_p10  ;;  %405 = sbr.rel (%p337_p10) target bundleno = 2396 (0x95c), region = 72 }
  0x15   : > { %p1567_p12 = pnand %p1574_p9, %p1566_p11 }
  0x16   : > { %s348_s22 = sshll.u32 %s2196_s1, 4  ;;  %s349_s22 = int_to_ptr.hbm [resolvable:$true] %s348_s22 }
  0x17   : > { %1569 = dma.hbm_to_vmem [thread:$0]  (!%p1567_p12), %s349_s22, 16, %s351_s24, [#allocation4]  }
  0x18   : > { %1755 = dma.done.wait (%p1574_p9), [#allocation4], 16  }
  0x19   : > { %1757 = vsyncadd (%p1574_p9), [#allocation4], 4294967280  ;;  %s1461_s30 = sshll.u32 %s1886_s29, 1  ;;  %vm462_vm0 = vcmask 261120   ;;  %s2197_s0 = sld [smem:[#allocation10_spill]]  ;;  %v1779_v4 = vmov 32.0  }
  0x1a   : > { %p451_p13 = scmp.lt.s32.totalorder %s1461_s30, 3  ;;  %1634 = vrcp.f32 %v1779_v4  ;;  %v1546_v21 = vld [vmem:[%s2179_s3 + $0x8] sm:$0xff]  ;;  %v1545_v23 = vld [vmem:[%s2179_s3] sm:$0xff]  ;;  %v1626_v42 = vld [vmem:[#allocation3] ss:$0 sm:$0xff]  ;;  %s1781_s17 = smov 64  }
  0x1b   : > { %554 = vmatpush.bf16.msra.mxu0 %v1546_v21  ;;  %v1627_v47 = vld [vmem:[%s2178_s2] ss:$0 sm:$0xff]  ;;  %s1782_s21 = smov 96   ;;  %s1783_s22 = smov 120   ;;  %vm568_vm8 = vcmask 64512   ;;  %vm605_vm9 = vcmask 1043456  }
  0x1c   : > { %s2205_s30 = smov (!%p451_p13, %s1461_s30), 3  ;;  %v1628_v52 = vld [vmem:[%s2180_s4] ss:$0 sm:$0xff]  ;;  %s1784_s23 = smov 104   ;;  %vm684_vm10 = vcmask 130112   ;;  %vm746_vm11 = vcmask 195712  }
  0x1d   : > { %s1462_s15 = sshll.u32 %s2205_s30, 3  ;;  %s1785_s24 = smov 112   ;;  %vm808_vm12 = vcmask 261312  }
  0x1e   : > { %s1786_s30 = smov 80   ;;  %s1788_s16 = smov 48  }
  0x1f   : > { %s454_s20 = scalar_lea.vmem %s2197_s0, %s1462_s15  ;;  %555 = vmatpush.bf16.msra.mxu0 %v1545_v23  ;;  %s1787_s15 = smov 72  }
  0x20   : > { %v1921_v0 = vld [vmem:[%s454_s20] sm:$0xff]  ;;  %v1925_v2 = vld [vmem:[%s454_s20 + $0x8] sm:$0xff]  ;;  %v1635_v5 = vpop.eup %1634  ;;  %s1780_s20 = smov 88  }
  0x21   : > { %v463_v1 = vsel %vm462_vm0, %v1921_v0, 0.0  ;;  %v466_v3 = vsel %vm462_vm0, %v1925_v2, 0.0  ;;  %v470_v6 = vmul.f32 32.0, %v1635_v5  ;;  %vm474_vm1 = vweird.f32 %v1635_v5 }
  0x22   : > { %464 = vadd.xlane.f32.xlu0 %v463_v1 }
  0x23   : > { %v471_v7 = vsub.f32 1.0, %v470_v6 }
  0x25   : > { %v472_v8 = vmul.f32 %v1635_v5, %v471_v7 }
  0x27   : > { %v473_v9 = vadd.f32 %v1635_v5, %v472_v8 }
  0x29   : > { %v1929_v10 = vsel %vm474_vm1, %v1635_v5, %v473_v9 }
  0x2a   : > { %467 = vadd.xlane.f32.xlu0 %v466_v3 }
  0x95   : > { %v465_v11 = vpop.xlane.xlu0 %464 }
  0x96   : > { %v476_v12 = vmul.f32 %v1929_v10, %v465_v11 }
  0x98   : > { %v478_v13 = vsub.f32 %v1921_v0, %v476_v12 }
  0x9a   : > { %v480_v14 = vmul.f32 %v478_v13, %v478_v13 }
  0x9c   : > { %v482_v15 = vsel %vm462_vm0, %v480_v14, 0.0 }
  0x9d   : > { %483 = vadd.xlane.f32.xlu1 %v482_v15  ;;  %v468_v16 = vpop.xlane.xlu0 %467 }
  0x9e   : > { %v477_v17 = vmul.f32 %v1929_v10, %v468_v16 }
  0xa0   : > { %v479_v18 = vsub.f32 %v1925_v2, %v477_v17 }
  0xa2   : > { %v481_v19 = vmul.f32 %v479_v18, %v479_v18 }
  0xa4   : > { %v485_v20 = vsel %vm462_vm0, %v481_v19, 0.0 }
  0xa5   : > { %486 = vadd.xlane.f32.xlu1 %v485_v20 }
 0x110   : > { %v484_v22 = vpop.xlane.xlu1 %483 }
 0x111   : > { %v488_v24 = vmul.f32 %v484_v22, %v1929_v10 }
 0x113   : > { %v490_v25 = vadd.f32 1e-06, %v488_v24 }
 0x115   : > { %1636 = vrsqrt.f32 %v490_v25  ;;  %vm498_vm3 = vweird.f32 %v490_v25 }
 0x118   : > { %v487_v26 = vpop.xlane.xlu1 %486 }
 0x119   : > { %v489_v27 = vmul.f32 %v487_v26, %v1929_v10 }
 0x11b   : > { %v1637_v28 = vpop.eup %1636  ;;  %v491_v29 = vadd.f32 1e-06, %v489_v27 }
 0x11c   : > { %v493_v30 = vmul.f32 %v1637_v28, %v490_v25  ;;  %vm499_vm2 = vweird.f32 %v1637_v28 }
 0x11d   : > { %1638 = vrsqrt.f32 %v491_v29  ;;  %vm500_vm4 = vmor %vm498_vm3, %vm499_vm2  ;;  %vm508_vm6 = vweird.f32 %v491_v29 }
 0x11e   : > { %v494_v31 = vmul.f32 %v1637_v28, %v493_v30 }
 0x120   : > { %v495_v32 = vmul.f32 0.5, %v494_v31 }
 0x122   : > { %v496_v33 = vsub.f32 1.5, %v495_v32 }
 0x123   : > { %v1639_v34 = vpop.eup %1638 }
 0x124   : > { %v497_v35 = vmul.f32 %v1637_v28, %v496_v33  ;;  %v503_v36 = vmul.f32 %v1639_v34, %v491_v29  ;;  %vm509_vm5 = vweird.f32 %v1639_v34 }
 0x125   : > { %vm510_vm7 = vmor %vm508_vm6, %vm509_vm5 }
 0x126   : > { %v504_v37 = vmul.f32 %v1639_v34, %v503_v36  ;;  %v501_v38 = vsel %vm500_vm4, %v1637_v28, %v497_v35 }
 0x127   : > { %v512_v41 = vmul.f32 %v501_v38, %v478_v13 }
 0x128   : > { %v505_v39 = vmul.f32 0.5, %v504_v37 }
 0x129   : > { %v517_v46 = vmul.f32 %v1626_v42, %v512_v41 }
 0x12a   : > { %v506_v40 = vsub.f32 1.5, %v505_v39 }
 0x12b   : > { %v522_v49 = vadd.f32 %v1627_v47, %v517_v46 }
 0x12c   : > { %v507_v43 = vmul.f32 %v1639_v34, %v506_v40 }
 0x12e   : > { %v511_v44 = vsel %vm510_vm7, %v1639_v34, %v507_v43 }
 0x12f   : > { %v513_v45 = vmul.f32 %v511_v44, %v479_v18 }
 0x131   : > { %v518_v48 = vmul.f32 %v1626_v42, %v513_v45 }
 0x133   : > { %v523_v50 = vadd.f32 %v1627_v47, %v518_v48 }
 0x135   : > { %v524_v51 = vpack.c.bf16 %v523_v50, %v522_v49 }
 0x137   : > { %1471 = vmatmul.msk.bf16.vlgmr.msra.gmra.mxu0 %vm462_vm0, %v524_v51 }
 0x1b4   : > { %v557_v53 = vpop.f32.mrf.mxu0 }
 0x1b5   : > { %v558_v54 = vadd.f32 %v1628_v52, %v557_v53 }
 0x1b7   : > { %v1952_v55 = vpack.c.bf16 %v558_v54, %v558_v54  ;;  %v562_v56 = vmul.f32 0.35355338, %v558_v54 }
 0x1b9   : > { %626 = vrot.lane.b32.xlu0 %v1952_v55, %s1780_s20  ;;  %600 = vrot.lane.b32.xlu1 %v1952_v55, %s1781_s17  ;;  %v563_v57 = vpack.c.bf16 %v562_v56, %v562_v56 }
 0x1ba   : > { %566 = vrot.lane.b32.xlu2 %v1952_v55, %s1782_s21 }
 0x1bc   : > { %v559_v58 = vpop.f32.mrf.mxu0 }
 0x1bd   : > { %v560_v59 = vadd.f32 %v1628_v52, %v559_v58 }
 0x1bf   : > { %v1961_v60 = vpack.c.bf16 %v560_v59, %v560_v59  ;;  %v810_v61 = vmul.f32 0.35355338, %v560_v59 }
 0x1c1   : > { %624 = vrot.lane.b32.xlu1 %v563_v57, %s1783_s22  ;;  %v811_v62 = vpack.c.bf16 %v810_v61, %v810_v61 }
 0x1c9   : > { %748 = vrot.lane.b32.xlu1 %v563_v57, %s1784_s23 }
 0x1d1   : > { %686 = vrot.lane.b32.xlu1 %v563_v57, %s1785_s24 }
 0x1d9   : > { %814 = vrot.lane.b32.xlu1 %v1961_v60, %s1782_s21  ;;  %s2190_s21 = smov 8  }
 0x1e1   : > { %992 = vrot.lane.b32.xlu1 %v811_v62, %s1784_s23  ;;  %s1793_s23 = smov 24  }
 0x214   : > { %v567_v63 = vpop.permute.xlu2 %566 }
 0x215   : > { %v573_v1 = vsel %vm568_vm8, %v567_v63, 0 }
 0x216   : > { %582 = vmatpush.bf16.xpose.msra.mxu1 %v573_v1 }
 0x21d   : > { %1472 = vmatmul.msk.bf16.vlgmr.msra.gmra.mxu1 %vm568_vm8, %v563_v57 }
 0x22b   : > { %v627_v3 = vpop.permute.xlu0 %626  ;;  %v601_v4 = vpop.permute.xlu1 %600 }
 0x22c   : > { %v607_v5 = vsel %vm605_vm9, %v601_v4, 0  ;;  %v632_v6 = vsel %vm568_vm8, %v627_v3, 0 }
 0x22d   : > { %616 = vmatpush.bf16.msra.mxu2 %v607_v5 }
 0x231   : > { %641 = vmatpush.bf16.xpose.msrb.mxu2 %v632_v6 }
 0x233   : > { %v625_v11 = vpop.permute.xlu1 %624 }
 0x23b   : > { %v749_v12 = vpop.permute.xlu1 %748 }
 0x243   : > { %v687_v13 = vpop.permute.xlu1 %686 }
 0x24b   : > { %v815_v17 = vpop.permute.xlu1 %814 }
 0x24c   : > { %v820_v20 = vsel %vm568_vm8, %v815_v17, 0 }
 0x253   : > { %v993_v42 = vpop.permute.xlu1 %992 }
 0x29a   : > { %v584_v7 = vpop.f32.mrf.mxu1 }
 0x29b   : > { %v588_v8 = vsel %vm568_vm8, %v584_v7, -inf }
 0x29c   : > { %589 = vmax.xlane.f32.xlu2 %v588_v8 }
 0x2a2   : > { %v586_v9 = vpop.f32.mrf.mxu1 }
 0x2b4   : > { %688 = vrot.lane.b32.xlu2 %v1952_v55, %s1786_s30 }
 0x2bc   : > { %933 = vrot.lane.b32.xlu2 %v1961_v60, %s1786_s30 }
 0x30f   : > { %v590_v14 = vpop.xlane.xlu2 %589 }
 0x310   : > { %v591_v15 = vsub.f32 %v584_v7, %v590_v14 }
 0x312   : > { %v592_v16 = vmul.f32 1.442695, %v591_v15 }
 0x314   : > { %1640 = vpow2.f32 %v592_v16 }
 0x317   : > { %v689_v18 = vpop.permute.xlu2 %688 }
 0x318   : > { %v694_v19 = vsel %vm568_vm8, %v689_v18, 0 }
 0x319   : > { %703 = vmatpush.bf16.xpose.msrb.mxu0 %v694_v19 }
 0x31a   : > { %v1641_v21 = vpop.eup %1640 }
 0x31b   : > { %v594_v22 = vsel %vm568_vm8, %v1641_v21, 0.0 }
 0x31c   : > { %595 = vadd.xlane.f32.xlu0 %v594_v22 }
 0x31f   : > { %v934_v23 = vpop.permute.xlu2 %933 }
 0x320   : > { %v939_v24 = vsel %vm568_vm8, %v934_v23, 0  ;;  %1476 = vmatmul.msk.bf16.vlgmr.msrb.gmra.mxu0 %vm568_vm8, %v687_v13 }
 0x321   : > { %829 = vmatpush.bf16.xpose.msra.mxu0 %v820_v20 }
 0x329   : > { %948 = vmatpush.bf16.xpose.msrb.mxu0 %v939_v24 }
 0x330   : > { %750 = vrot.lane.b32.xlu0 %v1952_v55, %s1787_s15  ;;  %1480 = vmatmul.msk.bf16.vlgmr.msra.gmra.mxu0 %vm568_vm8, %v811_v62 }
 0x338   : > { %872 = vrot.lane.b32.xlu0 %v1961_v60, %s1780_s20  ;;  %s1789_s20 = smov 56  }
 0x340   : > { %870 = vrot.lane.b32.xlu0 %v811_v62, %s1783_s22  ;;  %s1792_s22 = smov 16  }
 0x348   : > { %994 = vrot.lane.b32.xlu0 %v1961_v60, %s1787_s15 }
 0x350   : > { %931 = vrot.lane.b32.xlu0 %v811_v62, %s1785_s24  ;;  %s447_s24 = sand.u32 1, %s1768_s26  }
 0x38f   : > { %v596_v25 = vpop.xlane.xlu0 %595 }
 0x390   : > { %1642 = vrcp.f32 %v596_v25 }
 0x396   : > { %v1643_v26 = vpop.eup %1642 }
 0x397   : > { %v598_v27 = vmul.f32 %v1643_v26, %v1641_v21 }
 0x399   : > { %v599_v28 = vpack.c.bf16 %v598_v27, %v598_v27 }
 0x39b   : > { %1473 = vmatmul.msk.bf16.vlgmr.msra.gmra.mxu2 %vm568_vm8, %v599_v28 }
 0x39d   : > { %v705_v29 = vpop.f32.mrf.mxu0 }
 0x39e   : > { %v709_v30 = vsel %vm568_vm8, %v705_v29, -inf }
 0x39f   : > { %710 = vmax.xlane.f32.xlu0 %v709_v30 }
 0x3a2   : > { %v751_v31 = vpop.permute.xlu0 %750 }
 0x3a3   : > { %v756_v32 = vsel %vm568_vm8, %v751_v31, 0 }
 0x3a4   : > { %765 = vmatpush.bf16.xpose.msra.mxu3 %v756_v32 }
 0x3a5   : > { %v707_v33 = vpop.f32.mrf.mxu0 }
 0x3aa   : > { %v873_v34 = vpop.permute.xlu0 %872 }
 0x3ab   : > { %1474 = vmatmul.msk.bf16.vlgmr.msrb.gmra.mxu2 %vm568_vm8, %v625_v11  ;;  %1478 = vmatmul.msk.bf16.vlgmr.msra.gmra.mxu3 %vm568_vm8, %v749_v12  ;;  %v878_v35 = vsel %vm568_vm8, %v873_v34, 0 }
 0x3ac   : > { %887 = vmatpush.bf16.xpose.msrb.mxu3 %v878_v35 }
 0x3ad   : > { %v1989_v36 = vpop.f32.mrf.mxu0 }
 0x3ae   : > { %v835_v52 = vsel %vm568_vm8, %v1989_v36, -inf }
 0x3b2   : > { %v871_v37 = vpop.permute.xlu0 %870 }
 0x3b5   : > { %v833_v38 = vpop.f32.mrf.mxu0 }
 0x3ba   : > { %v995_v39 = vpop.permute.xlu0 %994 }
 0x3bb   : > { %v1000_v40 = vsel %vm568_vm8, %v995_v39, 0  ;;  %1482 = vmatmul.msk.bf16.vlgmr.msrb.gmra.mxu3 %vm568_vm8, %v871_v37 }
 0x3bc   : > { %1009 = vmatpush.bf16.xpose.msra.mxu3 %v1000_v40 }
 0x3c2   : > { %v932_v41 = vpop.permute.xlu0 %931 }
 0x3c3   : > { %1484 = vmatmul.msk.bf16.vlgmr.msrb.gmra.mxu0 %vm568_vm8, %v932_v41 }
 0x3cb   : > { %1486 = vmatmul.msk.bf16.vlgmr.msra.gmra.mxu3 %vm568_vm8, %v993_v42 }
 0x412   : > { %v711_v49 = vpop.xlane.xlu0 %710 }
 0x413   : > { %v712_v53 = vsub.f32 %v705_v29, %v711_v49 }
 0x415   : > { %v713_v54 = vmul.f32 1.442695, %v712_v53 }
 0x417   : > { %1644 = vpow2.f32 %v713_v54 }
 0x41d   : > { %v1645_v61 = vpop.eup %1644 }
 0x41e   : > { %v618_v43 = vpop.f32.mrf.mxu2  ;;  %v715_v1 = vsel %vm568_vm8, %v1645_v61, 0.0 }
 0x41f   : > { %622 = vst.msk [vmem:[#allocation2] sm:$0xff] %vm568_vm8, %v618_v43 }
 0x426   : > { %v620_v44 = vpop.f32.mrf.mxu2 }
 0x42e   : > { %v643_v45 = vpop.f32.mrf.mxu2  ;;  %v767_v46 = vpop.f32.mrf.mxu3 }
 0x42f   : > { %v647_v47 = vsel %vm568_vm8, %v643_v45, -inf  ;;  %v771_v48 = vsel %vm568_vm8, %v767_v46, -inf }
 0x430   : > { %648 = vmax.xlane.f32.xlu1 %v647_v47  ;;  %772 = vmax.xlane.f32.xlu2 %v771_v48 }
 0x436   : > { %v645_v50 = vpop.f32.mrf.mxu2  ;;  %v769_v51 = vpop.f32.mrf.mxu3 }
 0x438   : > { %836 = vmax.xlane.f32.xlu1 %v835_v52 }
 0x43e   : > { %v889_v56 = vpop.f32.mrf.mxu3 }
 0x43f   : > { %v893_v57 = vsel %vm568_vm8, %v889_v56, -inf }
 0x440   : > { %894 = vmax.xlane.f32.xlu2 %v893_v57  ;;  %v950_v58 = vpop.f32.mrf.mxu0 }
 0x441   : > { %v954_v59 = vsel %vm568_vm8, %v950_v58, -inf }
 0x442   : > { %955 = vmax.xlane.f32.xlu1 %v954_v59 }
 0x446   : > { %v891_v62 = vpop.f32.mrf.mxu3 }
 0x448   : > { %v952_v63 = vpop.f32.mrf.mxu0 }
 0x44a   : > { %716 = vadd.xlane.f32.xlu1 %v715_v1 }
 0x44e   : > { %v1011_v3 = vpop.f32.mrf.mxu3 }
 0x44f   : > { %v1015_v4 = vsel %vm568_vm8, %v1011_v3, -inf }
 0x450   : > { %1016 = vmax.xlane.f32.xlu0 %v1015_v4 }
 0x456   : > { %v1013_v5 = vpop.f32.mrf.mxu3 }
 0x463   : > { %721 = vrot.lane.b32.xlu1 %v1952_v55, %s1788_s16 }
 0x464   : > { %659 = vrot.lane.b32.xlu0 %v1952_v55, %s1789_s20 }
 0x46b   : > { %905 = vrot.lane.b32.xlu1 %v1961_v60, %s1789_s20  ;;  %s1559_s20 = sshll.u32 %s1886_s29, 4  ;;  %s1365_s29 = scalar_lea.sflag [#allocation5], %s447_s24 }
 0x473   : > { %847 = vrot.lane.b32.xlu1 %v1961_v60, %s1781_s17  ;;  %s1790_s17 = smov 40  }
 0x4a3   : > { %v649_v6 = vpop.xlane.xlu1 %648  ;;  %v773_v7 = vpop.xlane.xlu2 %772 }
 0x4a4   : > { %v774_v8 = vsub.f32 %v767_v46, %v773_v7  ;;  %v650_v11 = vsub.f32 %v643_v45, %v649_v6 }
 0x4a6   : > { %v775_v9 = vmul.f32 1.442695, %v774_v8  ;;  %v651_v12 = vmul.f32 1.442695, %v650_v11 }
 0x4a8   : > { %1646 = vpow2.f32 %v775_v9 }
 0x4a9   : > { %1648 = vpow2.f32 %v651_v12 }
 0x4ab   : > { %v837_v13 = vpop.xlane.xlu1 %836 }
 0x4ae   : > { %v2010_v14 = vpop.eup %1646 }
 0x4af   : > { %v777_v15 = vsel %vm568_vm8, %v2010_v14, 0.0  ;;  %v1649_v18 = vpop.eup %1648 }
 0x4b0   : > { %778 = vadd.xlane.f32.xlu2 %v777_v15  ;;  %v653_v22 = vsel %vm568_vm8, %v1649_v18, 0.0 }
 0x4b3   : > { %v895_v16 = vpop.xlane.xlu2 %894 }
 0x4b4   : > { %v896_v17 = vsub.f32 %v889_v56, %v895_v16 }
 0x4b5   : > { %v956_v19 = vpop.xlane.xlu1 %955 }
 0x4b6   : > { %v897_v20 = vmul.f32 1.442695, %v896_v17  ;;  %v957_v21 = vsub.f32 %v950_v58, %v956_v19 }
 0x4b8   : > { %1650 = vpow2.f32 %v897_v20  ;;  %654 = vadd.xlane.f32.xlu2 %v653_v22  ;;  %v958_v23 = vmul.f32 1.442695, %v957_v21 }
 0x4ba   : > { %1652 = vpow2.f32 %v958_v23 }
 0x4bd   : > { %v717_v31 = vpop.xlane.xlu1 %716 }
 0x4be   : > { %v2015_v24 = vpop.eup %1650 }
 0x4bf   : > { %v899_v25 = vsel %vm568_vm8, %v2015_v24, 0.0 }
 0x4c0   : > { %900 = vadd.xlane.f32.xlu0 %v899_v25  ;;  %v2019_v27 = vpop.eup %1652 }
 0x4c1   : > { %v960_v30 = vsel %vm568_vm8, %v2019_v27, 0.0 }
 0x4c3   : > { %v1017_v26 = vpop.xlane.xlu0 %1016 }
 0x4c4   : > { %v1018_v28 = vsub.f32 %v1011_v3, %v1017_v26 }
 0x4c6   : > { %v1019_v29 = vmul.f32 1.442695, %v1018_v28 }
 0x4c8   : > { %1654 = vpow2.f32 %v1019_v29  ;;  %961 = vadd.xlane.f32.xlu0 %v960_v30 }
 0x4c9   : > { %1656 = vrcp.f32 %v717_v31 }
 0x4ce   : > { %v1655_v32 = vpop.eup %1654 }
 0x4cf   : > { %v1021_v33 = vsel %vm568_vm8, %v1655_v32, 0.0  ;;  %v1657_v34 = vpop.eup %1656 }
 0x4d0   : > { %1022 = vadd.xlane.f32.xlu1 %v1021_v33  ;;  %783 = vrot.lane.b32.xlu2 %v1952_v55, %s1790_s17  ;;  %v719_v35 = vmul.f32 %v1657_v34, %v1645_v61  ;;  %v838_v55 = vsub.f32 %v1989_v36, %v837_v13 }
 0x4d2   : > { %v720_v41 = vpack.c.bf16 %v719_v35, %v719_v35  ;;  %v839_v45 = vmul.f32 1.442695, %v838_v55  ;;  %v1548_v35 = vld [vmem:[%s2181_s5 + $0x8] sm:$0xff] }
 0x4d3   : > { %1085 = vmatpush.bf16.msra.mxu0 %v1548_v35  ;;  %v1557_v35 = vld [vmem:[%s2187_s11 + $0x30] sm:$0xff] }
 0x4d4   : > { %1658 = vpow2.f32 %v839_v45 }
 0x4d5   : > { %v722_v37 = vpop.permute.xlu1 %721 }
 0x4d6   : > { %v660_v38 = vpop.permute.xlu0 %659  ;;  %v727_v39 = vsel %vm605_vm9, %v722_v37, 0  ;;  %v1547_v37 = vld [vmem:[%s2181_s5] sm:$0xff] }
 0x4d7   : > { %v665_v40 = vsel %vm605_vm9, %v660_v38, 0  ;;  %736 = vmatpush.bf16.msrb.mxu1 %v727_v39  ;;  %1086 = vmatpush.bf16.msra.mxu0 %v1547_v37 }
 0x4d8   : > { %674 = vmatpush.bf16.msra.mxu2 %v665_v40 }
 0x4da   : > { %1477 = vmatmul.msk.bf16.vlgmr.msrb.gmra.mxu1 %vm568_vm8, %v720_v41  ;;  %v1659_v46 = vpop.eup %1658 }
 0x4db   : > { %v841_v47 = vsel %vm568_vm8, %v1659_v46, 0.0 }
 0x4dc   : > { %1027 = vrot.lane.b32.xlu0 %v1961_v60, %s1790_s17 }
 0x4dd   : > { %v906_v42 = vpop.permute.xlu1 %905 }
 0x4de   : > { %v911_v36 = vsel %vm605_vm9, %v906_v42, 0 }
 0x4e5   : > { %v848_v43 = vpop.permute.xlu1 %847 }
 0x4e6   : > { %v853_v44 = vsel %vm605_vm9, %v848_v43, 0 }
 0x4e7   : > { %862 = vmatpush.bf16.msra.mxu1 %v853_v44  ;;  %v1629_v44 = vld [vmem:[%s2182_s6] ss:$0 sm:$0xff] }
 0x4f9   : > { %842 = vadd.xlane.f32.xlu2 %v841_v47 }
 0x511   : > { %966 = vrot.lane.b32.xlu2 %v1961_v60, %s1788_s16  ;;  %s1460_s16 = sshll.u32 %s447_s24, 4 }
 0x512   : > { %s449_s17 = scalar_lea.vmem [#allocation6], %s1460_s16 }
 0x513   : > { %s1377_s0 = sshll.u32 %s449_s17, 4  ;;  %s1378_s0 = int_to_ptr.vmem [resolvable:$true] %s1377_s0 }
 0x523   : > { %v779_v48 = vpop.xlane.xlu2 %778 }
 0x52b   : > { %v655_v49 = vpop.xlane.xlu2 %654 }
 0x52c   : > { %1660 = vrcp.f32 %v655_v49 }
 0x52d   : > { %1662 = vrcp.f32 %v779_v48 }
 0x532   : > { %v1661_v50 = vpop.eup %1660 }
 0x533   : > { %v657_v51 = vmul.f32 %v1661_v50, %v1649_v18  ;;  %v784_v52 = vpop.permute.xlu2 %783  ;;  %v901_v56 = vpop.xlane.xlu0 %900 }
 0x534   : > { %v789_v53 = vsel %vm605_vm9, %v784_v52, 0  ;;  %v1663_v57 = vpop.eup %1662  ;;  %1664 = vrcp.f32 %v901_v56 }
 0x535   : > { %v658_v54 = vpack.c.bf16 %v657_v51, %v657_v51  ;;  %798 = vmatpush.bf16.msrb.mxu2 %v789_v53  ;;  %v781_v60 = vmul.f32 %v1663_v57, %v2010_v14 }
 0x537   : > { %1475 = vmatmul.msk.bf16.vlgmr.msra.gmra.mxu2 %vm568_vm8, %v658_v54  ;;  %v782_v58 = vpack.c.bf16 %v781_v60, %v781_v60 }
 0x539   : > { %920 = vmatpush.bf16.msra.mxu2 %v911_v36 }
 0x53a   : > { %v1665_v62 = vpop.eup %1664 }
 0x53b   : > { %v962_v59 = vpop.xlane.xlu0 %961  ;;  %v903_v1 = vmul.f32 %v1665_v62, %v2015_v24 }
 0x53d   : > { %v904_v3 = vpack.c.bf16 %v903_v1, %v903_v1  ;;  %v1549_v1 = vld [vmem:[%s2185_s9] sm:$0xff] }
 0x543   : > { %v1023_v4 = vpop.xlane.xlu1 %1022 }
 0x544   : > { %1666 = vrcp.f32 %v1023_v4 }
 0x547   : > { %1479 = vmatmul.msk.bf16.vlgmr.msrb.gmra.mxu2 %vm568_vm8, %v782_v58 }
 0x54a   : > { %v1667_v6 = vpop.eup %1666 }
 0x54b   : > { %v1025_v8 = vmul.f32 %v1667_v6, %v1655_v32 }
 0x54d   : > { %v1026_v9 = vpack.c.bf16 %v1025_v8, %v1025_v8 }
 0x54e   : > { %v1028_v61 = vpop.permute.xlu0 %1027 }
 0x54f   : > { %v1033_v63 = vsel %vm605_vm9, %v1028_v61, 0 }
 0x550   : > { %1042 = vmatpush.bf16.msrb.mxu2 %v1033_v63 }
 0x557   : > { %v738_v5 = vpop.f32.mrf.mxu1  ;;  %1483 = vmatmul.msk.bf16.vlgmr.msra.gmra.mxu2 %vm568_vm8, %v904_v3 }
 0x55f   : > { %v740_v7 = vpop.f32.mrf.mxu1 }
 0x567   : > { %1487 = vmatmul.msk.bf16.vlgmr.msrb.gmra.mxu2 %vm568_vm8, %v1026_v9 }
 0x56c   : > { %v843_v11 = vpop.xlane.xlu2 %842 }
 0x56d   : > { %1668 = vrcp.f32 %v843_v11 }
 0x56e   : > { %1670 = vrcp.f32 %v962_v59  ;;  %v1550_v59 = vld [vmem:[%s2185_s9 + $0x8] sm:$0xff] }
 0x573   : > { %v1669_v12 = vpop.eup %1668 }
 0x574   : > { %v845_v13 = vmul.f32 %v1669_v12, %v1659_v46  ;;  %v967_v14 = vpop.permute.xlu2 %966  ;;  %v1671_v17 = vpop.eup %1670 }
 0x575   : > { %v972_v15 = vsel %vm605_vm9, %v967_v14, 0  ;;  %v964_v18 = vmul.f32 %v1671_v17, %v2019_v27 }
 0x576   : > { %v846_v16 = vpack.c.bf16 %v845_v13, %v845_v13  ;;  %981 = vmatpush.bf16.msrb.mxu1 %v972_v15 }
 0x577   : > { %v965_v19 = vpack.c.bf16 %v964_v18, %v964_v18 }
 0x578   : > { %1481 = vmatmul.msk.bf16.vlgmr.msra.gmra.mxu1 %vm568_vm8, %v846_v16 }
 0x57a   : > { %1181 = vmatpush.bf16.msra.mxu1 %v1550_v59  ;;  %v1553_v59 = vld [vmem:[%s2187_s11 + $0x10] sm:$0xff] }
 0x57e   : > { %1182 = vmatpush.bf16.msra.mxu1 %v1549_v1 }
 0x588   : > { %1485 = vmatmul.msk.bf16.vlgmr.msrb.gmra.mxu1 %vm568_vm8, %v965_v19 }
 0x5ba   : > { %v676_v20 = vpop.f32.mrf.mxu2 }
 0x5bb   : > { %681 = vrot.lane.b32.xlu0 %v676_v20, %s2190_s21 }
 0x5c2   : > { %v678_v21 = vpop.f32.mrf.mxu2 }
 0x5c3   : > { %743 = vrot.lane.b32.xlu0 %v738_v5, %s1792_s22 }
 0x5ca   : > { %v800_v22 = vpop.f32.mrf.mxu2 }
 0x5cb   : > { %805 = vrot.lane.b32.xlu0 %v800_v22, %s1793_s23  ;;  %v1631_v22 = vld [vmem:[%s2184_s8] ss:$0 sm:$0xff] }
 0x5d2   : > { %v802_v23 = vpop.f32.mrf.mxu2 }
 0x5da   : > { %v922_v24 = vpop.f32.mrf.mxu2 }
 0x5db   : > { %927 = vrot.lane.b32.xlu1 %v922_v24, %s2190_s21  ;;  %s1376_s21 = scalar_lea.hbm %s2189_s13, %s1559_s20 }
 0x5dc   : > { %s1379_s1 = sshll.u32 %s1376_s21, 4  ;;  %s1380_s1 = int_to_ptr.hbm [resolvable:$true] %s1379_s1 }
 0x5dd   : > { %s1724_s30 = sshra.s32 %s1380_s1, 4  ;;  %s1725_s30 = int_to_ptr.hbm [resolvable:$true] %s1724_s30 }
 0x5de   : > { %s1726_s15 = scalar_lea.hbm %s1725_s30, 16  ;;  %p1731_p3 = scmp.lt.s32.totalorder %s1725_s30, %s2189_s13 }
 0x5df   : > { %p1727_p0 = scmp.ne.s32.totalorder %s1725_s30, %s1726_s15 }
 0x5e1   : > { %p1728_p1 = pnand %p1727_p0, %p1903_p5 }
 0x5e2   : > { %v924_v25 = vpop.f32.mrf.mxu2 }
 0x5e3   : > { %p1729_p2 = pneg %p1728_p1 }
 0x5ea   : > { %v1044_v26 = vpop.f32.mrf.mxu2 }
 0x5f2   : > { %v1046_v27 = vpop.f32.mrf.mxu2 }
 0x5f5   : > { %v864_v28 = vpop.f32.mrf.mxu1 }
 0x5f6   : > { %868 = vst.msk [vmem:[#allocation2 + $0x8] sm:$0xff] %vm568_vm8, %v864_v28 }
 0x5fd   : > { %v866_v29 = vpop.f32.mrf.mxu1 }
 0x5fe   : > { %v1632_v29 = vld [vmem:[%s2186_s10] ss:$0 sm:$0xff] }
 0x605   : > { %v983_v30 = vpop.f32.mrf.mxu1 }
 0x606   : > { %988 = vrot.lane.b32.xlu2 %v983_v30, %s1792_s22  ;;  %s1730_s22 = scalar_lea.hbm %s2189_s13, 32 }
 0x607   : > { %p1732_p4 = scmp.lt.s32.totalorder %s1730_s22, %s1726_s15 }
 0x609   : > { %p1733_p7 = por %p1732_p4, %p1731_p3 }
 0x60b   : > { %p1734_p8 = pnand %p1733_p7, %p1729_p2 }
 0x60d   : > { %v985_v31 = vpop.f32.mrf.mxu1 }
 0x60e   : > { %1049 = vrot.lane.b32.xlu2 %v1044_v26, %s1793_s23 }
 0x62d   : > { %v682_v32 = vpop.permute.xlu0 %681 }
 0x62e   : > { %685 = vst.msk [vmem:[#allocation2] sm:$0xff] %vm684_vm10, %v682_v32  ;;  %v1558_v32 = vld [vmem:[%s2187_s11 + $0x38] sm:$0xff] }
 0x62f   : > { %1346 = vmatpush.bf16.msrb.mxu3 %v1558_v32 }
 0x633   : > { %1347 = vmatpush.bf16.msrb.mxu3 %v1557_v35 }
 0x635   : > { %v744_v33 = vpop.permute.xlu0 %743 }
 0x636   : > { %747 = vst.msk [vmem:[#allocation2] sm:$0xff] %vm746_vm11, %v744_v33 }
 0x63d   : > { %v806_v34 = vpop.permute.xlu0 %805 }
 0x63e   : > { %809 = vst.msk [vmem:[#allocation2] sm:$0xff] %vm808_vm12, %v806_v34 }
 0x645   : > { %v1053_v41 = vld [vmem:[#allocation2] sm:$0xff] }
 0x64d   : > { %v928_v38 = vpop.permute.xlu1 %927 }
 0x64e   : > { %930 = vst.msk [vmem:[#allocation2 + $0x8] sm:$0xff] %vm684_vm10, %v928_v38 }
 0x660   : > { %v989_v39 = vpop.permute.xlu2 %988 }
 0x661   : > { %991 = vst.msk [vmem:[#allocation2 + $0x8] sm:$0xff] %vm746_vm11, %v989_v39 }
 0x668   : > { %v1050_v40 = vpop.permute.xlu2 %1049 }
 0x669   : > { %1052 = vst.msk [vmem:[#allocation2 + $0x8] sm:$0xff] %vm808_vm12, %v1050_v40 }
 0x670   : > { %v1054_v42 = vld [vmem:[#allocation2 + $0x8] sm:$0xff] }
 0x671   : > { %v1055_v43 = vpack.c.bf16 %v1054_v42, %v1053_v41  ;;  %v1556_v42 = vld [vmem:[%s2187_s11 + $0x28] sm:$0xff] }
 0x672   : > { %1348 = vmatpush.bf16.msrb.mxu3 %v1556_v42 }
 0x673   : > { %1496 = vmatmul.msk.bf16.vlgmr.msra.gmra.mxu0 %vm462_vm0, %v1055_v43 }
 0x6f0   : > { %v1088_v55 = vpop.f32.mrf.mxu0 }
 0x6f1   : > { %v1089_v45 = vadd.f32 %v1629_v44, %v1088_v55 }
 0x6f3   : > { %v2061_v46 = vadd.f32 %v1089_v45, %v1921_v0 }
 0x6f5   : > { %v1097_v47 = vsel %vm462_vm0, %v2061_v46, 0.0 }
 0x6f6   : > { %1098 = vadd.xlane.f32.xlu0 %v1097_v47  ;;  %v1555_v47 = vld [vmem:[%s2187_s11 + $0x20] sm:$0xff] }
 0x6f7   : > { %1349 = vmatpush.bf16.msrb.mxu3 %v1555_v47 }
 0x6f8   : > { %v1090_v48 = vpop.f32.mrf.mxu0 }
 0x6f9   : > { %v1091_v49 = vadd.f32 %v1629_v44, %v1090_v48 }
 0x6fb   : > { %v2066_v50 = vadd.f32 %v1091_v49, %v1925_v2 }
 0x6fd   : > { %v1100_v51 = vsel %vm462_vm0, %v2066_v50, 0.0 }
 0x6fe   : > { %1101 = vadd.xlane.f32.xlu2 %v1100_v51 }
 0x769   : > { %v1099_v52 = vpop.xlane.xlu0 %1098 }
 0x76a   : > { %v1103_v53 = vmul.f32 %v1099_v52, %v1929_v10 }
 0x76c   : > { %v1105_v54 = vsub.f32 %v2061_v46, %v1103_v53 }
 0x76e   : > { %v1107_v0 = vmul.f32 %v1105_v54, %v1105_v54 }
 0x770   : > { %v1109_v36 = vsel %vm462_vm0, %v1107_v0, 0.0 }
 0x771   : > { %v1102_v56 = vpop.xlane.xlu2 %1101  ;;  %1110 = vadd.xlane.f32.xlu1 %v1109_v36 }
 0x772   : > { %v1104_v57 = vmul.f32 %v1102_v56, %v1929_v10 }
 0x774   : > { %v1106_v60 = vsub.f32 %v2066_v50, %v1104_v57 }
 0x776   : > { %v1108_v2 = vmul.f32 %v1106_v60, %v1106_v60 }
 0x778   : > { %v1112_v58 = vsel %vm462_vm0, %v1108_v2, 0.0 }
 0x779   : > { %1113 = vadd.xlane.f32.xlu0 %v1112_v58 }
 0x7e4   : > { %v1111_v61 = vpop.xlane.xlu1 %1110 }
 0x7e5   : > { %v1115_v62 = vmul.f32 %v1111_v61, %v1929_v10 }
 0x7e7   : > { %v1117_v63 = vadd.f32 1e-06, %v1115_v62 }
 0x7e9   : > { %1672 = vrsqrt.f32 %v1117_v63  ;;  %vm1125_vm14 = vweird.f32 %v1117_v63 }
 0x7ec   : > { %v1114_v3 = vpop.xlane.xlu0 %1113 }
 0x7ed   : > { %v1116_v4 = vmul.f32 %v1114_v3, %v1929_v10  ;;  %v1630_v10 = vld [vmem:[%s2183_s7] ss:$0 sm:$0xff] }
 0x7ef   : > { %v1673_v5 = vpop.eup %1672  ;;  %v1118_v6 = vadd.f32 1e-06, %v1116_v4 }
 0x7f0   : > { %v1120_v7 = vmul.f32 %v1673_v5, %v1117_v63  ;;  %vm1126_vm13 = vweird.f32 %v1673_v5 }
 0x7f1   : > { %1674 = vrsqrt.f32 %v1118_v6  ;;  %vm1127_vm15 = vmor %vm1125_vm14, %vm1126_vm13  ;;  %vm1135_vm2 = vweird.f32 %v1118_v6 }
 0x7f2   : > { %v1121_v8 = vmul.f32 %v1673_v5, %v1120_v7 }
 0x7f4   : > { %v1122_v9 = vmul.f32 0.5, %v1121_v8 }
 0x7f6   : > { %v1123_v11 = vsub.f32 1.5, %v1122_v9 }
 0x7f7   : > { %v1675_v12 = vpop.eup %1674 }
 0x7f8   : > { %v1124_v13 = vmul.f32 %v1673_v5, %v1123_v11  ;;  %v1130_v14 = vmul.f32 %v1675_v12, %v1118_v6  ;;  %vm1136_vm1 = vweird.f32 %v1675_v12  ;;  %v1552_v6 = vld [vmem:[%s2187_s11 + $0x8] sm:$0xff] }
 0x7f9   : > { %vm1137_vm3 = vmor %vm1135_vm2, %vm1136_vm1 }
 0x7fa   : > { %v1131_v15 = vmul.f32 %v1675_v12, %v1130_v14  ;;  %v1128_v16 = vsel %vm1127_vm15, %v1673_v5, %v1124_v13  ;;  %v1551_v13 = vld [vmem:[%s2187_s11] sm:$0xff] }
 0x7fb   : > { %v1139_v19 = vmul.f32 %v1128_v16, %v1105_v54  ;;  %v1554_v54 = vld [vmem:[%s2187_s11 + $0x18] sm:$0xff] }
 0x7fc   : > { %v1132_v17 = vmul.f32 0.5, %v1131_v15  ;;  %1350 = vmatpush.bf16.msrb.mxu3 %v1554_v54 }
 0x7fd   : > { %v1144_v23 = vmul.f32 %v1630_v10, %v1139_v19 }
 0x7fe   : > { %v1133_v18 = vsub.f32 1.5, %v1132_v17 }
 0x7ff   : > { %v1149_v26 = vadd.f32 %v1631_v22, %v1144_v23 }
 0x800   : > { %v1134_v20 = vmul.f32 %v1675_v12, %v1133_v18  ;;  %1351 = vmatpush.bf16.msrb.mxu3 %v1553_v59 }
 0x802   : > { %v1138_v21 = vsel %vm1137_vm3, %v1675_v12, %v1134_v20 }
 0x803   : > { %v1140_v24 = vmul.f32 %v1138_v21, %v1106_v60 }
 0x804   : > { %1352 = vmatpush.bf16.msrb.mxu3 %v1552_v6 }
 0x805   : > { %v1145_v25 = vmul.f32 %v1630_v10, %v1140_v24 }
 0x807   : > { %v1150_v27 = vadd.f32 %v1631_v22, %v1145_v25 }
 0x808   : > { %1353 = vmatpush.bf16.msrb.mxu3 %v1551_v13 }
 0x809   : > { %v1151_v28 = vpack.c.bf16 %v1150_v27, %v1149_v26 }
 0x80b   : > { %1505 = vmatmul.msk.bf16.vlgmr.msra.gmra.mxu1 %vm462_vm0, %v1151_v28 }
 0x888   : > { %v1184_v30 = vpop.f32.mrf.mxu1 }
 0x889   : > { %v2094_v31 = vadd.f32 %v1632_v29, %v1184_v30 }
 0x88b   : > { %v2100_v33 = vmul.f32 0.70710677, %v2094_v31 }
 0x88d   : > { %v1193_v34 = vmul.f32 %v2100_v33, %v2100_v33 }
 0x88f   : > { %v1194_v37 = vmin.f32 %v1193_v34, 16.0 }
 0x890   : > { %v1186_v38 = vpop.f32.mrf.mxu1 }
 0x891   : > { %v1195_v39 = vmul.f32 2.1237322e-06, %v1194_v37  ;;  %v1206_v40 = vmul.f32 3.8918573e-05, %v1194_v37  ;;  %v2107_v41 = vadd.f32 %v1632_v29, %v1186_v38 }
 0x893   : > { %v1196_v43 = vadd.f32 0.00028619796, %v1195_v39  ;;  %v1207_v44 = vadd.f32 0.001143296, %v1206_v40  ;;  %v2113_v55 = vmul.f32 0.70710677, %v2107_v41 }
 0x895   : > { %v1208_v45 = vmul.f32 %v1207_v44, %v1194_v37  ;;  %v1233_v48 = vmul.f32 %v2113_v55, %v2113_v55  ;;  %v1197_v49 = vmul.f32 %v1196_v43, %v1194_v37 }
 0x897   : > { %v1209_v51 = vadd.f32 0.014752088, %v1208_v45  ;;  %v1234_v52 = vmin.f32 %v1233_v48, 16.0  ;;  %v1198_v56 = vadd.f32 0.0036580483, %v1197_v49 }
 0x899   : > { %v1210_v53 = vmul.f32 %v1209_v51, %v1194_v37  ;;  %v1235_v0 = vmul.f32 2.1237322e-06, %v1234_v52  ;;  %v1246_v36 = vmul.f32 3.8918573e-05, %v1234_v52  ;;  %v1199_v63 = vmul.f32 %v1198_v56, %v1194_v37 }
 0x89b   : > { %v1211_v57 = vadd.f32 0.112945676, %v1210_v53  ;;  %v1236_v60 = vadd.f32 0.00028619796, %v1235_v0  ;;  %v1247_v2 = vadd.f32 0.001143296, %v1246_v36 }
 0x89c   : > { %v1200_v8 = vadd.f32 0.05243302, %v1199_v63 }
 0x89d   : > { %v1212_v58 = vmul.f32 %v1211_v57, %v1194_v37  ;;  %v1237_v61 = vmul.f32 %v1236_v60, %v1234_v52  ;;  %v1248_v62 = vmul.f32 %v1247_v2, %v1234_v52  ;;  %v1189_v57 = vmul.f32 0.5, %v2094_v31 }
 0x89e   : > { %v1201_v15 = vmul.f32 %v1200_v8, %v1194_v37  ;;  %v1190_v60 = vmul.f32 0.5, %v2107_v41 }
 0x89f   : > { %v1213_v1 = vadd.f32 0.4994258, %v1212_v58  ;;  %v1238_v3 = vadd.f32 0.0036580483, %v1237_v61  ;;  %v1249_v4 = vadd.f32 0.014752088, %v1248_v62 }
 0x8a0   : > { %v1202_v19 = vadd.f32 0.18741608, %v1201_v15 }
 0x8a1   : > { %v1214_v5 = vmul.f32 %v1213_v1, %v1194_v37  ;;  %v1250_v7 = vmul.f32 %v1249_v4, %v1234_v52  ;;  %v1239_v11 = vmul.f32 %v1238_v3, %v1234_v52 }
 0x8a2   : > { %v1203_v24 = vmul.f32 %v1202_v19, %v1194_v37 }
 0x8a3   : > { %v1215_v9 = vadd.f32 1.0, %v1214_v5  ;;  %v1251_v12 = vadd.f32 0.112945676, %v1250_v7  ;;  %v1240_v16 = vadd.f32 0.05243302, %v1239_v11 }
 0x8a4   : > { %v1204_v30 = vadd.f32 1.1283791, %v1203_v24 }
 0x8a5   : > { %1676 = vrcp.f32 %v1215_v9  ;;  %v1252_v14 = vmul.f32 %v1251_v12, %v1234_v52  ;;  %v1241_v21 = vmul.f32 %v1240_v16, %v1234_v52  ;;  %v1227_v26 = vand.u32 2147483648, %v1215_v9 }
 0x8a6   : > { %v1225_v28 = vand.u32 2147483647, %v1215_v9  ;;  %vm1221_vm5 = vweird.f32 %v1215_v9  ;;  %v1205_v42 = vmul.f32 %v1204_v30, %v2100_v33 }
 0x8a7   : > { %v1253_v17 = vadd.f32 0.4994258, %v1252_v14  ;;  %v1242_v27 = vadd.f32 0.18741608, %v1241_v21  ;;  %v1228_v35 = vor.u32 1.1754944e-38, %v1227_v26 }
 0x8a8   : > { %vm1226_vm7 = vcmp.eq.f32.partialorder %v1225_v28, 8.507059e+37 }
 0x8a9   : > { %v1254_v18 = vmul.f32 %v1253_v17, %v1234_v52  ;;  %v1243_v38 = vmul.f32 %v1242_v27, %v1234_v52 }
 0x8ab   : > { %v1677_v10 = vpop.eup %1676  ;;  %v1255_v22 = vadd.f32 1.0, %v1254_v18  ;;  %v1244_v37 = vadd.f32 1.1283791, %v1243_v38 }
 0x8ac   : > { %v1217_v20 = vmul.f32 %v1677_v10, %v1215_v9  ;;  %vm1222_vm4 = vweird.f32 %v1677_v10 }
 0x8ad   : > { %1678 = vrcp.f32 %v1255_v22  ;;  %vm1223_vm6 = vmor %vm1221_vm5, %vm1222_vm4  ;;  %v1267_v44 = vand.u32 2147483648, %v1255_v22  ;;  %v1265_v48 = vand.u32 2147483647, %v1255_v22  ;;  %vm1261_vm9 = vweird.f32 %v1255_v22 }
 0x8ae   : > { %v1218_v23 = vsub.f32 1.0, %v1217_v20  ;;  %v1245_v52 = vmul.f32 %v1244_v37, %v2113_v55  ;;  %v1633_v55 = vld [vmem:[%s2188_s12] ss:$0 sm:$0xff] }
 0x8af   : > { %v1268_v51 = vor.u32 1.1754944e-38, %v1267_v44  ;;  %vm1266_vm11 = vcmp.eq.f32.partialorder %v1265_v48, 8.507059e+37 }
 0x8b0   : > { %v1219_v25 = vmul.f32 %v1677_v10, %v1218_v23 }
 0x8b2   : > { %v1220_v29 = vadd.f32 %v1677_v10, %v1219_v25 }
 0x8b3   : > { %v1679_v32 = vpop.eup %1678 }
 0x8b4   : > { %v1224_v34 = vsel %vm1223_vm6, %v1677_v10, %v1220_v29  ;;  %v1257_v39 = vmul.f32 %v1679_v32, %v1255_v22  ;;  %vm1262_vm8 = vweird.f32 %v1679_v32 }
 0x8b5   : > { %v1229_v40 = vsel %vm1226_vm7, %v1228_v35, %v1224_v34  ;;  %vm1263_vm10 = vmor %vm1261_vm9, %vm1262_vm8 }
 0x8b6   : > { %v1258_v43 = vsub.f32 1.0, %v1257_v39  ;;  %v1230_v45 = vmul.f32 %v1229_v40, %v1205_v42 }
 0x8b8   : > { %v1259_v47 = vmul.f32 %v1679_v32, %v1258_v43  ;;  %v1506_v53 = vclamps-f32 %v1230_v45, 1.0 }
 0x8ba   : > { %v1260_v49 = vadd.f32 %v1679_v32, %v1259_v47  ;;  %v1273_v36 = vadd.f32 1.0, %v1506_v53 }
 0x8bc   : > { %v1264_v54 = vsel %vm1263_vm10, %v1679_v32, %v1260_v49  ;;  %v1275_v58 = vmul.f32 %v1273_v36, %v1189_v57 }
 0x8bd   : > { %v1269_v0 = vsel %vm1266_vm11, %v1268_v51, %v1264_v54 }
 0x8be   : > { %v1270_v33 = vmul.f32 %v1269_v0, %v1245_v52 }
 0x8c0   : > { %v1507_v56 = vclamps-f32 %v1270_v33, 1.0 }
 0x8c2   : > { %v1274_v2 = vadd.f32 1.0, %v1507_v56 }
 0x8c4   : > { %v1276_v59 = vmul.f32 %v1274_v2, %v1190_v60 }
 0x8c6   : > { %v1277_v61 = vpack.c.bf16 %v1276_v59, %v1275_v58 }
 0x8c8   : > { %1354 = vmatmul.bf16.vlgmr.msrb.gmra.mxu3 %v1277_v61 }
 0x94b   : > { %v1355_v62 = vpop.f32.mrf.mxu3 }
 0x94c   : > { %v1356_v63 = vadd.f32 %v1633_v55, %v1355_v62 }
 0x94e   : > { %v1360_v1 = vadd.f32 %v1356_v63, %v2061_v46 }
 0x950   : > { %1362 = vst.msk [vmem:[%s449_s17] sm:$0xff] %vm462_vm0, %v1360_v1 }
 0x953   : > { %v1357_v31 = vpop.f32.mrf.mxu3 }
 0x954   : > { %v1358_v41 = vadd.f32 %v1633_v55, %v1357_v31 }
 0x956   : > { %v1361_v3 = vadd.f32 %v1358_v41, %v2066_v50 }
 0x958   : > { %1363 = vst.msk [vmem:[%s449_s17 + $0x8] sm:$0xff] %vm462_vm0, %v1361_v3 }
 0x959   : > { %1737 = shalt.err (!%p1734_p8)
}
 0x95a   : > { %s1794_s24 = smov 128   ;;  %s2198_s17 = smov 8  }
 0x95b   : > { %1564 = dma.vmem_to_hbm [thread:$0]  (%p1903_p5), %s1378_s0, 256, %s1380_s1, %s1365_s29, %s1794_s24, %s1794_s24, %s2198_s17  }
 0x95c PF: > { %p1576_p9 = scmp.ge.s32.totalorder %s1776_s28, 2  ;;  %s1394_s16 = sand.u32 1, %s1764_s25  }
 0x95d   : > { %s1395_s20 = scalar_lea.sflag [#allocation5], %s1394_s16 }
 0x95e   : > { %p1571_p10 = pnand %p1576_p9, %p1907_p6 }
 0x960   : > { %p1572_p11 = pneg %p1571_p10 }
 0x962   : > { %1759 = dma.done.wait (%p1572_p11), %s1395_s20, 256  }
 0x963   : > { %1761 = vsyncadd (%p1572_p11), %s1395_s20, 4294967040  ;;  %s2199_s30 = sld [smem:[#allocation9_spill]]  ;;  %p24_p12 = scmp.ge.s32.totalorder %s1890_s14, 4  }
 0x964   : > { %s2200_s25 = smov %s1768_s26  ;;  %s2201_s26 = smov %s1772_s27 }
 0x965   : > { %s2203_s28 = smov %s1890_s14  ;;  %26 = sbr.rel (!%p24_p12) target bundleno = 7 (0x7), region = 112 }
 0x969   : > { %s2202_s27 = smov %s2199_s30 }
 0x96a   :  { %1401 = vsyncpa [#allocation4], 1 }
 0x96b   :  { %1403 = vsyncpa [#allocation4 + $0x1], 1 }
 0x96c   :  { %1404 = vsyncpa [#allocation5], 1 }
 0x96d   :  { %1406 = vsyncpa [#allocation5 + $0x1], 1 }

// kernel: tpu_custom_call.1
= control target key start
LH: loop header
LB: loop body
LE: loop exit
PB: predicated region body
PF: predicated region fallthrough
CT: control target
= control target key end

     0   :  { %s2176_s0 = inlined_call_operand.vmem [shape: f32[32,32], index: 0, kind: input, shape index: {}]   ;;  %s2177_s1 = inlined_call_operand.hbm [shape: f32[1,32], index: 1, kind: input, shape index: {}]   ;;  %s2178_s2 = inlined_call_operand.vmem [shape: f32[1,32], index: 2, kind: input, shape index: {}]   ;;  %s2179_s3 = inlined_call_operand.vmem [shape: bf16[32,96], index: 3, kind: input, shape index: {}]   ;;  %s2180_s4 = inlined_call_operand.vmem [shape: f32[1,96], index: 4, kind: input, shape index: {}]   ;;  %s2181_s5 = inlined_call_operand.vmem [shape: bf16[32,32], index: 5, kind: input, shape index: {}]   ;;  %s2182_s6 = inlined_call_operand.vmem [shape: f32[1,32], index: 6, kind: input, shape index: {}]   ;;  %s2183_s7 = inlined_call_operand.vmem [shape: f32[1,32], index: 7, kind: input, shape index: {}]   ;;  %s2184_s8 = inlined_call_operand.vmem [shape: f32[1,32], index: 8, kind: input, shape index: {}]   ;;  %s2185_s9 = inlined_call_operand.vmem [shape: bf16[32,128], index: 9, kind: input, shape index: {}]   ;;  %s2186_s10 = inlined_call_operand.vmem [shape: f32[1,128], index: 10, kind: input, shape index: {}]   ;;  %s2187_s11 = inlined_call_operand.vmem [shape: bf16[128,32], index: 11, kind: input, shape index: {}]   ;;  %s2188_s12 = inlined_call_operand.vmem [shape: f32[1,32], index: 12, kind: input, shape index: {}]   ;;  %s2189_s13 = inlined_call_operand.hbm [shape: f32[32,32], index: 13, kind: output, shape index: {}]  }
   0x1   :  { %2191 = sst [smem:[#allocation10_spill]] %s2176_s0 }
   0x2   :  { %2192 = sst [smem:[#allocation11_spill]] %s2177_s1 }
   0x3   :  { %18 = vsyncpa [#allocation4], 0 }
   0x4   :  { %19 = vsyncpa [#allocation5], 0 }
   0x5   :  { %21 = vsyncpa [#allocation5 + $0x1], 0  ;;  %s1865_s25 = smov 0   ;;  %s1867_s26 = smov 0  }
   0x6   :  { %s1869_s27 = smov 0   ;;  %s1871_s28 = smov 0  }
   0x7 LB: > { %s1886_s29 = sadd.s32 4294967295, %s1776_s28   ;;  %s1454_s30 = sadd.s32 4294967294, %s1776_s28   ;;  %s1776_s28 = sphi %s1871_s28, %s2203_s28   ;;  %s1772_s27 = sphi %s1869_s27, %s2202_s27   ;;  %s1768_s26 = sphi %s1867_s26, %s2201_s26   ;;  %s1764_s25 = sphi %s1865_s25, %s2200_s25  }
   0x8   : > { %s1890_s14 = sadd.s32 1, %s1776_s28   ;;  %s312_s15 = sadd.s32 1, %s1772_s27 }
   0x9   : > { %s309_s16 = ssub.s32 %s1776_s28, %s1890_s14  ;;  %p322_p0 = scmp.ne.s32.totalorder %s1772_s27, %s1768_s26 }
   0xa   : > { %p310_p1 = scmp.eq.s32.totalorder %s309_s16, 0  ;;  %p323_p2 = scmp.eq.s32.totalorder %s1886_s29, 1 }
   0xb   : > { %p328_p3 = scmp.ne.s32.totalorder %s1768_s26, %s1764_s25  ;;  %p329_p4 = scmp.eq.s32.totalorder %s1454_s30, 1 }
   0xc   : > { %s1901_s17 = scalar_select %p310_p1, %s1772_s27, %s312_s15  }
   0xd   : > { %p1903_p5 = por %p323_p2, %p322_p0  ;;  %p1907_p6 = por %p329_p4, %p328_p3 }
   0xe   : > { %2193 = sst [smem:[#allocation9_spill]] %s1901_s17  ;;  %p1455_p7 = scmp.ge.s32.totalorder %s1776_s28, 1 }
   0xf   : > { %p336_p8 = scmp.lt.s32.totalorder %s1776_s28, 3  ;;  %p1574_p9 = scmp.eq.s32.totalorder %s1886_s29, 0 }
  0x10   : > { %s2196_s1 = sld [smem:[#allocation11_spill]]  ;;  %s1778_s23 = smov [#allocation3]  }
  0x11   : > { %p337_p10 = pnand %p1455_p7, %p336_p8  ;;  %s350_s24 = sshll.u32 %s1778_s23, 4  ;;  %s351_s24 = int_to_ptr.vmem [resolvable:$true] %s350_s24 }
  0x13   : > { %p1566_p11 = pneg %p337_p10  ;;  %405 = sbr.rel (%p337_p10) target bundleno = 2396 (0x95c), region = 72 }
  0x15   : > { %p1567_p12 = pnand %p1574_p9, %p1566_p11 }
  0x16   : > { %s348_s22 = sshll.u32 %s2196_s1, 4  ;;  %s349_s22 = int_to_ptr.hbm [resolvable:$true] %s348_s22 }
  0x17   : > { %1569 = dma.hbm_to_vmem [thread:$0]  (!%p1567_p12), %s349_s22, 16, %s351_s24, [#allocation4]  }
  0x18   : > { %1755 = dma.done.wait (%p1574_p9), [#allocation4], 16  }
  0x19   : > { %1757 = vsyncadd (%p1574_p9), [#allocation4], 4294967280  ;;  %s1461_s30 = sshll.u32 %s1886_s29, 1  ;;  %vm462_vm0 = vcmask 261120   ;;  %s2197_s0 = sld [smem:[#allocation10_spill]]  ;;  %v1779_v4 = vmov 32.0  }
  0x1a   : > { %p451_p13 = scmp.lt.s32.totalorder %s1461_s30, 3  ;;  %1634 = vrcp.f32 %v1779_v4  ;;  %v1546_v21 = vld [vmem:[%s2179_s3 + $0x8] sm:$0xff]  ;;  %v1545_v23 = vld [vmem:[%s2179_s3] sm:$0xff]  ;;  %v1626_v42 = vld [vmem:[#allocation3] ss:$0 sm:$0xff]  ;;  %s1781_s17 = smov 64  }
  0x1b   : > { %554 = vmatpush.bf16.msra.mxu0 %v1546_v21  ;;  %v1627_v47 = vld [vmem:[%s2178_s2] ss:$0 sm:$0xff]  ;;  %s1782_s21 = smov 96   ;;  %s1783_s22 = smov 120   ;;  %vm568_vm8 = vcmask 64512   ;;  %vm605_vm9 = vcmask 1043456  }
  0x1c   : > { %s2205_s30 = smov (!%p451_p13, %s1461_s30), 3  ;;  %v1628_v52 = vld [vmem:[%s2180_s4] ss:$0 sm:$0xff]  ;;  %s1784_s23 = smov 104   ;;  %vm684_vm10 = vcmask 130112   ;;  %vm746_vm11 = vcmask 195712  }
  0x1d   : > { %s1462_s15 = sshll.u32 %s2205_s30, 3  ;;  %s1785_s24 = smov 112   ;;  %vm808_vm12 = vcmask 261312  }
  0x1e   : > { %s1786_s30 = smov 80   ;;  %s1788_s16 = smov 48  }
  0x1f   : > { %s454_s20 = scalar_lea.vmem %s2197_s0, %s1462_s15  ;;  %555 = vmatpush.bf16.msra.mxu0 %v1545_v23  ;;  %s1787_s15 = smov 72  }
  0x20   : > { %v1921_v0 = vld [vmem:[%s454_s20] sm:$0xff]  ;;  %v1925_v2 = vld [vmem:[%s454_s20 + $0x8] sm:$0xff]  ;;  %v1635_v5 = vpop.eup %1634  ;;  %s1780_s20 = smov 88  }
  0x21   : > { %v463_v1 = vsel %vm462_vm0, %v1921_v0, 0.0  ;;  %v466_v3 = vsel %vm462_vm0, %v1925_v2, 0.0  ;;  %v470_v6 = vmul.f32 32.0, %v1635_v5  ;;  %vm474_vm1 = vweird.f32 %v1635_v5 }
  0x22   : > { %464 = vadd.xlane.f32.xlu0 %v463_v1 }
  0x23   : > { %v471_v7 = vsub.f32 1.0, %v470_v6 }
  0x25   : > { %v472_v8 = vmul.f32 %v1635_v5, %v471_v7 }
  0x27   : > { %v473_v9 = vadd.f32 %v1635_v5, %v472_v8 }
  0x29   : > { %v1929_v10 = vsel %vm474_vm1, %v1635_v5, %v473_v9 }
  0x2a   : > { %467 = vadd.xlane.f32.xlu0 %v466_v3 }
  0x95   : > { %v465_v11 = vpop.xlane.xlu0 %464 }
  0x96   : > { %v476_v12 = vmul.f32 %v1929_v10, %v465_v11 }
  0x98   : > { %v478_v13 = vsub.f32 %v1921_v0, %v476_v12 }
  0x9a   : > { %v480_v14 = vmul.f32 %v478_v13, %v478_v13 }
  0x9c   : > { %v482_v15 = vsel %vm462_vm0, %v480_v14, 0.0 }
  0x9d   : > { %483 = vadd.xlane.f32.xlu1 %v482_v15  ;;  %v468_v16 = vpop.xlane.xlu0 %467 }
  0x9e   : > { %v477_v17 = vmul.f32 %v1929_v10, %v468_v16 }
  0xa0   : > { %v479_v18 = vsub.f32 %v1925_v2, %v477_v17 }
  0xa2   : > { %v481_v19 = vmul.f32 %v479_v18, %v479_v18 }
  0xa4   : > { %v485_v20 = vsel %vm462_vm0, %v481_v19, 0.0 }
  0xa5   : > { %486 = vadd.xlane.f32.xlu1 %v485_v20 }
 0x110   : > { %v484_v22 = vpop.xlane.xlu1 %483 }
 0x111   : > { %v488_v24 = vmul.f32 %v484_v22, %v1929_v10 }
 0x113   : > { %v490_v25 = vadd.f32 1e-06, %v488_v24 }
 0x115   : > { %1636 = vrsqrt.f32 %v490_v25  ;;  %vm498_vm3 = vweird.f32 %v490_v25 }
 0x118   : > { %v487_v26 = vpop.xlane.xlu1 %486 }
 0x119   : > { %v489_v27 = vmul.f32 %v487_v26, %v1929_v10 }
 0x11b   : > { %v1637_v28 = vpop.eup %1636  ;;  %v491_v29 = vadd.f32 1e-06, %v489_v27 }
 0x11c   : > { %v493_v30 = vmul.f32 %v1637_v28, %v490_v25  ;;  %vm499_vm2 = vweird.f32 %v1637_v28 }
 0x11d   : > { %1638 = vrsqrt.f32 %v491_v29  ;;  %vm500_vm4 = vmor %vm498_vm3, %vm499_vm2  ;;  %vm508_vm6 = vweird.f32 %v491_v29 }
 0x11e   : > { %v494_v31 = vmul.f32 %v1637_v28, %v493_v30 }
 0x120   : > { %v495_v32 = vmul.f32 0.5, %v494_v31 }
 0x122   : > { %v496_v33 = vsub.f32 1.5, %v495_v32 }
 0x123   : > { %v1639_v34 = vpop.eup %1638 }
 0x124   : > { %v497_v35 = vmul.f32 %v1637_v28, %v496_v33  ;;  %v503_v36 = vmul.f32 %v1639_v34, %v491_v29  ;;  %vm509_vm5 = vweird.f32 %v1639_v34 }
 0x125   : > { %vm510_vm7 = vmor %vm508_vm6, %vm509_vm5 }
 0x126   : > { %v504_v37 = vmul.f32 %v1639_v34, %v503_v36  ;;  %v501_v38 = vsel %vm500_vm4, %v1637_v28, %v497_v35 }
 0x127   : > { %v512_v41 = vmul.f32 %v501_v38, %v478_v13 }
 0x128   : > { %v505_v39 = vmul.f32 0.5, %v504_v37 }
 0x129   : > { %v517_v46 = vmul.f32 %v1626_v42, %v512_v41 }
 0x12a   : > { %v506_v40 = vsub.f32 1.5, %v505_v39 }
 0x12b   : > { %v522_v49 = vadd.f32 %v1627_v47, %v517_v46 }
 0x12c   : > { %v507_v43 = vmul.f32 %v1639_v34, %v506_v40 }
 0x12e   : > { %v511_v44 = vsel %vm510_vm7, %v1639_v34, %v507_v43 }
 0x12f   : > { %v513_v45 = vmul.f32 %v511_v44, %v479_v18 }
 0x131   : > { %v518_v48 = vmul.f32 %v1626_v42, %v513_v45 }
 0x133   : > { %v523_v50 = vadd.f32 %v1627_v47, %v518_v48 }
 0x135   : > { %v524_v51 = vpack.c.bf16 %v523_v50, %v522_v49 }
 0x137   : > { %1471 = vmatmul.msk.bf16.vlgmr.msra.gmra.mxu0 %vm462_vm0, %v524_v51 }
 0x1b4   : > { %v557_v53 = vpop.f32.mrf.mxu0 }
 0x1b5   : > { %v558_v54 = vadd.f32 %v1628_v52, %v557_v53 }
 0x1b7   : > { %v1952_v55 = vpack.c.bf16 %v558_v54, %v558_v54  ;;  %v562_v56 = vmul.f32 0.35355338, %v558_v54 }
 0x1b9   : > { %626 = vrot.lane.b32.xlu0 %v1952_v55, %s1780_s20  ;;  %600 = vrot.lane.b32.xlu1 %v1952_v55, %s1781_s17  ;;  %v563_v57 = vpack.c.bf16 %v562_v56, %v562_v56 }
 0x1ba   : > { %566 = vrot.lane.b32.xlu2 %v1952_v55, %s1782_s21 }
 0x1bc   : > { %v559_v58 = vpop.f32.mrf.mxu0 }
 0x1bd   : > { %v560_v59 = vadd.f32 %v1628_v52, %v559_v58 }
 0x1bf   : > { %v1961_v60 = vpack.c.bf16 %v560_v59, %v560_v59  ;;  %v810_v61 = vmul.f32 0.35355338, %v560_v59 }
 0x1c1   : > { %624 = vrot.lane.b32.xlu1 %v563_v57, %s1783_s22  ;;  %v811_v62 = vpack.c.bf16 %v810_v61, %v810_v61 }
 0x1c9   : > { %748 = vrot.lane.b32.xlu1 %v563_v57, %s1784_s23 }
 0x1d1   : > { %686 = vrot.lane.b32.xlu1 %v563_v57, %s1785_s24 }
 0x1d9   : > { %814 = vrot.lane.b32.xlu1 %v1961_v60, %s1782_s21  ;;  %s2190_s21 = smov 8  }
 0x1e1   : > { %992 = vrot.lane.b32.xlu1 %v811_v62, %s1784_s23  ;;  %s1793_s23 = smov 24  }
 0x214   : > { %v567_v63 = vpop.permute.xlu2 %566 }
 0x215   : > { %v573_v1 = vsel %vm568_vm8, %v567_v63, 0 }
 0x216   : > { %582 = vmatpush.bf16.xpose.msra.mxu1 %v573_v1 }
 0x21d   : > { %1472 = vmatmul.msk.bf16.vlgmr.msra.gmra.mxu1 %vm568_vm8, %v563_v57 }
 0x22b   : > { %v627_v3 = vpop.permute.xlu0 %626  ;;  %v601_v4 = vpop.permute.xlu1 %600 }
 0x22c   : > { %v607_v5 = vsel %vm605_vm9, %v601_v4, 0  ;;  %v632_v6 = vsel %vm568_vm8, %v627_v3, 0 }
 0x22d   : > { %616 = vmatpush.bf16.msra.mxu2 %v607_v5 }
 0x231   : > { %641 = vmatpush.bf16.xpose.msrb.mxu2 %v632_v6 }
 0x233   : > { %v625_v11 = vpop.permute.xlu1 %624 }
 0x23b   : > { %v749_v12 = vpop.permute.xlu1 %748 }
 0x243   : > { %v687_v13 = vpop.permute.xlu1 %686 }
 0x24b   : > { %v815_v17 = vpop.permute.xlu1 %814 }
 0x24c   : > { %v820_v20 = vsel %vm568_vm8, %v815_v17, 0 }
 0x253   : > { %v993_v42 = vpop.permute.xlu1 %992 }
 0x29a   : > { %v584_v7 = vpop.f32.mrf.mxu1 }
 0x29b   : > { %v588_v8 = vsel %vm568_vm8, %v584_v7, -inf }
 0x29c   : > { %589 = vmax.xlane.f32.xlu2 %v588_v8 }
 0x2a2   : > { %v586_v9 = vpop.f32.mrf.mxu1 }
 0x2b4   : > { %688 = vrot.lane.b32.xlu2 %v1952_v55, %s1786_s30 }
 0x2bc   : > { %933 = vrot.lane.b32.xlu2 %v1961_v60, %s1786_s30 }
 0x30f   : > { %v590_v14 = vpop.xlane.xlu2 %589 }
 0x310   : > { %v591_v15 = vsub.f32 %v584_v7, %v590_v14 }
 0x312   : > { %v592_v16 = vmul.f32 1.442695, %v591_v15 }
 0x314   : > { %1640 = vpow2.f32 %v592_v16 }
 0x317   : > { %v689_v18 = vpop.permute.xlu2 %688 }
 0x318   : > { %v694_v19 = vsel %vm568_vm8, %v689_v18, 0 }
 0x319   : > { %703 = vmatpush.bf16.xpose.msrb.mxu0 %v694_v19 }
 0x31a   : > { %v1641_v21 = vpop.eup %1640 }
 0x31b   : > { %v594_v22 = vsel %vm568_vm8, %v1641_v21, 0.0 }
 0x31c   : > { %595 = vadd.xlane.f32.xlu0 %v594_v22 }
 0x31f   : > { %v934_v23 = vpop.permute.xlu2 %933 }
 0x320   : > { %v939_v24 = vsel %vm568_vm8, %v934_v23, 0  ;;  %1476 = vmatmul.msk.bf16.vlgmr.msrb.gmra.mxu0 %vm568_vm8, %v687_v13 }
 0x321   : > { %829 = vmatpush.bf16.xpose.msra.mxu0 %v820_v20 }
 0x329   : > { %948 = vmatpush.bf16.xpose.msrb.mxu0 %v939_v24 }
 0x330   : > { %750 = vrot.lane.b32.xlu0 %v1952_v55, %s1787_s15  ;;  %1480 = vmatmul.msk.bf16.vlgmr.msra.gmra.mxu0 %vm568_vm8, %v811_v62 }
 0x338   : > { %872 = vrot.lane.b32.xlu0 %v1961_v60, %s1780_s20  ;;  %s1789_s20 = smov 56  }
 0x340   : > { %870 = vrot.lane.b32.xlu0 %v811_v62, %s1783_s22  ;;  %s1792_s22 = smov 16  }
 0x348   : > { %994 = vrot.lane.b32.xlu0 %v1961_v60, %s1787_s15 }
 0x350   : > { %931 = vrot.lane.b32.xlu0 %v811_v62, %s1785_s24  ;;  %s447_s24 = sand.u32 1, %s1768_s26  }
 0x38f   : > { %v596_v25 = vpop.xlane.xlu0 %595 }
 0x390   : > { %1642 = vrcp.f32 %v596_v25 }
 0x396   : > { %v1643_v26 = vpop.eup %1642 }
 0x397   : > { %v598_v27 = vmul.f32 %v1643_v26, %v1641_v21 }
 0x399   : > { %v599_v28 = vpack.c.bf16 %v598_v27, %v598_v27 }
 0x39b   : > { %1473 = vmatmul.msk.bf16.vlgmr.msra.gmra.mxu2 %vm568_vm8, %v599_v28 }
 0x39d   : > { %v705_v29 = vpop.f32.mrf.mxu0 }
 0x39e   : > { %v709_v30 = vsel %vm568_vm8, %v705_v29, -inf }
 0x39f   : > { %710 = vmax.xlane.f32.xlu0 %v709_v30 }
 0x3a2   : > { %v751_v31 = vpop.permute.xlu0 %750 }
 0x3a3   : > { %v756_v32 = vsel %vm568_vm8, %v751_v31, 0 }
 0x3a4   : > { %765 = vmatpush.bf16.xpose.msra.mxu3 %v756_v32 }
 0x3a5   : > { %v707_v33 = vpop.f32.mrf.mxu0 }
 0x3aa   : > { %v873_v34 = vpop.permute.xlu0 %872 }
 0x3ab   : > { %1474 = vmatmul.msk.bf16.vlgmr.msrb.gmra.mxu2 %vm568_vm8, %v625_v11  ;;  %1478 = vmatmul.msk.bf16.vlgmr.msra.gmra.mxu3 %vm568_vm8, %v749_v12  ;;  %v878_v35 = vsel %vm568_vm8, %v873_v34, 0 }
 0x3ac   : > { %887 = vmatpush.bf16.xpose.msrb.mxu3 %v878_v35 }
 0x3ad   : > { %v1989_v36 = vpop.f32.mrf.mxu0 }
 0x3ae   : > { %v835_v52 = vsel %vm568_vm8, %v1989_v36, -inf }
 0x3b2   : > { %v871_v37 = vpop.permute.xlu0 %870 }
 0x3b5   : > { %v833_v38 = vpop.f32.mrf.mxu0 }
 0x3ba   : > { %v995_v39 = vpop.permute.xlu0 %994 }
 0x3bb   : > { %v1000_v40 = vsel %vm568_vm8, %v995_v39, 0  ;;  %1482 = vmatmul.msk.bf16.vlgmr.msrb.gmra.mxu3 %vm568_vm8, %v871_v37 }
 0x3bc   : > { %1009 = vmatpush.bf16.xpose.msra.mxu3 %v1000_v40 }
 0x3c2   : > { %v932_v41 = vpop.permute.xlu0 %931 }
 0x3c3   : > { %1484 = vmatmul.msk.bf16.vlgmr.msrb.gmra.mxu0 %vm568_vm8, %v932_v41 }
 0x3cb   : > { %1486 = vmatmul.msk.bf16.vlgmr.msra.gmra.mxu3 %vm568_vm8, %v993_v42 }
 0x412   : > { %v711_v49 = vpop.xlane.xlu0 %710 }
 0x413   : > { %v712_v53 = vsub.f32 %v705_v29, %v711_v49 }
 0x415   : > { %v713_v54 = vmul.f32 1.442695, %v712_v53 }
 0x417   : > { %1644 = vpow2.f32 %v713_v54 }
 0x41d   : > { %v1645_v61 = vpop.eup %1644 }
 0x41e   : > { %v618_v43 = vpop.f32.mrf.mxu2  ;;  %v715_v1 = vsel %vm568_vm8, %v1645_v61, 0.0 }
 0x41f   : > { %622 = vst.msk [vmem:[#allocation2] sm:$0xff] %vm568_vm8, %v618_v43 }
 0x426   : > { %v620_v44 = vpop.f32.mrf.mxu2 }
 0x42e   : > { %v643_v45 = vpop.f32.mrf.mxu2  ;;  %v767_v46 = vpop.f32.mrf.mxu3 }
 0x42f   : > { %v647_v47 = vsel %vm568_vm8, %v643_v45, -inf  ;;  %v771_v48 = vsel %vm568_vm8, %v767_v46, -inf }
 0x430   : > { %648 = vmax.xlane.f32.xlu1 %v647_v47  ;;  %772 = vmax.xlane.f32.xlu2 %v771_v48 }
 0x436   : > { %v645_v50 = vpop.f32.mrf.mxu2  ;;  %v769_v51 = vpop.f32.mrf.mxu3 }
 0x438   : > { %836 = vmax.xlane.f32.xlu1 %v835_v52 }
 0x43e   : > { %v889_v56 = vpop.f32.mrf.mxu3 }
 0x43f   : > { %v893_v57 = vsel %vm568_vm8, %v889_v56, -inf }
 0x440   : > { %894 = vmax.xlane.f32.xlu2 %v893_v57  ;;  %v950_v58 = vpop.f32.mrf.mxu0 }
 0x441   : > { %v954_v59 = vsel %vm568_vm8, %v950_v58, -inf }
 0x442   : > { %955 = vmax.xlane.f32.xlu1 %v954_v59 }
 0x446   : > { %v891_v62 = vpop.f32.mrf.mxu3 }
 0x448   : > { %v952_v63 = vpop.f32.mrf.mxu0 }
 0x44a   : > { %716 = vadd.xlane.f32.xlu1 %v715_v1 }
 0x44e   : > { %v1011_v3 = vpop.f32.mrf.mxu3 }
 0x44f   : > { %v1015_v4 = vsel %vm568_vm8, %v1011_v3, -inf }
 0x450   : > { %1016 = vmax.xlane.f32.xlu0 %v1015_v4 }
 0x456   : > { %v1013_v5 = vpop.f32.mrf.mxu3 }
 0x463   : > { %721 = vrot.lane.b32.xlu1 %v1952_v55, %s1788_s16 }
 0x464   : > { %659 = vrot.lane.b32.xlu0 %v1952_v55, %s1789_s20 }
 0x46b   : > { %905 = vrot.lane.b32.xlu1 %v1961_v60, %s1789_s20  ;;  %s1559_s20 = sshll.u32 %s1886_s29, 4  ;;  %s1365_s29 = scalar_lea.sflag [#allocation5], %s447_s24 }
 0x473   : > { %847 = vrot.lane.b32.xlu1 %v1961_v60, %s1781_s17  ;;  %s1790_s17 = smov 40  }
 0x4a3   : > { %v649_v6 = vpop.xlane.xlu1 %648  ;;  %v773_v7 = vpop.xlane.xlu2 %772 }
 0x4a4   : > { %v774_v8 = vsub.f32 %v767_v46, %v773_v7  ;;  %v650_v11 = vsub.f32 %v643_v45, %v649_v6 }
 0x4a6   : > { %v775_v9 = vmul.f32 1.442695, %v774_v8  ;;  %v651_v12 = vmul.f32 1.442695, %v650_v11 }
 0x4a8   : > { %1646 = vpow2.f32 %v775_v9 }
 0x4a9   : > { %1648 = vpow2.f32 %v651_v12 }
 0x4ab   : > { %v837_v13 = vpop.xlane.xlu1 %836 }
 0x4ae   : > { %v2010_v14 = vpop.eup %1646 }
 0x4af   : > { %v777_v15 = vsel %vm568_vm8, %v2010_v14, 0.0  ;;  %v1649_v18 = vpop.eup %1648 }
 0x4b0   : > { %778 = vadd.xlane.f32.xlu2 %v777_v15  ;;  %v653_v22 = vsel %vm568_vm8, %v1649_v18, 0.0 }
 0x4b3   : > { %v895_v16 = vpop.xlane.xlu2 %894 }
 0x4b4   : > { %v896_v17 = vsub.f32 %v889_v56, %v895_v16 }
 0x4b5   : > { %v956_v19 = vpop.xlane.xlu1 %955 }
 0x4b6   : > { %v897_v20 = vmul.f32 1.442695, %v896_v17  ;;  %v957_v21 = vsub.f32 %v950_v58, %v956_v19 }
 0x4b8   : > { %1650 = vpow2.f32 %v897_v20  ;;  %654 = vadd.xlane.f32.xlu2 %v653_v22  ;;  %v958_v23 = vmul.f32 1.442695, %v957_v21 }
 0x4ba   : > { %1652 = vpow2.f32 %v958_v23 }
 0x4bd   : > { %v717_v31 = vpop.xlane.xlu1 %716 }
 0x4be   : > { %v2015_v24 = vpop.eup %1650 }
 0x4bf   : > { %v899_v25 = vsel %vm568_vm8, %v2015_v24, 0.0 }
 0x4c0   : > { %900 = vadd.xlane.f32.xlu0 %v899_v25  ;;  %v2019_v27 = vpop.eup %1652 }
 0x4c1   : > { %v960_v30 = vsel %vm568_vm8, %v2019_v27, 0.0 }
 0x4c3   : > { %v1017_v26 = vpop.xlane.xlu0 %1016 }
 0x4c4   : > { %v1018_v28 = vsub.f32 %v1011_v3, %v1017_v26 }
 0x4c6   : > { %v1019_v29 = vmul.f32 1.442695, %v1018_v28 }
 0x4c8   : > { %1654 = vpow2.f32 %v1019_v29  ;;  %961 = vadd.xlane.f32.xlu0 %v960_v30 }
 0x4c9   : > { %1656 = vrcp.f32 %v717_v31 }
 0x4ce   : > { %v1655_v32 = vpop.eup %1654 }
 0x4cf   : > { %v1021_v33 = vsel %vm568_vm8, %v1655_v32, 0.0  ;;  %v1657_v34 = vpop.eup %1656 }
 0x4d0   : > { %1022 = vadd.xlane.f32.xlu1 %v1021_v33  ;;  %783 = vrot.lane.b32.xlu2 %v1952_v55, %s1790_s17  ;;  %v719_v35 = vmul.f32 %v1657_v34, %v1645_v61  ;;  %v838_v55 = vsub.f32 %v1989_v36, %v837_v13 }
 0x4d2   : > { %v720_v41 = vpack.c.bf16 %v719_v35, %v719_v35  ;;  %v839_v45 = vmul.f32 1.442695, %v838_v55  ;;  %v1548_v35 = vld [vmem:[%s2181_s5 + $0x8] sm:$0xff] }
 0x4d3   : > { %1085 = vmatpush.bf16.msra.mxu0 %v1548_v35  ;;  %v1557_v35 = vld [vmem:[%s2187_s11 + $0x30] sm:$0xff] }
 0x4d4   : > { %1658 = vpow2.f32 %v839_v45 }
 0x4d5   : > { %v722_v37 = vpop.permute.xlu1 %721 }
 0x4d6   : > { %v660_v38 = vpop.permute.xlu0 %659  ;;  %v727_v39 = vsel %vm605_vm9, %v722_v37, 0  ;;  %v1547_v37 = vld [vmem:[%s2181_s5] sm:$0xff] }
 0x4d7   : > { %v665_v40 = vsel %vm605_vm9, %v660_v38, 0  ;;  %736 = vmatpush.bf16.msrb.mxu1 %v727_v39  ;;  %1086 = vmatpush.bf16.msra.mxu0 %v1547_v37 }
 0x4d8   : > { %674 = vmatpush.bf16.msra.mxu2 %v665_v40 }
 0x4da   : > { %1477 = vmatmul.msk.bf16.vlgmr.msrb.gmra.mxu1 %vm568_vm8, %v720_v41  ;;  %v1659_v46 = vpop.eup %1658 }
 0x4db   : > { %v841_v47 = vsel %vm568_vm8, %v1659_v46, 0.0 }
 0x4dc   : > { %1027 = vrot.lane.b32.xlu0 %v1961_v60, %s1790_s17 }
 0x4dd   : > { %v906_v42 = vpop.permute.xlu1 %905 }
 0x4de   : > { %v911_v36 = vsel %vm605_vm9, %v906_v42, 0 }
 0x4e5   : > { %v848_v43 = vpop.permute.xlu1 %847 }
 0x4e6   : > { %v853_v44 = vsel %vm605_vm9, %v848_v43, 0 }
 0x4e7   : > { %862 = vmatpush.bf16.msra.mxu1 %v853_v44  ;;  %v1629_v44 = vld [vmem:[%s2182_s6] ss:$0 sm:$0xff] }
 0x4f9   : > { %842 = vadd.xlane.f32.xlu2 %v841_v47 }
 0x511   : > { %966 = vrot.lane.b32.xlu2 %v1961_v60, %s1788_s16  ;;  %s1460_s16 = sshll.u32 %s447_s24, 4 }
 0x512   : > { %s449_s17 = scalar_lea.vmem [#allocation6], %s1460_s16 }
 0x513   : > { %s1377_s0 = sshll.u32 %s449_s17, 4  ;;  %s1378_s0 = int_to_ptr.vmem [resolvable:$true] %s1377_s0 }
 0x523   : > { %v779_v48 = vpop.xlane.xlu2 %778 }
 0x52b   : > { %v655_v49 = vpop.xlane.xlu2 %654 }
 0x52c   : > { %1660 = vrcp.f32 %v655_v49 }
 0x52d   : > { %1662 = vrcp.f32 %v779_v48 }
 0x532   : > { %v1661_v50 = vpop.eup %1660 }
 0x533   : > { %v657_v51 = vmul.f32 %v1661_v50, %v1649_v18  ;;  %v784_v52 = vpop.permute.xlu2 %783  ;;  %v901_v56 = vpop.xlane.xlu0 %900 }
 0x534   : > { %v789_v53 = vsel %vm605_vm9, %v784_v52, 0  ;;  %v1663_v57 = vpop.eup %1662  ;;  %1664 = vrcp.f32 %v901_v56 }
 0x535   : > { %v658_v54 = vpack.c.bf16 %v657_v51, %v657_v51  ;;  %798 = vmatpush.bf16.msrb.mxu2 %v789_v53  ;;  %v781_v60 = vmul.f32 %v1663_v57, %v2010_v14 }
 0x537   : > { %1475 = vmatmul.msk.bf16.vlgmr.msra.gmra.mxu2 %vm568_vm8, %v658_v54  ;;  %v782_v58 = vpack.c.bf16 %v781_v60, %v781_v60 }
 0x539   : > { %920 = vmatpush.bf16.msra.mxu2 %v911_v36 }
 0x53a   : > { %v1665_v62 = vpop.eup %1664 }
 0x53b   : > { %v962_v59 = vpop.xlane.xlu0 %961  ;;  %v903_v1 = vmul.f32 %v1665_v62, %v2015_v24 }
 0x53d   : > { %v904_v3 = vpack.c.bf16 %v903_v1, %v903_v1  ;;  %v1549_v1 = vld [vmem:[%s2185_s9] sm:$0xff] }
 0x543   : > { %v1023_v4 = vpop.xlane.xlu1 %1022 }
 0x544   : > { %1666 = vrcp.f32 %v1023_v4 }
 0x547   : > { %1479 = vmatmul.msk.bf16.vlgmr.msrb.gmra.mxu2 %vm568_vm8, %v782_v58 }
 0x54a   : > { %v1667_v6 = vpop.eup %1666 }
 0x54b   : > { %v1025_v8 = vmul.f32 %v1667_v6, %v1655_v32 }
 0x54d   : > { %v1026_v9 = vpack.c.bf16 %v1025_v8, %v1025_v8 }
 0x54e   : > { %v1028_v61 = vpop.permute.xlu0 %1027 }
 0x54f   : > { %v1033_v63 = vsel %vm605_vm9, %v1028_v61, 0 }
 0x550   : > { %1042 = vmatpush.bf16.msrb.mxu2 %v1033_v63 }
 0x557   : > { %v738_v5 = vpop.f32.mrf.mxu1  ;;  %1483 = vmatmul.msk.bf16.vlgmr.msra.gmra.mxu2 %vm568_vm8, %v904_v3 }
 0x55f   : > { %v740_v7 = vpop.f32.mrf.mxu1 }
 0x567   : > { %1487 = vmatmul.msk.bf16.vlgmr.msrb.gmra.mxu2 %vm568_vm8, %v1026_v9 }
 0x56c   : > { %v843_v11 = vpop.xlane.xlu2 %842 }
 0x56d   : > { %1668 = vrcp.f32 %v843_v11 }
 0x56e   : > { %1670 = vrcp.f32 %v962_v59  ;;  %v1550_v59 = vld [vmem:[%s2185_s9 + $0x8] sm:$0xff] }
 0x573   : > { %v1669_v12 = vpop.eup %1668 }
 0x574   : > { %v845_v13 = vmul.f32 %v1669_v12, %v1659_v46  ;;  %v967_v14 = vpop.permute.xlu2 %966  ;;  %v1671_v17 = vpop.eup %1670 }
 0x575   : > { %v972_v15 = vsel %vm605_vm9, %v967_v14, 0  ;;  %v964_v18 = vmul.f32 %v1671_v17, %v2019_v27 }
 0x576   : > { %v846_v16 = vpack.c.bf16 %v845_v13, %v845_v13  ;;  %981 = vmatpush.bf16.msrb.mxu1 %v972_v15 }
 0x577   : > { %v965_v19 = vpack.c.bf16 %v964_v18, %v964_v18 }
 0x578   : > { %1481 = vmatmul.msk.bf16.vlgmr.msra.gmra.mxu1 %vm568_vm8, %v846_v16 }
 0x57a   : > { %1181 = vmatpush.bf16.msra.mxu1 %v1550_v59  ;;  %v1553_v59 = vld [vmem:[%s2187_s11 + $0x10] sm:$0xff] }
 0x57e   : > { %1182 = vmatpush.bf16.msra.mxu1 %v1549_v1 }
 0x588   : > { %1485 = vmatmul.msk.bf16.vlgmr.msrb.gmra.mxu1 %vm568_vm8, %v965_v19 }
 0x5ba   : > { %v676_v20 = vpop.f32.mrf.mxu2 }
 0x5bb   : > { %681 = vrot.lane.b32.xlu0 %v676_v20, %s2190_s21 }
 0x5c2   : > { %v678_v21 = vpop.f32.mrf.mxu2 }
 0x5c3   : > { %743 = vrot.lane.b32.xlu0 %v738_v5, %s1792_s22 }
 0x5ca   : > { %v800_v22 = vpop.f32.mrf.mxu2 }
 0x5cb   : > { %805 = vrot.lane.b32.xlu0 %v800_v22, %s1793_s23  ;;  %v1631_v22 = vld [vmem:[%s2184_s8] ss:$0 sm:$0xff] }
 0x5d2   : > { %v802_v23 = vpop.f32.mrf.mxu2 }
 0x5da   : > { %v922_v24 = vpop.f32.mrf.mxu2 }
 0x5db   : > { %927 = vrot.lane.b32.xlu1 %v922_v24, %s2190_s21  ;;  %s1376_s21 = scalar_lea.hbm %s2189_s13, %s1559_s20 }
 0x5dc   : > { %s1379_s1 = sshll.u32 %s1376_s21, 4  ;;  %s1380_s1 = int_to_ptr.hbm [resolvable:$true] %s1379_s1 }
 0x5dd   : > { %s1724_s30 = sshra.s32 %s1380_s1, 4  ;;  %s1725_s30 = int_to_ptr.hbm [resolvable:$true] %s1724_s30 }
 0x5de   : > { %s1726_s15 = scalar_lea.hbm %s1725_s30, 16  ;;  %p1731_p3 = scmp.lt.s32.totalorder %s1725_s30, %s2189_s13 }
 0x5df   : > { %p1727_p0 = scmp.ne.s32.totalorder %s1725_s30, %s1726_s15 }
 0x5e1   : > { %p1728_p1 = pnand %p1727_p0, %p1903_p5 }
 0x5e2   : > { %v924_v25 = vpop.f32.mrf.mxu2 }
 0x5e3   : > { %p1729_p2 = pneg %p1728_p1 }
 0x5ea   : > { %v1044_v26 = vpop.f32.mrf.mxu2 }
 0x5f2   : > { %v1046_v27 = vpop.f32.mrf.mxu2 }
 0x5f5   : > { %v864_v28 = vpop.f32.mrf.mxu1 }
 0x5f6   : > { %868 = vst.msk [vmem:[#allocation2 + $0x8] sm:$0xff] %vm568_vm8, %v864_v28 }
 0x5fd   : > { %v866_v29 = vpop.f32.mrf.mxu1 }
 0x5fe   : > { %v1632_v29 = vld [vmem:[%s2186_s10] ss:$0 sm:$0xff] }
 0x605   : > { %v983_v30 = vpop.f32.mrf.mxu1 }
 0x606   : > { %988 = vrot.lane.b32.xlu2 %v983_v30, %s1792_s22  ;;  %s1730_s22 = scalar_lea.hbm %s2189_s13, 32 }
 0x607   : > { %p1732_p4 = scmp.lt.s32.totalorder %s1730_s22, %s1726_s15 }
 0x609   : > { %p1733_p7 = por %p1732_p4, %p1731_p3 }
 0x60b   : > { %p1734_p8 = pnand %p1733_p7, %p1729_p2 }
 0x60d   : > { %v985_v31 = vpop.f32.mrf.mxu1 }
 0x60e   : > { %1049 = vrot.lane.b32.xlu2 %v1044_v26, %s1793_s23 }
 0x62d   : > { %v682_v32 = vpop.permute.xlu0 %681 }
 0x62e   : > { %685 = vst.msk [vmem:[#allocation2] sm:$0xff] %vm684_vm10, %v682_v32  ;;  %v1558_v32 = vld [vmem:[%s2187_s11 + $0x38] sm:$0xff] }
 0x62f   : > { %1346 = vmatpush.bf16.msrb.mxu3 %v1558_v32 }
 0x633   : > { %1347 = vmatpush.bf16.msrb.mxu3 %v1557_v35 }
 0x635   : > { %v744_v33 = vpop.permute.xlu0 %743 }
 0x636   : > { %747 = vst.msk [vmem:[#allocation2] sm:$0xff] %vm746_vm11, %v744_v33 }
 0x63d   : > { %v806_v34 = vpop.permute.xlu0 %805 }
 0x63e   : > { %809 = vst.msk [vmem:[#allocation2] sm:$0xff] %vm808_vm12, %v806_v34 }
 0x645   : > { %v1053_v41 = vld [vmem:[#allocation2] sm:$0xff] }
 0x64d   : > { %v928_v38 = vpop.permute.xlu1 %927 }
 0x64e   : > { %930 = vst.msk [vmem:[#allocation2 + $0x8] sm:$0xff] %vm684_vm10, %v928_v38 }
 0x660   : > { %v989_v39 = vpop.permute.xlu2 %988 }
 0x661   : > { %991 = vst.msk [vmem:[#allocation2 + $0x8] sm:$0xff] %vm746_vm11, %v989_v39 }
 0x668   : > { %v1050_v40 = vpop.permute.xlu2 %1049 }
 0x669   : > { %1052 = vst.msk [vmem:[#allocation2 + $0x8] sm:$0xff] %vm808_vm12, %v1050_v40 }
 0x670   : > { %v1054_v42 = vld [vmem:[#allocation2 + $0x8] sm:$0xff] }
 0x671   : > { %v1055_v43 = vpack.c.bf16 %v1054_v42, %v1053_v41  ;;  %v1556_v42 = vld [vmem:[%s2187_s11 + $0x28] sm:$0xff] }
 0x672   : > { %1348 = vmatpush.bf16.msrb.mxu3 %v1556_v42 }
 0x673   : > { %1496 = vmatmul.msk.bf16.vlgmr.msra.gmra.mxu0 %vm462_vm0, %v1055_v43 }
 0x6f0   : > { %v1088_v55 = vpop.f32.mrf.mxu0 }
 0x6f1   : > { %v1089_v45 = vadd.f32 %v1629_v44, %v1088_v55 }
 0x6f3   : > { %v2061_v46 = vadd.f32 %v1089_v45, %v1921_v0 }
 0x6f5   : > { %v1097_v47 = vsel %vm462_vm0, %v2061_v46, 0.0 }
 0x6f6   : > { %1098 = vadd.xlane.f32.xlu0 %v1097_v47  ;;  %v1555_v47 = vld [vmem:[%s2187_s11 + $0x20] sm:$0xff] }
 0x6f7   : > { %1349 = vmatpush.bf16.msrb.mxu3 %v1555_v47 }
 0x6f8   : > { %v1090_v48 = vpop.f32.mrf.mxu0 }
 0x6f9   : > { %v1091_v49 = vadd.f32 %v1629_v44, %v1090_v48 }
 0x6fb   : > { %v2066_v50 = vadd.f32 %v1091_v49, %v1925_v2 }
 0x6fd   : > { %v1100_v51 = vsel %vm462_vm0, %v2066_v50, 0.0 }
 0x6fe   : > { %1101 = vadd.xlane.f32.xlu2 %v1100_v51 }
 0x769   : > { %v1099_v52 = vpop.xlane.xlu0 %1098 }
 0x76a   : > { %v1103_v53 = vmul.f32 %v1099_v52, %v1929_v10 }
 0x76c   : > { %v1105_v54 = vsub.f32 %v2061_v46, %v1103_v53 }
 0x76e   : > { %v1107_v0 = vmul.f32 %v1105_v54, %v1105_v54 }
 0x770   : > { %v1109_v36 = vsel %vm462_vm0, %v1107_v0, 0.0 }
 0x771   : > { %v1102_v56 = vpop.xlane.xlu2 %1101  ;;  %1110 = vadd.xlane.f32.xlu1 %v1109_v36 }
 0x772   : > { %v1104_v57 = vmul.f32 %v1102_v56, %v1929_v10 }
 0x774   : > { %v1106_v60 = vsub.f32 %v2066_v50, %v1104_v57 }
 0x776   : > { %v1108_v2 = vmul.f32 %v1106_v60, %v1106_v60 }
 0x778   : > { %v1112_v58 = vsel %vm462_vm0, %v1108_v2, 0.0 }
 0x779   : > { %1113 = vadd.xlane.f32.xlu0 %v1112_v58 }
 0x7e4   : > { %v1111_v61 = vpop.xlane.xlu1 %1110 }
 0x7e5   : > { %v1115_v62 = vmul.f32 %v1111_v61, %v1929_v10 }
 0x7e7   : > { %v1117_v63 = vadd.f32 1e-06, %v1115_v62 }
 0x7e9   : > { %1672 = vrsqrt.f32 %v1117_v63  ;;  %vm1125_vm14 = vweird.f32 %v1117_v63 }
 0x7ec   : > { %v1114_v3 = vpop.xlane.xlu0 %1113 }
 0x7ed   : > { %v1116_v4 = vmul.f32 %v1114_v3, %v1929_v10  ;;  %v1630_v10 = vld [vmem:[%s2183_s7] ss:$0 sm:$0xff] }
 0x7ef   : > { %v1673_v5 = vpop.eup %1672  ;;  %v1118_v6 = vadd.f32 1e-06, %v1116_v4 }
 0x7f0   : > { %v1120_v7 = vmul.f32 %v1673_v5, %v1117_v63  ;;  %vm1126_vm13 = vweird.f32 %v1673_v5 }
 0x7f1   : > { %1674 = vrsqrt.f32 %v1118_v6  ;;  %vm1127_vm15 = vmor %vm1125_vm14, %vm1126_vm13  ;;  %vm1135_vm2 = vweird.f32 %v1118_v6 }
 0x7f2   : > { %v1121_v8 = vmul.f32 %v1673_v5, %v1120_v7 }
 0x7f4   : > { %v1122_v9 = vmul.f32 0.5, %v1121_v8 }
 0x7f6   : > { %v1123_v11 = vsub.f32 1.5, %v1122_v9 }
 0x7f7   : > { %v1675_v12 = vpop.eup %1674 }
 0x7f8   : > { %v1124_v13 = vmul.f32 %v1673_v5, %v1123_v11  ;;  %v1130_v14 = vmul.f32 %v1675_v12, %v1118_v6  ;;  %vm1136_vm1 = vweird.f32 %v1675_v12  ;;  %v1552_v6 = vld [vmem:[%s2187_s11 + $0x8] sm:$0xff] }
 0x7f9   : > { %vm1137_vm3 = vmor %vm1135_vm2, %vm1136_vm1 }
 0x7fa   : > { %v1131_v15 = vmul.f32 %v1675_v12, %v1130_v14  ;;  %v1128_v16 = vsel %vm1127_vm15, %v1673_v5, %v1124_v13  ;;  %v1551_v13 = vld [vmem:[%s2187_s11] sm:$0xff] }
 0x7fb   : > { %v1139_v19 = vmul.f32 %v1128_v16, %v1105_v54  ;;  %v1554_v54 = vld [vmem:[%s2187_s11 + $0x18] sm:$0xff] }
 0x7fc   : > { %v1132_v17 = vmul.f32 0.5, %v1131_v15  ;;  %1350 = vmatpush.bf16.msrb.mxu3 %v1554_v54 }
 0x7fd   : > { %v1144_v23 = vmul.f32 %v1630_v10, %v1139_v19 }
 0x7fe   : > { %v1133_v18 = vsub.f32 1.5, %v1132_v17 }
 0x7ff   : > { %v1149_v26 = vadd.f32 %v1631_v22, %v1144_v23 }
 0x800   : > { %v1134_v20 = vmul.f32 %v1675_v12, %v1133_v18  ;;  %1351 = vmatpush.bf16.msrb.mxu3 %v1553_v59 }
 0x802   : > { %v1138_v21 = vsel %vm1137_vm3, %v1675_v12, %v1134_v20 }
 0x803   : > { %v1140_v24 = vmul.f32 %v1138_v21, %v1106_v60 }
 0x804   : > { %1352 = vmatpush.bf16.msrb.mxu3 %v1552_v6 }
 0x805   : > { %v1145_v25 = vmul.f32 %v1630_v10, %v1140_v24 }
 0x807   : > { %v1150_v27 = vadd.f32 %v1631_v22, %v1145_v25 }
 0x808   : > { %1353 = vmatpush.bf16.msrb.mxu3 %v1551_v13 }
 0x809   : > { %v1151_v28 = vpack.c.bf16 %v1150_v27, %v1149_v26 }
 0x80b   : > { %1505 = vmatmul.msk.bf16.vlgmr.msra.gmra.mxu1 %vm462_vm0, %v1151_v28 }
 0x888   : > { %v1184_v30 = vpop.f32.mrf.mxu1 }
 0x889   : > { %v2094_v31 = vadd.f32 %v1632_v29, %v1184_v30 }
 0x88b   : > { %v2100_v33 = vmul.f32 0.70710677, %v2094_v31 }
 0x88d   : > { %v1193_v34 = vmul.f32 %v2100_v33, %v2100_v33 }
 0x88f   : > { %v1194_v37 = vmin.f32 %v1193_v34, 16.0 }
 0x890   : > { %v1186_v38 = vpop.f32.mrf.mxu1 }
 0x891   : > { %v1195_v39 = vmul.f32 2.1237322e-06, %v1194_v37  ;;  %v1206_v40 = vmul.f32 3.8918573e-05, %v1194_v37  ;;  %v2107_v41 = vadd.f32 %v1632_v29, %v1186_v38 }
 0x893   : > { %v1196_v43 = vadd.f32 0.00028619796, %v1195_v39  ;;  %v1207_v44 = vadd.f32 0.001143296, %v1206_v40  ;;  %v2113_v55 = vmul.f32 0.70710677, %v2107_v41 }
 0x895   : > { %v1208_v45 = vmul.f32 %v1207_v44, %v1194_v37  ;;  %v1233_v48 = vmul.f32 %v2113_v55, %v2113_v55  ;;  %v1197_v49 = vmul.f32 %v1196_v43, %v1194_v37 }
 0x897   : > { %v1209_v51 = vadd.f32 0.014752088, %v1208_v45  ;;  %v1234_v52 = vmin.f32 %v1233_v48, 16.0  ;;  %v1198_v56 = vadd.f32 0.0036580483, %v1197_v49 }
 0x899   : > { %v1210_v53 = vmul.f32 %v1209_v51, %v1194_v37  ;;  %v1235_v0 = vmul.f32 2.1237322e-06, %v1234_v52  ;;  %v1246_v36 = vmul.f32 3.8918573e-05, %v1234_v52  ;;  %v1199_v63 = vmul.f32 %v1198_v56, %v1194_v37 }
 0x89b   : > { %v1211_v57 = vadd.f32 0.112945676, %v1210_v53  ;;  %v1236_v60 = vadd.f32 0.00028619796, %v1235_v0  ;;  %v1247_v2 = vadd.f32 0.001143296, %v1246_v36 }
 0x89c   : > { %v1200_v8 = vadd.f32 0.05243302, %v1199_v63 }
 0x89d   : > { %v1212_v58 = vmul.f32 %v1211_v57, %v1194_v37  ;;  %v1237_v61 = vmul.f32 %v1236_v60, %v1234_v52  ;;  %v1248_v62 = vmul.f32 %v1247_v2, %v1234_v52  ;;  %v1189_v57 = vmul.f32 0.5, %v2094_v31 }
 0x89e   : > { %v1201_v15 = vmul.f32 %v1200_v8, %v1194_v37  ;;  %v1190_v60 = vmul.f32 0.5, %v2107_v41 }
 0x89f   : > { %v1213_v1 = vadd.f32 0.4994258, %v1212_v58  ;;  %v1238_v3 = vadd.f32 0.0036580483, %v1237_v61  ;;  %v1249_v4 = vadd.f32 0.014752088, %v1248_v62 }
 0x8a0   : > { %v1202_v19 = vadd.f32 0.18741608, %v1201_v15 }
 0x8a1   : > { %v1214_v5 = vmul.f32 %v1213_v1, %v1194_v37  ;;  %v1250_v7 = vmul.f32 %v1249_v4, %v1234_v52  ;;  %v1239_v11 = vmul.f32 %v1238_v3, %v1234_v52 }
 0x8a2   : > { %v1203_v24 = vmul.f32 %v1202_v19, %v1194_v37 }
 0x8a3   : > { %v1215_v9 = vadd.f32 1.0, %v1214_v5  ;;  %v1251_v12 = vadd.f32 0.112945676, %v1250_v7  ;;  %v1240_v16 = vadd.f32 0.05243302, %v1239_v11 }
 0x8a4   : > { %v1204_v30 = vadd.f32 1.1283791, %v1203_v24 }
 0x8a5   : > { %1676 = vrcp.f32 %v1215_v9  ;;  %v1252_v14 = vmul.f32 %v1251_v12, %v1234_v52  ;;  %v1241_v21 = vmul.f32 %v1240_v16, %v1234_v52  ;;  %v1227_v26 = vand.u32 2147483648, %v1215_v9 }
 0x8a6   : > { %v1225_v28 = vand.u32 2147483647, %v1215_v9  ;;  %vm1221_vm5 = vweird.f32 %v1215_v9  ;;  %v1205_v42 = vmul.f32 %v1204_v30, %v2100_v33 }
 0x8a7   : > { %v1253_v17 = vadd.f32 0.4994258, %v1252_v14  ;;  %v1242_v27 = vadd.f32 0.18741608, %v1241_v21  ;;  %v1228_v35 = vor.u32 1.1754944e-38, %v1227_v26 }
 0x8a8   : > { %vm1226_vm7 = vcmp.eq.f32.partialorder %v1225_v28, 8.507059e+37 }
 0x8a9   : > { %v1254_v18 = vmul.f32 %v1253_v17, %v1234_v52  ;;  %v1243_v38 = vmul.f32 %v1242_v27, %v1234_v52 }
 0x8ab   : > { %v1677_v10 = vpop.eup %1676  ;;  %v1255_v22 = vadd.f32 1.0, %v1254_v18  ;;  %v1244_v37 = vadd.f32 1.1283791, %v1243_v38 }
 0x8ac   : > { %v1217_v20 = vmul.f32 %v1677_v10, %v1215_v9  ;;  %vm1222_vm4 = vweird.f32 %v1677_v10 }
 0x8ad   : > { %1678 = vrcp.f32 %v1255_v22  ;;  %vm1223_vm6 = vmor %vm1221_vm5, %vm1222_vm4  ;;  %v1267_v44 = vand.u32 2147483648, %v1255_v22  ;;  %v1265_v48 = vand.u32 2147483647, %v1255_v22  ;;  %vm1261_vm9 = vweird.f32 %v1255_v22 }
 0x8ae   : > { %v1218_v23 = vsub.f32 1.0, %v1217_v20  ;;  %v1245_v52 = vmul.f32 %v1244_v37, %v2113_v55  ;;  %v1633_v55 = vld [vmem:[%s2188_s12] ss:$0 sm:$0xff] }
 0x8af   : > { %v1268_v51 = vor.u32 1.1754944e-38, %v1267_v44  ;;  %vm1266_vm11 = vcmp.eq.f32.partialorder %v1265_v48, 8.507059e+37 }
 0x8b0   : > { %v1219_v25 = vmul.f32 %v1677_v10, %v1218_v23 }
 0x8b2   : > { %v1220_v29 = vadd.f32 %v1677_v10, %v1219_v25 }
 0x8b3   : > { %v1679_v32 = vpop.eup %1678 }
 0x8b4   : > { %v1224_v34 = vsel %vm1223_vm6, %v1677_v10, %v1220_v29  ;;  %v1257_v39 = vmul.f32 %v1679_v32, %v1255_v22  ;;  %vm1262_vm8 = vweird.f32 %v1679_v32 }
 0x8b5   : > { %v1229_v40 = vsel %vm1226_vm7, %v1228_v35, %v1224_v34  ;;  %vm1263_vm10 = vmor %vm1261_vm9, %vm1262_vm8 }
 0x8b6   : > { %v1258_v43 = vsub.f32 1.0, %v1257_v39  ;;  %v1230_v45 = vmul.f32 %v1229_v40, %v1205_v42 }
 0x8b8   : > { %v1259_v47 = vmul.f32 %v1679_v32, %v1258_v43  ;;  %v1506_v53 = vclamps-f32 %v1230_v45, 1.0 }
 0x8ba   : > { %v1260_v49 = vadd.f32 %v1679_v32, %v1259_v47  ;;  %v1273_v36 = vadd.f32 1.0, %v1506_v53 }
 0x8bc   : > { %v1264_v54 = vsel %vm1263_vm10, %v1679_v32, %v1260_v49  ;;  %v1275_v58 = vmul.f32 %v1273_v36, %v1189_v57 }
 0x8bd   : > { %v1269_v0 = vsel %vm1266_vm11, %v1268_v51, %v1264_v54 }
 0x8be   : > { %v1270_v33 = vmul.f32 %v1269_v0, %v1245_v52 }
 0x8c0   : > { %v1507_v56 = vclamps-f32 %v1270_v33, 1.0 }
 0x8c2   : > { %v1274_v2 = vadd.f32 1.0, %v1507_v56 }
 0x8c4   : > { %v1276_v59 = vmul.f32 %v1274_v2, %v1190_v60 }
 0x8c6   : > { %v1277_v61 = vpack.c.bf16 %v1276_v59, %v1275_v58 }
 0x8c8   : > { %1354 = vmatmul.bf16.vlgmr.msrb.gmra.mxu3 %v1277_v61 }
 0x94b   : > { %v1355_v62 = vpop.f32.mrf.mxu3 }
 0x94c   : > { %v1356_v63 = vadd.f32 %v1633_v55, %v1355_v62 }
 0x94e   : > { %v1360_v1 = vadd.f32 %v1356_v63, %v2061_v46 }
 0x950   : > { %1362 = vst.msk [vmem:[%s449_s17] sm:$0xff] %vm462_vm0, %v1360_v1 }
 0x953   : > { %v1357_v31 = vpop.f32.mrf.mxu3 }
 0x954   : > { %v1358_v41 = vadd.f32 %v1633_v55, %v1357_v31 }
 0x956   : > { %v1361_v3 = vadd.f32 %v1358_v41, %v2066_v50 }
 0x958   : > { %1363 = vst.msk [vmem:[%s449_s17 + $0x8] sm:$0xff] %vm462_vm0, %v1361_v3 }
 0x959   : > { %1737 = shalt.err (!%p1734_p8)
}
 0x95a   : > { %s1794_s24 = smov 128   ;;  %s2198_s17 = smov 8  }
 0x95b   : > { %1564 = dma.vmem_to_hbm [thread:$0]  (%p1903_p5), %s1378_s0, 256, %s1380_s1, %s1365_s29, %s1794_s24, %s1794_s24, %s2198_s17  }
 0x95c PF: > { %p1576_p9 = scmp.ge.s32.totalorder %s1776_s28, 2  ;;  %s1394_s16 = sand.u32 1, %s1764_s25  }
 0x95d   : > { %s1395_s20 = scalar_lea.sflag [#allocation5], %s1394_s16 }
 0x95e   : > { %p1571_p10 = pnand %p1576_p9, %p1907_p6 }
 0x960   : > { %p1572_p11 = pneg %p1571_p10 }
 0x962   : > { %1759 = dma.done.wait (%p1572_p11), %s1395_s20, 256  }
 0x963   : > { %1761 = vsyncadd (%p1572_p11), %s1395_s20, 4294967040  ;;  %s2199_s30 = sld [smem:[#allocation9_spill]]  ;;  %p24_p12 = scmp.ge.s32.totalorder %s1890_s14, 4  }
 0x964   : > { %s2200_s25 = smov %s1768_s26  ;;  %s2201_s26 = smov %s1772_s27 }
 0x965   : > { %s2203_s28 = smov %s1890_s14  ;;  %26 = sbr.rel (!%p24_p12) target bundleno = 7 (0x7), region = 112 }
 0x969   : > { %s2202_s27 = smov %s2199_s30 }
 0x96a   :  { %1401 = vsyncpa [#allocation4], 1 }
 0x96b   :  { %1403 = vsyncpa [#allocation4 + $0x1], 1 }
 0x96c   :  { %1404 = vsyncpa [#allocation5], 1 }
 0x96d   :  { %1406 = vsyncpa [#allocation5 + $0x1], 1 }

</bundles_post_ra>
